<compile_context>
chip_gen: v7x
topology: tpu7x:2x2x1
jax: 0.10.0
libtpu: 0.0.40
codegen_flags: <defaults>
</compile_context>

<pallas_src>
import math
from functools import partial

import jax
import jax.numpy as jnp
from jax.experimental import pallas as pl
from jax.experimental.pallas import tpu as pltpu

VMEM = pltpu.MemorySpace.VMEM


# ---------------------------------------------------------------------------
# Pallas kernels
# ---------------------------------------------------------------------------
def _conv_pool_kernel(a_ref, w_ref, b_ref, o_ref, *, n_pool):
    """pooled = max_q relu(A[q] @ W + b).  A bf16 (n_pool, M, Kp), out bf16 (M, 128)."""
    w = w_ref[...]
    b = b_ref[...]
    pooled = None
    for q in range(n_pool):                      # static unroll, q is a Python int
        y = jnp.dot(a_ref[q], w, preferred_element_type=jnp.float32) + b
        y = jnp.maximum(y, 0.0)
        pooled = y if pooled is None else jnp.maximum(pooled, y)
    o_ref[...] = pooled.astype(o_ref.dtype)


def _conv_pool_fc_kernel(a_ref, w2_ref, b2_ref, wf1_ref, bf1_ref, wf2_ref, bf2_ref,
                         wf3_ref, bf3_ref, o_ref, *, n_pool, n_pos, batch):
    """Fused conv2-GEMM + ReLU + 2x2 max-pool + flatten + 3-layer FC head."""
    w2 = w2_ref[...]
    b2 = b2_ref[...]
    pooled = None                                # (n_pos*batch, 128), rows ordered (p, b)
    for q in range(n_pool):
        y = jnp.dot(a_ref[q], w2, preferred_element_type=jnp.float32) + b2
        y = jnp.maximum(y, 0.0)
        pooled = y if pooled is None else jnp.maximum(pooled, y)
    # Flatten (p, b) rows x channel lanes -> (batch, n_pos*128) lanes ordered (p, c).
    # wf1 was repacked at init to the same (p, c) row order, so this equals torch's
    # NCHW flatten followed by fc1.
    feat = jnp.concatenate(
        [pooled[p * batch:(p + 1) * batch, :] for p in range(n_pos)], axis=1)
    h = jnp.dot(feat.astype(jnp.bfloat16), wf1_ref[...],
                preferred_element_type=jnp.float32) + bf1_ref[...]
    h = jnp.maximum(h, 0.0)
    h = jnp.dot(h.astype(jnp.bfloat16), wf2_ref[...],
                preferred_element_type=jnp.float32) + bf2_ref[...]
    h = jnp.maximum(h, 0.0)
    o_ref[...] = jnp.dot(h.astype(jnp.bfloat16), wf3_ref[...],
                         preferred_element_type=jnp.float32) + bf3_ref[...]


# ---------------------------------------------------------------------------
# Pallas wrappers
# ---------------------------------------------------------------------------
def _vmem_spec():
    return pl.BlockSpec(memory_space=VMEM)


def _bytes(*arrs):
    return int(sum(a.size * jnp.dtype(a.dtype).itemsize for a in arrs))


def conv_pool(a, w, b):
    """Fused conv-as-GEMM + ReLU + 2x2 max-pool.  a: (4, M, Kp) bf16 -> (M, 128) bf16."""
    n_pool, m, kp = a.shape
    np_ = w.shape[1]
    return pl.pallas_call(
        partial(_conv_pool_kernel, n_pool=n_pool),
        out_shape=jax.ShapeDtypeStruct((m, np_), jnp.bfloat16),
        in_specs=[_vmem_spec()] * 3,
        out_specs=_vmem_spec(),
        cost_estimate=pl.CostEstimate(
            flops=2 * n_pool * m * kp * np_, transcendentals=0,
            bytes_accessed=_bytes(a, w, b) + m * np_ * 2),
    )(a, w, b)


def conv_pool_fc(a2, w2, b2, wf1, bf1, wf2, bf2, wf3, bf3, *, batch, n_pos):
    """Single fused pallas_call: conv2 + ReLU + pool + flatten + FC head -> (B, 128)."""
    n_pool, m, kp = a2.shape
    np_ = wf3.shape[1]
    flops = (2 * n_pool * m * kp * w2.shape[1]
             + 2 * batch * (wf1.shape[0] * wf1.shape[1]
                            + wf2.shape[0] * wf2.shape[1]
                            + wf3.shape[0] * wf3.shape[1]))
    args = (a2, w2, b2, wf1, bf1, wf2, bf2, wf3, bf3)
    return pl.pallas_call(
        partial(_conv_pool_fc_kernel, n_pool=n_pool, n_pos=n_pos, batch=batch),
        out_shape=jax.ShapeDtypeStruct((batch, np_), jnp.float32),
        in_specs=[_vmem_spec()] * len(args),
        out_specs=_vmem_spec(),
        cost_estimate=pl.CostEstimate(
            flops=flops, transcendentals=0,
            bytes_accessed=_bytes(*args) + batch * np_ * 4),
    )(*args)


# ---------------------------------------------------------------------------
# XLA glue: im2col (split by pool position), padding/casts, weight packing
# ---------------------------------------------------------------------------
def _im2col_pooled(x, k, *, batch_minor=False):
    """im2col for a valid k x k conv followed by a 2x2/2 max-pool, separated by pool
    position.  Returns (4, rows, k*k*C) with patch cols ordered (dy, dx, c) and rows
    ordered (b, ho, wo) (default) or (ho, wo, b) (batch_minor=True)."""
    B, H, W, C = x.shape
    Ho, Wo = (H - k + 1) // 2, (W - k + 1) // 2
    outs = []
    for py in range(2):
        for px in range(2):
            cols = []
            for dy in range(k):
                for dx in range(k):
                    cols.append(x[:, py + dy: py + dy + 2 * Ho: 2,
                                  px + dx: px + dx + 2 * Wo: 2, :])
            patch = jnp.concatenate(cols, axis=-1)          # (B, Ho, Wo, k*k*C)
            if batch_minor:
                patch = jnp.transpose(patch, (1, 2, 0, 3))  # (Ho, Wo, B, k*k*C)
            outs.append(patch.reshape(-1, k * k * C))
    return jnp.stack(outs), (Ho, Wo)


def _pad_cast_bf16(a, kp):
    k = a.shape[-1]
    if k != kp:
        a = jnp.pad(a, [(0, 0)] * (a.ndim - 1) + [(0, kp - k)])
    return a.astype(jnp.bfloat16)


def _pad_weight(w, kp, np_):
    k, n = w.shape
    return jnp.zeros((kp, np_), jnp.float32).at[:k, :n].set(w).astype(jnp.bfloat16)


def _pad_bias(b, np_):
    return jnp.zeros((1, np_), jnp.float32).at[0, :b.shape[0]].set(b)


def _pack_fc1_weight(wf1, n_chan, n_pos, chan_pad, out_pad):
    """Repack fc1's weight from torch NCHW-flatten row order (c*n_pos + p) to
    (p*chan_pad + c) so the fused kernel consumes the pooled conv2 output
    (rows = spatial pos, lanes = channel) without an in-kernel transpose."""
    n_out = wf1.shape[1]
    w = wf1.reshape(n_chan, n_pos, n_out).transpose(1, 0, 2)     # (p, c, n_out)
    w = jnp.pad(w, ((0, 0), (0, chan_pad - n_chan), (0, 0)))
    w = w.reshape(n_pos * chan_pad, n_out)
    return jnp.pad(w, ((0, 0), (0, out_pad - n_out))).astype(jnp.bfloat16)


def init_lenet_params(key, embed_dim):
    ks = jax.random.split(key, 5)

    def raw(k, fan_in, fan_out):
        w = jax.random.normal(k, (fan_in, fan_out), jnp.float32) / math.sqrt(fan_in)
        return w, jnp.zeros((fan_out,), jnp.float32)

    w1, b1 = raw(ks[0], 5 * 5 * 3, 6)          # conv1 as GEMM: (dy,dx,cin) x cout
    w2, b2 = raw(ks[1], 5 * 5 * 6, 16)         # conv2 as GEMM
    wf1, bf1 = raw(ks[2], 16 * 5 * 5, 120)     # torch NCHW-flatten row order
    wf2, bf2 = raw(ks[3], 120, 84)
    wf3, bf3 = raw(ks[4], 84, embed_dim)

    # zero-padded bf16 weight packs -> lane-dense K and N for every Pallas GEMM
    return {
        'w1': _pad_weight(w1, 128, 128), 'b1': _pad_bias(b1, 128),
        'w2': _pad_weight(w2, 256, 128), 'b2': _pad_bias(b2, 128),
        'wf1': _pack_fc1_weight(wf1, 16, 25, 128, 128), 'bf1': _pad_bias(bf1, 128),
        'wf2': _pad_weight(wf2, 128, 128), 'bf2': _pad_bias(bf2, 128),
        'wf3': _pad_weight(wf3, 128, 128), 'bf3': _pad_bias(bf3, 128),
    }


# ---------------------------------------------------------------------------
# Forward
# ---------------------------------------------------------------------------
def client_model_noise_forward(x_nchw, params, key, *, severity, embed_dim):
    # TODO(synk): torch.randn_like advances global RNG state; here the noise is a pure
    # function of `key`, drawn in the XLA wrapper where it fuses into the im2col gather.
    x = jnp.transpose(x_nchw, (0, 2, 3, 1))                    # NHWC
    B = x.shape[0]
    noise = jax.random.normal(key, x.shape, x.dtype)
    corr = x + noise * jnp.float32(severity)

    # conv1 + ReLU + pool  (fused Pallas kernel 1)
    a1, (h1, w1_) = _im2col_pooled(corr, 5)                    # (4, B*14*14, 75)
    a1 = _pad_cast_bf16(a1, 128)
    pooled1 = conv_pool(a1, params['w1'], params['b1'])        # (B*196, 128) bf16
    p1 = pooled1.reshape(B, h1, w1_, 128)[..., :6]             # (B,14,14,6) bf16

    # conv2 + ReLU + pool + flatten + FC head  (fused Pallas kernel 2)
    a2, (h2, w2_) = _im2col_pooled(p1, 5, batch_minor=True)    # (4, 25*B, 150)
    a2 = _pad_cast_bf16(a2, 256)
    out = conv_pool_fc(a2, params['w2'], params['b2'],
                       params['wf1'], params['bf1'],
                       params['wf2'], params['bf2'],
                       params['wf3'], params['bf3'],
                       batch=B, n_pos=h2 * w2_)                # (B, 128) lane-dense
    return out[:, :embed_dim]


# ---------------------------------------------------------------------------
if __name__ == "__main__":
    SEVERITY_TABLE = [0.0, 0.1, 0.2, 0.4, 2 / 3, 1.0, 1.5]
    corruption_severity_idx = 3          # -> 0.4, as ClientModelNoise.__init__ maps it
    embed_dim = 32

    key = jax.random.PRNGKey(0)
    xkey, pkey, nkey = jax.random.split(key, 3)
    x = jax.random.normal(xkey, (2, 3, 32, 32), jnp.float32)   # NCHW like torch
    params = init_lenet_params(pkey, embed_dim)

    fwd = jax.jit(partial(client_model_noise_forward,
                          severity=SEVERITY_TABLE[corruption_severity_idx],
                          embed_dim=embed_dim))
    out = fwd(x, params, nkey)
    out = jax.block_until_ready(out)
    assert out.shape == (2, embed_dim)
    assert bool(jnp.all(jnp.isfinite(out)))
    print("KERNEL_OK")
</pallas_src>

<mosaic_0001>
module attributes {stable_mosaic.version = 11 : i64} {
  func.func @_conv_pool_kernel(%arg0: memref<4x392x128xbf16, #tpu.memory_space<vmem>>, %arg1: memref<128x128xbf16, #tpu.memory_space<vmem>>, %arg2: memref<1x128xf32, #tpu.memory_space<vmem>>, %arg3: memref<392x128xbf16, #tpu.memory_space<vmem>>) attributes {dimension_semantics = [], scalar_prefetch = 0 : i64, scratch_operands = 0 : i64, tpu.core_type = #tpu.core_type<tc>} {
    %c0 = arith.constant 0 : index
    %c0_0 = arith.constant 0 : index
    %0 = vector.load %arg1[%c0, %c0_0] : memref<128x128xbf16, #tpu.memory_space<vmem>>, vector<128x128xbf16>
    %c0_1 = arith.constant 0 : index
    %c0_2 = arith.constant 0 : index
    %1 = vector.load %arg2[%c0_1, %c0_2] : memref<1x128xf32, #tpu.memory_space<vmem>>, vector<1x128xf32>
    %c0_3 = arith.constant 0 : index
    %c0_4 = arith.constant 0 : index
    %c0_5 = arith.constant 0 : index
    %2 = vector.load %arg0[%c0_3, %c0_4, %c0_5] : memref<4x392x128xbf16, #tpu.memory_space<vmem>>, vector<1x392x128xbf16>
    %3 = vector.shape_cast %2 : vector<1x392x128xbf16> to vector<392x128xbf16>
    %cst = arith.constant dense<0.000000e+00> : vector<392x128xf32>
    %4 = tpu.matmul %3, %0, %cst {dimension_numbers = #tpu.dot_dimension_numbers<[1], [0], [0], [1], [0, 0, 1, 1], [], []>} : vector<392x128xbf16>, vector<128x128xbf16>, vector<392x128xf32> -> vector<392x128xf32>
    %5 = vector.broadcast %1 : vector<1x128xf32> to vector<392x128xf32>
    %6 = arith.addf %4, %5 : vector<392x128xf32>
    %cst_6 = arith.constant 0.000000e+00 : f32
    %7 = vector.broadcast %cst_6 : f32 to vector<392x128xf32>
    %8 = arith.maximumf %6, %7 : vector<392x128xf32>
    %c1 = arith.constant 1 : index
    %c0_7 = arith.constant 0 : index
    %c0_8 = arith.constant 0 : index
    %9 = vector.load %arg0[%c1, %c0_7, %c0_8] : memref<4x392x128xbf16, #tpu.memory_space<vmem>>, vector<1x392x128xbf16>
    %10 = vector.shape_cast %9 : vector<1x392x128xbf16> to vector<392x128xbf16>
    %cst_9 = arith.constant dense<0.000000e+00> : vector<392x128xf32>
    %11 = tpu.matmul %10, %0, %cst_9 {dimension_numbers = #tpu.dot_dimension_numbers<[1], [0], [0], [1], [0, 0, 1, 1], [], []>} : vector<392x128xbf16>, vector<128x128xbf16>, vector<392x128xf32> -> vector<392x128xf32>
    %12 = vector.broadcast %1 : vector<1x128xf32> to vector<392x128xf32>
    %13 = arith.addf %11, %12 : vector<392x128xf32>
    %cst_10 = arith.constant 0.000000e+00 : f32
    %14 = vector.broadcast %cst_10 : f32 to vector<392x128xf32>
    %15 = arith.maximumf %13, %14 : vector<392x128xf32>
    %16 = arith.maximumf %8, %15 : vector<392x128xf32>
    %c2 = arith.constant 2 : index
    %c0_11 = arith.constant 0 : index
    %c0_12 = arith.constant 0 : index
    %17 = vector.load %arg0[%c2, %c0_11, %c0_12] : memref<4x392x128xbf16, #tpu.memory_space<vmem>>, vector<1x392x128xbf16>
    %18 = vector.shape_cast %17 : vector<1x392x128xbf16> to vector<392x128xbf16>
    %cst_13 = arith.constant dense<0.000000e+00> : vector<392x128xf32>
    %19 = tpu.matmul %18, %0, %cst_13 {dimension_numbers = #tpu.dot_dimension_numbers<[1], [0], [0], [1], [0, 0, 1, 1], [], []>} : vector<392x128xbf16>, vector<128x128xbf16>, vector<392x128xf32> -> vector<392x128xf32>
    %20 = vector.broadcast %1 : vector<1x128xf32> to vector<392x128xf32>
    %21 = arith.addf %19, %20 : vector<392x128xf32>
    %cst_14 = arith.constant 0.000000e+00 : f32
    %22 = vector.broadcast %cst_14 : f32 to vector<392x128xf32>
    %23 = arith.maximumf %21, %22 : vector<392x128xf32>
    %24 = arith.maximumf %16, %23 : vector<392x128xf32>
    %c3 = arith.constant 3 : index
    %c0_15 = arith.constant 0 : index
    %c0_16 = arith.constant 0 : index
    %25 = vector.load %arg0[%c3, %c0_15, %c0_16] : memref<4x392x128xbf16, #tpu.memory_space<vmem>>, vector<1x392x128xbf16>
    %26 = vector.shape_cast %25 : vector<1x392x128xbf16> to vector<392x128xbf16>
    %cst_17 = arith.constant dense<0.000000e+00> : vector<392x128xf32>
    %27 = tpu.matmul %26, %0, %cst_17 {dimension_numbers = #tpu.dot_dimension_numbers<[1], [0], [0], [1], [0, 0, 1, 1], [], []>} : vector<392x128xbf16>, vector<128x128xbf16>, vector<392x128xf32> -> vector<392x128xf32>
    %28 = vector.broadcast %1 : vector<1x128xf32> to vector<392x128xf32>
    %29 = arith.addf %27, %28 : vector<392x128xf32>
    %cst_18 = arith.constant 0.000000e+00 : f32
    %30 = vector.broadcast %cst_18 : f32 to vector<392x128xf32>
    %31 = arith.maximumf %29, %30 : vector<392x128xf32>
    %32 = arith.maximumf %24, %31 : vector<392x128xf32>
    %33 = arith.truncf %32 : vector<392x128xf32> to vector<392x128xbf16>
    %c0_19 = arith.constant 0 : index
    %c0_20 = arith.constant 0 : index
    %34 = vector.load %arg3[%c0_19, %c0_20] : memref<392x128xbf16, #tpu.memory_space<vmem>>, vector<392x128xbf16>
    tpu.vector_store %arg3[%c0_19, %c0_20], %33 {strides = array<i32>} : memref<392x128xbf16, #tpu.memory_space<vmem>>, vector<392x128xbf16>,
    return
  }
}

module attributes {stable_mosaic.version = 11 : i64} {
  func.func @_conv_pool_fc_kernel(%arg0: memref<4x50x256xbf16, #tpu.memory_space<vmem>>, %arg1: memref<256x128xbf16, #tpu.memory_space<vmem>>, %arg2: memref<1x128xf32, #tpu.memory_space<vmem>>, %arg3: memref<3200x128xbf16, #tpu.memory_space<vmem>>, %arg4: memref<1x128xf32, #tpu.memory_space<vmem>>, %arg5: memref<128x128xbf16, #tpu.memory_space<vmem>>, %arg6: memref<1x128xf32, #tpu.memory_space<vmem>>, %arg7: memref<128x128xbf16, #tpu.memory_space<vmem>>, %arg8: memref<1x128xf32, #tpu.memory_space<vmem>>, %arg9: memref<2x128xf32, #tpu.memory_space<vmem>>) attributes {dimension_semantics = [], scalar_prefetch = 0 : i64, scratch_operands = 0 : i64, tpu.core_type = #tpu.core_type<tc>} {
    %c0 = arith.constant 0 : index
    %c0_0 = arith.constant 0 : index
    %0 = vector.load %arg1[%c0, %c0_0] : memref<256x128xbf16, #tpu.memory_space<vmem>>, vector<256x128xbf16>
    %c0_1 = arith.constant 0 : index
    %c0_2 = arith.constant 0 : index
    %1 = vector.load %arg2[%c0_1, %c0_2] : memref<1x128xf32, #tpu.memory_space<vmem>>, vector<1x128xf32>
    %c0_3 = arith.constant 0 : index
    %c0_4 = arith.constant 0 : index
    %c0_5 = arith.constant 0 : index
    %2 = vector.load %arg0[%c0_3, %c0_4, %c0_5] : memref<4x50x256xbf16, #tpu.memory_space<vmem>>, vector<1x50x256xbf16>
    %3 = vector.shape_cast %2 : vector<1x50x256xbf16> to vector<50x256xbf16>
    %cst = arith.constant dense<0.000000e+00> : vector<50x128xf32>
    %4 = tpu.matmul %3, %0, %cst {dimension_numbers = #tpu.dot_dimension_numbers<[1], [0], [0], [1], [0, 0, 1, 1], [], []>} : vector<50x256xbf16>, vector<256x128xbf16>, vector<50x128xf32> -> vector<50x128xf32>
    %5 = vector.broadcast %1 : vector<1x128xf32> to vector<50x128xf32>
    %6 = arith.addf %4, %5 : vector<50x128xf32>
    %cst_6 = arith.constant 0.000000e+00 : f32
    %7 = vector.broadcast %cst_6 : f32 to vector<50x128xf32>
    %8 = arith.maximumf %6, %7 : vector<50x128xf32>
    %c1 = arith.constant 1 : index
    %c0_7 = arith.constant 0 : index
    %c0_8 = arith.constant 0 : index
    %9 = vector.load %arg0[%c1, %c0_7, %c0_8] : memref<4x50x256xbf16, #tpu.memory_space<vmem>>, vector<1x50x256xbf16>
    %10 = vector.shape_cast %9 : vector<1x50x256xbf16> to vector<50x256xbf16>
    %cst_9 = arith.constant dense<0.000000e+00> : vector<50x128xf32>
    %11 = tpu.matmul %10, %0, %cst_9 {dimension_numbers = #tpu.dot_dimension_numbers<[1], [0], [0], [1], [0, 0, 1, 1], [], []>} : vector<50x256xbf16>, vector<256x128xbf16>, vector<50x128xf32> -> vector<50x128xf32>
    %12 = vector.broadcast %1 : vector<1x128xf32> to vector<50x128xf32>
    %13 = arith.addf %11, %12 : vector<50x128xf32>
    %cst_10 = arith.constant 0.000000e+00 : f32
    %14 = vector.broadcast %cst_10 : f32 to vector<50x128xf32>
    %15 = arith.maximumf %13, %14 : vector<50x128xf32>
    %16 = arith.maximumf %8, %15 : vector<50x128xf32>
    %c2 = arith.constant 2 : index
    %c0_11 = arith.constant 0 : index
    %c0_12 = arith.constant 0 : index
    %17 = vector.load %arg0[%c2, %c0_11, %c0_12] : memref<4x50x256xbf16, #tpu.memory_space<vmem>>, vector<1x50x256xbf16>
    %18 = vector.shape_cast %17 : vector<1x50x256xbf16> to vector<50x256xbf16>
    %cst_13 = arith.constant dense<0.000000e+00> : vector<50x128xf32>
    %19 = tpu.matmul %18, %0, %cst_13 {dimension_numbers = #tpu.dot_dimension_numbers<[1], [0], [0], [1], [0, 0, 1, 1], [], []>} : vector<50x256xbf16>, vector<256x128xbf16>, vector<50x128xf32> -> vector<50x128xf32>
    %20 = vector.broadcast %1 : vector<1x128xf32> to vector<50x128xf32>
    %21 = arith.addf %19, %20 : vector<50x128xf32>
    %cst_14 = arith.constant 0.000000e+00 : f32
    %22 = vector.broadcast %cst_14 : f32 to vector<50x128xf32>
    %23 = arith.maximumf %21, %22 : vector<50x128xf32>
    %24 = arith.maximumf %16, %23 : vector<50x128xf32>
    %c3 = arith.constant 3 : index
    %c0_15 = arith.constant 0 : index
    %c0_16 = arith.constant 0 : index
    %25 = vector.load %arg0[%c3, %c0_15, %c0_16] : memref<4x50x256xbf16, #tpu.memory_space<vmem>>, vector<1x50x256xbf16>
    %26 = vector.shape_cast %25 : vector<1x50x256xbf16> to vector<50x256xbf16>
    %cst_17 = arith.constant dense<0.000000e+00> : vector<50x128xf32>
    %27 = tpu.matmul %26, %0, %cst_17 {dimension_numbers = #tpu.dot_dimension_numbers<[1], [0], [0], [1], [0, 0, 1, 1], [], []>} : vector<50x256xbf16>, vector<256x128xbf16>, vector<50x128xf32> -> vector<50x128xf32>
    %28 = vector.broadcast %1 : vector<1x128xf32> to vector<50x128xf32>
    %29 = arith.addf %27, %28 : vector<50x128xf32>
    %cst_18 = arith.constant 0.000000e+00 : f32
    %30 = vector.broadcast %cst_18 : f32 to vector<50x128xf32>
    %31 = arith.maximumf %29, %30 : vector<50x128xf32>
    %32 = arith.maximumf %24, %31 : vector<50x128xf32>
    %33 = vector.extract_strided_slice %32 {offsets = [0, 0], sizes = [2, 128], strides = [1, 1]} : vector<50x128xf32> to vector<2x128xf32>
    %34 = vector.extract_strided_slice %32 {offsets = [2, 0], sizes = [2, 128], strides = [1, 1]} : vector<50x128xf32> to vector<2x128xf32>
    %35 = vector.extract_strided_slice %32 {offsets = [4, 0], sizes = [2, 128], strides = [1, 1]} : vector<50x128xf32> to vector<2x128xf32>
    %36 = vector.extract_strided_slice %32 {offsets = [6, 0], sizes = [2, 128], strides = [1, 1]} : vector<50x128xf32> to vector<2x128xf32>
    %37 = vector.extract_strided_slice %32 {offsets = [8, 0], sizes = [2, 128], strides = [1, 1]} : vector<50x128xf32> to vector<2x128xf32>
    %38 = vector.extract_strided_slice %32 {offsets = [10, 0], sizes = [2, 128], strides = [1, 1]} : vector<50x128xf32> to vector<2x128xf32>
    %39 = vector.extract_strided_slice %32 {offsets = [12, 0], sizes = [2, 128], strides = [1, 1]} : vector<50x128xf32> to vector<2x128xf32>
    %40 = vector.extract_strided_slice %32 {offsets = [14, 0], sizes = [2, 128], strides = [1, 1]} : vector<50x128xf32> to vector<2x128xf32>
    %41 = vector.extract_strided_slice %32 {offsets = [16, 0], sizes = [2, 128], strides = [1, 1]} : vector<50x128xf32> to vector<2x128xf32>
    %42 = vector.extract_strided_slice %32 {offsets = [18, 0], sizes = [2, 128], strides = [1, 1]} : vector<50x128xf32> to vector<2x128xf32>
    %43 = vector.extract_strided_slice %32 {offsets = [20, 0], sizes = [2, 128], strides = [1, 1]} : vector<50x128xf32> to vector<2x128xf32>
    %44 = vector.extract_strided_slice %32 {offsets = [22, 0], sizes = [2, 128], strides = [1, 1]} : vector<50x128xf32> to vector<2x128xf32>
    %45 = vector.extract_strided_slice %32 {offsets = [24, 0], sizes = [2, 128], strides = [1, 1]} : vector<50x128xf32> to vector<2x128xf32>
    %46 = vector.extract_strided_slice %32 {offsets = [26, 0], sizes = [2, 128], strides = [1, 1]} : vector<50x128xf32> to vector<2x128xf32>
    %47 = vector.extract_strided_slice %32 {offsets = [28, 0], sizes = [2, 128], strides = [1, 1]} : vector<50x128xf32> to vector<2x128xf32>
    %48 = vector.extract_strided_slice %32 {offsets = [30, 0], sizes = [2, 128], strides = [1, 1]} : vector<50x128xf32> to vector<2x128xf32>
    %49 = vector.extract_strided_slice %32 {offsets = [32, 0], sizes = [2, 128], strides = [1, 1]} : vector<50x128xf32> to vector<2x128xf32>
    %50 = vector.extract_strided_slice %32 {offsets = [34, 0], sizes = [2, 128], strides = [1, 1]} : vector<50x128xf32> to vector<2x128xf32>
    %51 = vector.extract_strided_slice %32 {offsets = [36, 0], sizes = [2, 128], strides = [1, 1]} : vector<50x128xf32> to vector<2x128xf32>
    %52 = vector.extract_strided_slice %32 {offsets = [38, 0], sizes = [2, 128], strides = [1, 1]} : vector<50x128xf32> to vector<2x128xf32>
    %53 = vector.extract_strided_slice %32 {offsets = [40, 0], sizes = [2, 128], strides = [1, 1]} : vector<50x128xf32> to vector<2x128xf32>
    %54 = vector.extract_strided_slice %32 {offsets = [42, 0], sizes = [2, 128], strides = [1, 1]} : vector<50x128xf32> to vector<2x128xf32>
    %55 = vector.extract_strided_slice %32 {offsets = [44, 0], sizes = [2, 128], strides = [1, 1]} : vector<50x128xf32> to vector<2x128xf32>
    %56 = vector.extract_strided_slice %32 {offsets = [46, 0], sizes = [2, 128], strides = [1, 1]} : vector<50x128xf32> to vector<2x128xf32>
    %57 = vector.extract_strided_slice %32 {offsets = [48, 0], sizes = [2, 128], strides = [1, 1]} : vector<50x128xf32> to vector<2x128xf32>
    %58 = tpu.concatenate %33, %34, %35, %36, %37, %38, %39, %40, %41, %42, %43, %44, %45, %46, %47, %48 in 1 : vector<2x128xf32>, vector<2x128xf32>, vector<2x128xf32>, vector<2x128xf32>, vector<2x128xf32>, vector<2x128xf32>, vector<2x128xf32>, vector<2x128xf32>, vector<2x128xf32>, vector<2x128xf32>, vector<2x128xf32>, vector<2x128xf32>, vector<2x128xf32>, vector<2x128xf32>, vector<2x128xf32>, vector<2x128xf32> -> vector<2x2048xf32>
    %59 = tpu.concatenate %49, %50, %51, %52, %53, %54, %55, %56, %57 in 1 : vector<2x128xf32>, vector<2x128xf32>, vector<2x128xf32>, vector<2x128xf32>, vector<2x128xf32>, vector<2x128xf32>, vector<2x128xf32>, vector<2x128xf32>, vector<2x128xf32> -> vector<2x1152xf32>
    %60 = tpu.concatenate %58, %59 in 1 : vector<2x2048xf32>, vector<2x1152xf32> -> vector<2x3200xf32>
    %61 = arith.truncf %60 : vector<2x3200xf32> to vector<2x3200xbf16>
    %c0_19 = arith.constant 0 : index
    %c0_20 = arith.constant 0 : index
    %62 = vector.load %arg3[%c0_19, %c0_20] : memref<3200x128xbf16, #tpu.memory_space<vmem>>, vector<3200x128xbf16>
    %cst_21 = arith.constant dense<0.000000e+00> : vector<2x128xf32>
    %63 = tpu.matmul %61, %62, %cst_21 {dimension_numbers = #tpu.dot_dimension_numbers<[1], [0], [0], [1], [0, 0, 1, 1], [], []>} : vector<2x3200xbf16>, vector<3200x128xbf16>, vector<2x128xf32> -> vector<2x128xf32>
    %c0_22 = arith.constant 0 : index
    %c0_23 = arith.constant 0 : index
    %64 = vector.load %arg4[%c0_22, %c0_23] : memref<1x128xf32, #tpu.memory_space<vmem>>, vector<1x128xf32>
    %65 = vector.broadcast %64 : vector<1x128xf32> to vector<2x128xf32>
    %66 = arith.addf %63, %65 : vector<2x128xf32>
    %cst_24 = arith.constant 0.000000e+00 : f32
    %67 = vector.broadcast %cst_24 : f32 to vector<2x128xf32>
    %68 = arith.maximumf %66, %67 : vector<2x128xf32>
    %69 = arith.truncf %68 : vector<2x128xf32> to vector<2x128xbf16>
    %c0_25 = arith.constant 0 : index
    %c0_26 = arith.constant 0 : index
    %70 = vector.load %arg5[%c0_25, %c0_26] : memref<128x128xbf16, #tpu.memory_space<vmem>>, vector<128x128xbf16>
    %cst_27 = arith.constant dense<0.000000e+00> : vector<2x128xf32>
    %71 = tpu.matmul %69, %70, %cst_27 {dimension_numbers = #tpu.dot_dimension_numbers<[1], [0], [0], [1], [0, 0, 1, 1], [], []>} : vector<2x128xbf16>, vector<128x128xbf16>, vector<2x128xf32> -> vector<2x128xf32>
    %c0_28 = arith.constant 0 : index
    %c0_29 = arith.constant 0 : index
    %72 = vector.load %arg6[%c0_28, %c0_29] : memref<1x128xf32, #tpu.memory_space<vmem>>, vector<1x128xf32>
    %73 = vector.broadcast %72 : vector<1x128xf32> to vector<2x128xf32>
    %74 = arith.addf %71, %73 : vector<2x128xf32>
    %cst_30 = arith.constant 0.000000e+00 : f32
    %75 = vector.broadcast %cst_30 : f32 to vector<2x128xf32>
    %76 = arith.maximumf %74, %75 : vector<2x128xf32>
    %77 = arith.truncf %76 : vector<2x128xf32> to vector<2x128xbf16>
    %c0_31 = arith.constant 0 : index
    %c0_32 = arith.constant 0 : index
    %78 = vector.load %arg7[%c0_31, %c0_32] : memref<128x128xbf16, #tpu.memory_space<vmem>>, vector<128x128xbf16>
    %cst_33 = arith.constant dense<0.000000e+00> : vector<2x128xf32>
    %79 = tpu.matmul %77, %78, %cst_33 {dimension_numbers = #tpu.dot_dimension_numbers<[1], [0], [0], [1], [0, 0, 1, 1], [], []>} : vector<2x128xbf16>, vector<128x128xbf16>, vector<2x128xf32> -> vector<2x128xf32>
    %c0_34 = arith.constant 0 : index
    %c0_35 = arith.constant 0 : index
    %80 = vector.load %arg8[%c0_34, %c0_35] : memref<1x128xf32, #tpu.memory_space<vmem>>, vector<1x128xf32>
    %81 = vector.broadcast %80 : vector<1x128xf32> to vector<2x128xf32>
    %82 = arith.addf %79, %81 : vector<2x128xf32>
    %c0_36 = arith.constant 0 : index
    %c0_37 = arith.constant 0 : index
    %83 = vector.load %arg9[%c0_36, %c0_37] : memref<2x128xf32, #tpu.memory_space<vmem>>, vector<2x128xf32>
    tpu.vector_store %arg9[%c0_36, %c0_37], %82 {strides = array<i32>} : memref<2x128xf32, #tpu.memory_space<vmem>>, vector<2x128xf32>,
    return
  }
}

</mosaic_0001>

<bundles_post_ra>
// kernel: client_model_noise_forward.2
= control target key start
LH: loop header
LB: loop body
LE: loop exit
PB: predicated region body
PF: predicated region fallthrough
CT: control target
= control target key end

     0   :  { %v3603_v0 = vmov 0.0   ;;  %vm3604_vm0 = vmmov 0   ;;  %s4614_s1 = inlined_call_operand.vmem [shape: bf16[128,128], index: 1, kind: input, shape index: {}]   ;;  %s4615_s0 = inlined_call_operand.vmem [shape: bf16[4,392,128], index: 0, kind: input, shape index: {}]   ;;  %s4616_s2 = inlined_call_operand.vmem [shape: f32[1,128], index: 2, kind: input, shape index: {}]   ;;  %s4617_s3 = inlined_call_operand.vmem [shape: bf16[392,128], index: 3, kind: output, shape index: {}]  }
   0x1   :  { %3027 = vmatprep.subr.bf16.mxu0 %v3603_v0  ;;  %3143 = vmatprep.subr.bf16.mxu1 %v3603_v0  ;;  %v3493_v1 = vld [vmem:[%s4614_s1] sm:$0xff]   ;;  %v3494_v2 = vld [vmem:[%s4614_s1 + $0x8] sm:$0xff]   ;;  %v3495_v3 = vld [vmem:[%s4614_s1 + $0x10] sm:$0xff]  }
   0x2   :  { %3043 = vmatprep.mubr.msk.bf16.mxu0 %vm3604_vm0, %v3603_v0  ;;  %3159 = vmatprep.mubr.msk.bf16.mxu1 %vm3604_vm0, %v3603_v0  ;;  %v3496_v4 = vld [vmem:[%s4614_s1 + $0x18] sm:$0xff]   ;;  %v3497_v5 = vld [vmem:[%s4614_s1 + $0x20] sm:$0xff]   ;;  %v3498_v6 = vld [vmem:[%s4614_s1 + $0x28] sm:$0xff]  }
   0x3   :  { %3028 = vmatpush3.bf16.msra.mxu0 %v3493_v1  ;;  %3144 = vmatpush3.bf16.msra.mxu1 %v3493_v1  ;;  %v3499_v7 = vld [vmem:[%s4614_s1 + $0x30] sm:$0xff]   ;;  %v3500_v8 = vld [vmem:[%s4614_s1 + $0x38] sm:$0xff]   ;;  %v3501_v9 = vld [vmem:[%s4615_s0] sm:$0xff]  }
   0x4   :  { %3029 = vmatprep.subr.bf16.mxu0 %v3603_v0  ;;  %3145 = vmatprep.subr.bf16.mxu1 %v3603_v0  ;;  %v3502_v10 = vld [vmem:[%s4615_s0 + $0xc4] sm:$0xff]   ;;  %v3504_v12 = vld [vmem:[%s4615_s0 + $0xcc] sm:$0xff]   ;;  %v3506_v14 = vld [vmem:[%s4615_s0 + $0xd4] sm:$0xff]  }
   0x5   :  { %v3503_v11 = vld [vmem:[%s4615_s0 + $0x8] sm:$0xff]   ;;  %v3505_v13 = vld [vmem:[%s4615_s0 + $0x10] sm:$0xff]   ;;  %v3507_v15 = vld [vmem:[%s4615_s0 + $0x18] sm:$0xff]  }
   0x6   :  { %v3508_v16 = vld [vmem:[%s4615_s0 + $0xdc] sm:$0xff]   ;;  %v3510_v18 = vld [vmem:[%s4615_s0 + $0xe4] sm:$0xff]   ;;  %v3512_v20 = vld [vmem:[%s4615_s0 + $0xec] sm:$0xff]  }
   0x7   :  { %3030 = vmatpush3.bf16.msra.mxu0 %v3494_v2  ;;  %3146 = vmatpush3.bf16.msra.mxu1 %v3494_v2  ;;  %v3509_v17 = vld [vmem:[%s4615_s0 + $0x20] sm:$0xff]   ;;  %v3511_v19 = vld [vmem:[%s4615_s0 + $0x28] sm:$0xff]   ;;  %v3513_v21 = vld [vmem:[%s4615_s0 + $0x30] sm:$0xff]  }
   0x8   :  { %3031 = vmatprep.subr.bf16.mxu0 %v3603_v0  ;;  %3147 = vmatprep.subr.bf16.mxu1 %v3603_v0  ;;  %v3514_v22 = vld [vmem:[%s4615_s0 + $0xf4] sm:$0xff]   ;;  %v3516_v24 = vld [vmem:[%s4615_s0 + $0xfc] sm:$0xff]   ;;  %v3518_v26 = vld [vmem:[%s4615_s0 + $0x104] sm:$0xff]  }
   0x9   :  { %v3515_v23 = vld [vmem:[%s4615_s0 + $0x38] sm:$0xff]   ;;  %v3517_v25 = vld [vmem:[%s4615_s0 + $0x40] sm:$0xff]   ;;  %v3519_v27 = vld [vmem:[%s4615_s0 + $0x48] sm:$0xff]  }
   0xa   :  { %v3520_v28 = vld [vmem:[%s4615_s0 + $0x10c] sm:$0xff]   ;;  %v3522_v30 = vld [vmem:[%s4615_s0 + $0x114] sm:$0xff]   ;;  %v3524_v32 = vld [vmem:[%s4615_s0 + $0x11c] sm:$0xff]  }
   0xb   :  { %3032 = vmatpush3.bf16.msra.mxu0 %v3495_v3  ;;  %3148 = vmatpush3.bf16.msra.mxu1 %v3495_v3  ;;  %v3521_v29 = vld [vmem:[%s4615_s0 + $0x50] sm:$0xff]   ;;  %v3523_v31 = vld [vmem:[%s4615_s0 + $0x58] sm:$0xff]   ;;  %v3525_v33 = vld [vmem:[%s4615_s0 + $0x60] sm:$0xff]  }
   0xc   :  { %3033 = vmatprep.subr.bf16.mxu0 %v3603_v0  ;;  %3149 = vmatprep.subr.bf16.mxu1 %v3603_v0  ;;  %v3526_v34 = vld [vmem:[%s4615_s0 + $0x124] sm:$0xff]   ;;  %v3528_v36 = vld [vmem:[%s4615_s0 + $0x12c] sm:$0xff]   ;;  %v3530_v38 = vld [vmem:[%s4615_s0 + $0x134] sm:$0xff]  }
   0xd   :  { %v3527_v35 = vld [vmem:[%s4615_s0 + $0x68] sm:$0xff]   ;;  %v3529_v37 = vld [vmem:[%s4615_s0 + $0x70] sm:$0xff]   ;;  %v3531_v39 = vld [vmem:[%s4615_s0 + $0x78] sm:$0xff]  }
   0xe   :  { %v3532_v40 = vld [vmem:[%s4615_s0 + $0x13c] sm:$0xff]   ;;  %v3534_v42 = vld [vmem:[%s4615_s0 + $0x144] sm:$0xff]   ;;  %v3536_v44 = vld [vmem:[%s4615_s0 + $0x14c] sm:$0xff]  }
   0xf   :  { %3034 = vmatpush3.bf16.msra.mxu0 %v3496_v4  ;;  %3150 = vmatpush3.bf16.msra.mxu1 %v3496_v4  ;;  %v3533_v41 = vld [vmem:[%s4615_s0 + $0x80] sm:$0xff]   ;;  %v3535_v43 = vld [vmem:[%s4615_s0 + $0x88] sm:$0xff]   ;;  %v3537_v45 = vld [vmem:[%s4615_s0 + $0x90] sm:$0xff]  }
  0x10   :  { %3035 = vmatprep.subr.bf16.mxu0 %v3603_v0  ;;  %3151 = vmatprep.subr.bf16.mxu1 %v3603_v0  ;;  %v3538_v46 = vld [vmem:[%s4615_s0 + $0x154] sm:$0xff]   ;;  %v3540_v48 = vld [vmem:[%s4615_s0 + $0x15c] sm:$0xff]   ;;  %v3542_v50 = vld [vmem:[%s4615_s0 + $0x164] sm:$0xff]  }
  0x11   :  { %v3539_v47 = vld [vmem:[%s4615_s0 + $0x98] sm:$0xff]   ;;  %v3541_v49 = vld [vmem:[%s4615_s0 + $0xa0] sm:$0xff]   ;;  %v3543_v51 = vld [vmem:[%s4615_s0 + $0xa8] sm:$0xff]  }
  0x12   :  { %v3544_v52 = vld [vmem:[%s4615_s0 + $0x16c] sm:$0xff]   ;;  %v3546_v54 = vld [vmem:[%s4615_s0 + $0x174] sm:$0xff]   ;;  %v3548_v56 = vld [vmem:[%s4615_s0 + $0x17c] sm:$0xff]  }
  0x13   :  { %3036 = vmatpush3.bf16.msra.mxu0 %v3497_v5  ;;  %3152 = vmatpush3.bf16.msra.mxu1 %v3497_v5  ;;  %v3545_v53 = vld [vmem:[%s4615_s0 + $0xb0] sm:$0xff]   ;;  %v3547_v55 = vld [vmem:[%s4615_s0 + $0xb8] sm:$0xff]   ;;  %v3549_v57 = vld [vmem:[%s4615_s0 + $0xc0] ss:$0 sps:$4 sm:$0xff]  }
  0x14   :  { %3037 = vmatprep.subr.bf16.mxu0 %v3603_v0  ;;  %3153 = vmatprep.subr.bf16.mxu1 %v3603_v0  ;;  %v3550_v58 = vld [vmem:[%s4615_s0 + $0x184] ss:$0 sps:$4 sm:$0xff]   ;;  %v3551_v59 = vld [vmem:[%s4615_s0 + $0x188] sm:$0xff]   ;;  %v3553_v61 = vld [vmem:[%s4615_s0 + $0x190] sm:$0xff]  }
  0x15   :  { %v3552_v60 = vld [vmem:[%s4615_s0 + $0x24c] sm:$0xff]   ;;  %v3554_v62 = vld [vmem:[%s4615_s0 + $0x254] sm:$0xff]   ;;  %v3954_v63 = vld [vmem:[%s4616_s2] ss:$0 sm:$0xff] }
  0x17   :  { %3038 = vmatpush3.bf16.msra.mxu0 %v3498_v6  ;;  %3154 = vmatpush3.bf16.msra.mxu1 %v3498_v6 }
  0x18   :  { %3039 = vmatprep.subr.bf16.mxu0 %v3603_v0  ;;  %3155 = vmatprep.subr.bf16.mxu1 %v3603_v0 }
  0x1b   :  { %3040 = vmatpush3.bf16.msra.mxu0 %v3499_v7  ;;  %3156 = vmatpush3.bf16.msra.mxu1 %v3499_v7 }
  0x1c   :  { %3041 = vmatprep.subr.bf16.mxu0 %v3603_v0  ;;  %3157 = vmatprep.subr.bf16.mxu1 %v3603_v0 }
  0x1f   :  { %3042 = vmatpush3.bf16.msra.mxu0 %v3500_v8  ;;  %3158 = vmatpush3.bf16.msra.mxu1 %v3500_v8 }
  0x20   :  { %3259 = vmatprep.subr.bf16.mxu0 %v3603_v0  ;;  %3375 = vmatprep.subr.bf16.mxu1 %v3603_v0 }
  0x22   :  { %3044 = vmatmul.mubr.bf16.vlgmr.msra.gmra.mrb[0].mxu0 %v3501_v9  ;;  %3160 = vmatmul.mubr.bf16.vlgmr.msra.gmra.mrb[0].mxu1 %v3502_v10 }
  0x23   :  { %3260 = vmatpush3.bf16.msra.mxu0 %v3493_v1  ;;  %3376 = vmatpush3.bf16.msra.mxu1 %v3493_v1 }
  0x24   :  { %3047 = vmatprep.mubr.msk.bf16.mxu0 %vm3604_vm0, %v3603_v0  ;;  %3163 = vmatprep.mubr.msk.bf16.mxu1 %vm3604_vm0, %v3603_v0 }
  0x25   :  { %3261 = vmatprep.subr.bf16.mxu0 %v3603_v0  ;;  %3377 = vmatprep.subr.bf16.mxu1 %v3603_v0 }
  0x27   :  { %3262 = vmatpush3.bf16.msra.mxu0 %v3494_v2  ;;  %3378 = vmatpush3.bf16.msra.mxu1 %v3494_v2 }
  0x28   :  { %3263 = vmatprep.subr.bf16.mxu0 %v3603_v0  ;;  %3379 = vmatprep.subr.bf16.mxu1 %v3603_v0 }
  0x2a   :  { %3048 = vmatmul.mubr.bf16.gmra.mrb[4].mxu0 %v3503_v11  ;;  %3164 = vmatmul.mubr.bf16.gmra.mrb[4].mxu1 %v3504_v12 }
  0x2b   :  { %3051 = vmatprep.mubr.msk.bf16.mxu0 %vm3604_vm0, %v3603_v0  ;;  %3167 = vmatprep.mubr.msk.bf16.mxu1 %vm3604_vm0, %v3603_v0 }
  0x2c   :  { %3264 = vmatpush3.bf16.msra.mxu0 %v3495_v3  ;;  %3380 = vmatpush3.bf16.msra.mxu1 %v3495_v3 }
  0x2d   :  { %3265 = vmatprep.subr.bf16.mxu0 %v3603_v0  ;;  %3381 = vmatprep.subr.bf16.mxu1 %v3603_v0 }
  0x30   :  { %3266 = vmatpush3.bf16.msra.mxu0 %v3496_v4  ;;  %3382 = vmatpush3.bf16.msra.mxu1 %v3496_v4 }
  0x31   :  { %3267 = vmatprep.subr.bf16.mxu0 %v3603_v0  ;;  %3383 = vmatprep.subr.bf16.mxu1 %v3603_v0 }
  0x32   :  { %3052 = vmatmul.mubr.bf16.gmra.mrb[8].mxu0 %v3505_v13  ;;  %3168 = vmatmul.mubr.bf16.gmra.mrb[8].mxu1 %v3506_v14 }
  0x33   :  { %3055 = vmatprep.mubr.msk.bf16.mxu0 %vm3604_vm0, %v3603_v0  ;;  %3171 = vmatprep.mubr.msk.bf16.mxu1 %vm3604_vm0, %v3603_v0 }
  0x34   :  { %3268 = vmatpush3.bf16.msra.mxu0 %v3497_v5  ;;  %3384 = vmatpush3.bf16.msra.mxu1 %v3497_v5 }
  0x35   :  { %3269 = vmatprep.subr.bf16.mxu0 %v3603_v0  ;;  %3385 = vmatprep.subr.bf16.mxu1 %v3603_v0 }
  0x38   :  { %3270 = vmatpush3.bf16.msra.mxu0 %v3498_v6  ;;  %3386 = vmatpush3.bf16.msra.mxu1 %v3498_v6 }
  0x39   :  { %3271 = vmatprep.subr.bf16.mxu0 %v3603_v0  ;;  %3387 = vmatprep.subr.bf16.mxu1 %v3603_v0 }
  0x3a   :  { %3056 = vmatmul.mubr.bf16.gmra.mrb[12].mxu0 %v3507_v15  ;;  %3172 = vmatmul.mubr.bf16.gmra.mrb[12].mxu1 %v3508_v16 }
  0x3b   :  { %3059 = vmatprep.mubr.msk.bf16.mxu0 %vm3604_vm0, %v3603_v0  ;;  %3175 = vmatprep.mubr.msk.bf16.mxu1 %vm3604_vm0, %v3603_v0 }
  0x3c   :  { %3272 = vmatpush3.bf16.msra.mxu0 %v3499_v7  ;;  %3388 = vmatpush3.bf16.msra.mxu1 %v3499_v7  ;;  %v3555_v7 = vld [vmem:[%s4615_s0 + $0x198] sm:$0xff]  }
  0x3d   :  { %3273 = vmatprep.subr.bf16.mxu0 %v3603_v0  ;;  %3389 = vmatprep.subr.bf16.mxu1 %v3603_v0 }
  0x40   :  { %3274 = vmatpush3.bf16.msra.mxu0 %v3500_v8  ;;  %3390 = vmatpush3.bf16.msra.mxu1 %v3500_v8  ;;  %v3556_v8 = vld [vmem:[%s4615_s0 + $0x25c] sm:$0xff]  }
  0x42   :  { %3060 = vmatmul.mubr.bf16.gmra.mrb[16].mxu0 %v3509_v17  ;;  %3176 = vmatmul.mubr.bf16.gmra.mrb[16].mxu1 %v3510_v18 }
  0x43   :  { %3063 = vmatprep.mubr.msk.bf16.mxu0 %vm3604_vm0, %v3603_v0  ;;  %3179 = vmatprep.mubr.msk.bf16.mxu1 %vm3604_vm0, %v3603_v0 }
  0x4a   :  { %3064 = vmatmul.mubr.bf16.gmra.mrb[20].mxu0 %v3511_v19  ;;  %3180 = vmatmul.mubr.bf16.gmra.mrb[20].mxu1 %v3512_v20 }
  0x4b   :  { %3067 = vmatprep.mubr.msk.bf16.mxu0 %vm3604_vm0, %v3603_v0  ;;  %3183 = vmatprep.mubr.msk.bf16.mxu1 %vm3604_vm0, %v3603_v0 }
  0x52   :  { %3068 = vmatmul.mubr.bf16.gmra.mrb[24].mxu0 %v3513_v21  ;;  %3184 = vmatmul.mubr.bf16.gmra.mrb[24].mxu1 %v3514_v22 }
  0x53   :  { %3071 = vmatprep.mubr.msk.bf16.mxu0 %vm3604_vm0, %v3603_v0  ;;  %3187 = vmatprep.mubr.msk.bf16.mxu1 %vm3604_vm0, %v3603_v0 }
  0x5a   :  { %3072 = vmatmul.mubr.bf16.gmra.mrb[28].mxu0 %v3515_v23  ;;  %3188 = vmatmul.mubr.bf16.gmra.mrb[28].mxu1 %v3516_v24 }
  0x5b   :  { %3075 = vmatprep.mubr.msk.bf16.mxu0 %vm3604_vm0, %v3603_v0  ;;  %3191 = vmatprep.mubr.msk.bf16.mxu1 %vm3604_vm0, %v3603_v0 }
  0x62   :  { %3076 = vmatmul.mubr.bf16.gmra.mrb[32].mxu0 %v3517_v25  ;;  %3192 = vmatmul.mubr.bf16.gmra.mrb[32].mxu1 %v3518_v26 }
  0x63   :  { %3079 = vmatprep.mubr.msk.bf16.mxu0 %vm3604_vm0, %v3603_v0  ;;  %3195 = vmatprep.mubr.msk.bf16.mxu1 %vm3604_vm0, %v3603_v0 }
  0x6a   :  { %3080 = vmatmul.mubr.bf16.gmra.mrb[36].mxu0 %v3519_v27  ;;  %3196 = vmatmul.mubr.bf16.gmra.mrb[36].mxu1 %v3520_v28  ;;  %v3557_v27 = vld [vmem:[%s4615_s0 + $0x1a0] sm:$0xff]  }
  0x6b   :  { %3083 = vmatprep.mubr.msk.bf16.mxu0 %vm3604_vm0, %v3603_v0  ;;  %3199 = vmatprep.mubr.msk.bf16.mxu1 %vm3604_vm0, %v3603_v0  ;;  %v3558_v28 = vld [vmem:[%s4615_s0 + $0x264] sm:$0xff]  }
  0x72   :  { %3084 = vmatmul.mubr.bf16.gmra.mrb[40].mxu0 %v3521_v29  ;;  %3200 = vmatmul.mubr.bf16.gmra.mrb[40].mxu1 %v3522_v30 }
  0x73   :  { %3087 = vmatprep.mubr.msk.bf16.mxu0 %vm3604_vm0, %v3603_v0  ;;  %3203 = vmatprep.mubr.msk.bf16.mxu1 %vm3604_vm0, %v3603_v0 }
  0x7a   :  { %3088 = vmatmul.mubr.bf16.gmra.mrb[44].mxu0 %v3523_v31  ;;  %3204 = vmatmul.mubr.bf16.gmra.mrb[44].mxu1 %v3524_v32 }
  0x7b   :  { %3091 = vmatprep.mubr.msk.bf16.mxu0 %vm3604_vm0, %v3603_v0  ;;  %3207 = vmatprep.mubr.msk.bf16.mxu1 %vm3604_vm0, %v3603_v0 }
  0x82   :  { %3092 = vmatmul.mubr.bf16.gmra.mrb[48].mxu0 %v3525_v33  ;;  %3208 = vmatmul.mubr.bf16.gmra.mrb[48].mxu1 %v3526_v34 }
  0x83   :  { %3095 = vmatprep.mubr.msk.bf16.mxu0 %vm3604_vm0, %v3603_v0  ;;  %3211 = vmatprep.mubr.msk.bf16.mxu1 %vm3604_vm0, %v3603_v0 }
  0x8a   :  { %3096 = vmatmul.mubr.bf16.gmra.mrb[52].mxu0 %v3527_v35  ;;  %3212 = vmatmul.mubr.bf16.gmra.mrb[52].mxu1 %v3528_v36 }
  0x8b   :  { %3099 = vmatprep.mubr.msk.bf16.mxu0 %vm3604_vm0, %v3603_v0  ;;  %3215 = vmatprep.mubr.msk.bf16.mxu1 %vm3604_vm0, %v3603_v0 }
  0x92   :  { %3100 = vmatmul.mubr.bf16.gmra.mrb[56].mxu0 %v3529_v37  ;;  %3216 = vmatmul.mubr.bf16.gmra.mrb[56].mxu1 %v3530_v38 }
  0x93   :  { %3103 = vmatprep.mubr.msk.bf16.mxu0 %vm3604_vm0, %v3603_v0  ;;  %3219 = vmatprep.mubr.msk.bf16.mxu1 %vm3604_vm0, %v3603_v0 }
  0x9a   :  { %3104 = vmatmul.mubr.bf16.gmra.mrb[60].mxu0 %v3531_v39  ;;  %3220 = vmatmul.mubr.bf16.gmra.mrb[60].mxu1 %v3532_v40 }
  0x9b   :  { %3107 = vmatprep.mubr.msk.bf16.mxu0 %vm3604_vm0, %v3603_v0  ;;  %3223 = vmatprep.mubr.msk.bf16.mxu1 %vm3604_vm0, %v3603_v0 }
  0xa2   :  { %3108 = vmatmul.mubr.bf16.gmra.mrb[64].mxu0 %v3533_v41  ;;  %3224 = vmatmul.mubr.bf16.gmra.mrb[64].mxu1 %v3534_v42 }
  0xa3   :  { %3111 = vmatprep.mubr.msk.bf16.mxu0 %vm3604_vm0, %v3603_v0  ;;  %3227 = vmatprep.mubr.msk.bf16.mxu1 %vm3604_vm0, %v3603_v0 }
  0xaa   :  { %3112 = vmatmul.mubr.bf16.gmra.mrb[68].mxu0 %v3535_v43  ;;  %3228 = vmatmul.mubr.bf16.gmra.mrb[68].mxu1 %v3536_v44 }
  0xab   :  { %3115 = vmatprep.mubr.msk.bf16.mxu0 %vm3604_vm0, %v3603_v0  ;;  %3231 = vmatprep.mubr.msk.bf16.mxu1 %vm3604_vm0, %v3603_v0 }
  0xb2   :  { %3116 = vmatmul.mubr.bf16.gmra.mrb[72].mxu0 %v3537_v45  ;;  %3232 = vmatmul.mubr.bf16.gmra.mrb[72].mxu1 %v3538_v46 }
  0xb3   :  { %3119 = vmatprep.mubr.msk.bf16.mxu0 %vm3604_vm0, %v3603_v0  ;;  %3235 = vmatprep.mubr.msk.bf16.mxu1 %vm3604_vm0, %v3603_v0 }
  0xba   :  { %3120 = vmatmul.mubr.bf16.gmra.mrb[76].mxu0 %v3539_v47  ;;  %3236 = vmatmul.mubr.bf16.gmra.mrb[76].mxu1 %v3540_v48  ;;  %v3559_v47 = vld [vmem:[%s4615_s0 + $0x1a8] sm:$0xff]  }
  0xbb   :  { %3123 = vmatprep.mubr.msk.bf16.mxu0 %vm3604_vm0, %v3603_v0  ;;  %3239 = vmatprep.mubr.msk.bf16.mxu1 %vm3604_vm0, %v3603_v0  ;;  %v3560_v48 = vld [vmem:[%s4615_s0 + $0x26c] sm:$0xff]  }
  0xc2   :  { %3124 = vmatmul.mubr.bf16.gmra.mrb[80].mxu0 %v3541_v49  ;;  %3240 = vmatmul.mubr.bf16.gmra.mrb[80].mxu1 %v3542_v50 }
  0xc3   :  { %3127 = vmatprep.mubr.msk.bf16.mxu0 %vm3604_vm0, %v3603_v0  ;;  %3243 = vmatprep.mubr.msk.bf16.mxu1 %vm3604_vm0, %v3603_v0 }
  0xca   :  { %3128 = vmatmul.mubr.bf16.gmra.mrb[84].mxu0 %v3543_v51  ;;  %3244 = vmatmul.mubr.bf16.gmra.mrb[84].mxu1 %v3544_v52 }
  0xcb   :  { %3131 = vmatprep.mubr.msk.bf16.mxu0 %vm3604_vm0, %v3603_v0  ;;  %3247 = vmatprep.mubr.msk.bf16.mxu1 %vm3604_vm0, %v3603_v0 }
  0xd2   :  { %3132 = vmatmul.mubr.bf16.gmra.mrb[88].mxu0 %v3545_v53  ;;  %3248 = vmatmul.mubr.bf16.gmra.mrb[88].mxu1 %v3546_v54 }
  0xd3   :  { %3135 = vmatprep.mubr.msk.bf16.mxu0 %vm3604_vm0, %v3603_v0  ;;  %3251 = vmatprep.mubr.msk.bf16.mxu1 %vm3604_vm0, %v3603_v0 }
  0xda   :  { %3136 = vmatmul.mubr.bf16.gmra.mrb[92].mxu0 %v3547_v55  ;;  %3252 = vmatmul.mubr.bf16.gmra.mrb[92].mxu1 %v3548_v56 }
  0xdb   :  { %3139 = vmatprep.mubr.msk.bf16.mxu0 %vm3604_vm0, %v3603_v0  ;;  %3255 = vmatprep.mubr.msk.bf16.mxu1 %vm3604_vm0, %v3603_v0 }
  0xe2   :  { %3140 = vmatmul.mubr.bf16.gmra.mrb[96].mxu0 %v3549_v57  ;;  %3256 = vmatmul.mubr.bf16.gmra.mrb[96].mxu1 %v3550_v58 }
  0xe3   :  { %3275 = vmatprep.mubr.msk.bf16.mxu0 %vm3604_vm0, %v3603_v0  ;;  %3391 = vmatprep.mubr.msk.bf16.mxu1 %vm3604_vm0, %v3603_v0 }
  0xea   :  { %3276 = vmatmul.mubr.bf16.vlgmr.msra.gmra.mrb[100].mxu0 %v3551_v59  ;;  %3392 = vmatmul.mubr.bf16.vlgmr.msra.gmra.mrb[100].mxu1 %v3552_v60 }
  0xeb   :  { %3279 = vmatprep.mubr.msk.bf16.mxu0 %vm3604_vm0, %v3603_v0  ;;  %3395 = vmatprep.mubr.msk.bf16.mxu1 %vm3604_vm0, %v3603_v0 }
  0xf2   :  { %3280 = vmatmul.mubr.bf16.gmra.mrb[104].mxu0 %v3553_v61  ;;  %3396 = vmatmul.mubr.bf16.gmra.mrb[104].mxu1 %v3554_v62 }
  0xf3   :  { %3283 = vmatprep.mubr.msk.bf16.mxu0 %vm3604_vm0, %v3603_v0  ;;  %3399 = vmatprep.mubr.msk.bf16.mxu1 %vm3604_vm0, %v3603_v0 }
  0xf5   :  { %v317_v1 = vpop.f32.mrb[0].mxu0  ;;  %v796_v2 = vpop.f32.mrb[0].mxu1 }
  0xf6   :  { %v318_v3 = vadd.f32 %v3954_v63, %v317_v1  ;;  %v797_v4 = vadd.f32 %v3954_v63, %v796_v2  ;;  %v3045_v5 = vpop.f32.mrb[1].mxu0  ;;  %v3161_v6 = vpop.f32.mrb[1].mxu1 }
  0xf7   :  { %v320_v9 = vpop.f32.mrb[2].mxu0  ;;  %v799_v10 = vpop.f32.mrb[2].mxu1  ;;  %v3561_v5 = vld [vmem:[%s4615_s0 + $0x1b0] sm:$0xff]  }
  0xf8   :  { %v515_v11 = vmax.f32 %v318_v3, 0.0  ;;  %v994_v12 = vmax.f32 %v797_v4, 0.0  ;;  %v321_v13 = vadd.f32 %v3954_v63, %v320_v9  ;;  %v800_v14 = vadd.f32 %v3954_v63, %v799_v10  ;;  %v3046_v15 = vpop.f32.mrb[3].mxu0  ;;  %v3162_v16 = vpop.f32.mrb[3].mxu1  ;;  %v3562_v6 = vld [vmem:[%s4615_s0 + $0x274] sm:$0xff]  }
  0xfa   :  { %v3970_v17 = vmax.f32 %v515_v11, %v994_v12  ;;  %v516_v18 = vmax.f32 %v321_v13, 0.0  ;;  %v995_v19 = vmax.f32 %v800_v14, 0.0  ;;  %3284 = vmatmul.mubr.bf16.gmra.mrb[108].mxu0 %v3555_v7  ;;  %3400 = vmatmul.mubr.bf16.gmra.mrb[108].mxu1 %v3556_v8 }
  0xfb   :  { %3287 = vmatprep.mubr.msk.bf16.mxu0 %vm3604_vm0, %v3603_v0  ;;  %3403 = vmatprep.mubr.msk.bf16.mxu1 %vm3604_vm0, %v3603_v0 }
  0xfc   :  { %v3976_v20 = vmax.f32 %v516_v18, %v995_v19 }
  0xfd   :  { %v325_v21 = vpop.f32.mrb[4].mxu0  ;;  %v804_v22 = vpop.f32.mrb[4].mxu1 }
  0xfe   :  { %v326_v23 = vadd.f32 %v3954_v63, %v325_v21  ;;  %v805_v24 = vadd.f32 %v3954_v63, %v804_v22  ;;  %v3049_v25 = vpop.f32.mrb[5].mxu0  ;;  %v3165_v26 = vpop.f32.mrb[5].mxu1 }
  0xff   :  { %v328_v29 = vpop.f32.mrb[6].mxu0  ;;  %v807_v30 = vpop.f32.mrb[6].mxu1 }
 0x100   :  { %v517_v31 = vmax.f32 %v326_v23, 0.0  ;;  %v996_v32 = vmax.f32 %v805_v24, 0.0  ;;  %v329_v33 = vadd.f32 %v3954_v63, %v328_v29  ;;  %v808_v34 = vadd.f32 %v3954_v63, %v807_v30  ;;  %v3050_v35 = vpop.f32.mrb[7].mxu0  ;;  %v3166_v36 = vpop.f32.mrb[7].mxu1 }
 0x102   :  { %v3988_v37 = vmax.f32 %v517_v31, %v996_v32  ;;  %v518_v38 = vmax.f32 %v329_v33, 0.0  ;;  %v997_v39 = vmax.f32 %v808_v34, 0.0  ;;  %3288 = vmatmul.mubr.bf16.gmra.mrb[112].mxu0 %v3557_v27  ;;  %3404 = vmatmul.mubr.bf16.gmra.mrb[112].mxu1 %v3558_v28  ;;  %v3563_v27 = vld [vmem:[%s4615_s0 + $0x1b8] sm:$0xff]  }
 0x103   :  { %3291 = vmatprep.mubr.msk.bf16.mxu0 %vm3604_vm0, %v3603_v0  ;;  %3407 = vmatprep.mubr.msk.bf16.mxu1 %vm3604_vm0, %v3603_v0  ;;  %v3564_v28 = vld [vmem:[%s4615_s0 + $0x27c] sm:$0xff]  }
 0x104   :  { %v3994_v40 = vmax.f32 %v518_v38, %v997_v39 }
 0x105   :  { %v333_v41 = vpop.f32.mrb[8].mxu0  ;;  %v812_v42 = vpop.f32.mrb[8].mxu1 }
 0x106   :  { %v334_v43 = vadd.f32 %v3954_v63, %v333_v41  ;;  %v813_v44 = vadd.f32 %v3954_v63, %v812_v42  ;;  %v3053_v45 = vpop.f32.mrb[9].mxu0  ;;  %v3169_v46 = vpop.f32.mrb[9].mxu1 }
 0x107   :  { %v336_v49 = vpop.f32.mrb[10].mxu0  ;;  %v815_v50 = vpop.f32.mrb[10].mxu1 }
 0x108   :  { %v519_v51 = vmax.f32 %v334_v43, 0.0  ;;  %v998_v52 = vmax.f32 %v813_v44, 0.0  ;;  %v337_v53 = vadd.f32 %v3954_v63, %v336_v49  ;;  %v816_v54 = vadd.f32 %v3954_v63, %v815_v50  ;;  %v3054_v55 = vpop.f32.mrb[11].mxu0  ;;  %v3170_v56 = vpop.f32.mrb[11].mxu1  ;;  %v3565_v49 = vld [vmem:[%s4615_s0 + $0x1c0] sm:$0xff]  }
 0x109   :  { %v3566_v50 = vld [vmem:[%s4615_s0 + $0x284] sm:$0xff]  }
 0x10a   :  { %v4006_v57 = vmax.f32 %v519_v51, %v998_v52  ;;  %v520_v58 = vmax.f32 %v337_v53, 0.0  ;;  %v999_v59 = vmax.f32 %v816_v54, 0.0  ;;  %3292 = vmatmul.mubr.bf16.gmra.mrb[116].mxu0 %v3559_v47  ;;  %3408 = vmatmul.mubr.bf16.gmra.mrb[116].mxu1 %v3560_v48 }
 0x10b   :  { %3295 = vmatprep.mubr.msk.bf16.mxu0 %vm3604_vm0, %v3603_v0  ;;  %3411 = vmatprep.mubr.msk.bf16.mxu1 %vm3604_vm0, %v3603_v0 }
 0x10c   :  { %v4012_v60 = vmax.f32 %v520_v58, %v999_v59 }
 0x10d   :  { %v341_v61 = vpop.f32.mrb[12].mxu0  ;;  %v820_v62 = vpop.f32.mrb[12].mxu1 }
 0x10e   :  { %v342_v1 = vadd.f32 %v3954_v63, %v341_v61  ;;  %v821_v2 = vadd.f32 %v3954_v63, %v820_v62  ;;  %v3057_v3 = vpop.f32.mrb[13].mxu0  ;;  %v3173_v4 = vpop.f32.mrb[13].mxu1 }
 0x10f   :  { %v344_v7 = vpop.f32.mrb[14].mxu0  ;;  %v823_v8 = vpop.f32.mrb[14].mxu1 }
 0x110   :  { %v521_v9 = vmax.f32 %v342_v1, 0.0  ;;  %v1000_v10 = vmax.f32 %v821_v2, 0.0  ;;  %v345_v11 = vadd.f32 %v3954_v63, %v344_v7  ;;  %v824_v12 = vadd.f32 %v3954_v63, %v823_v8  ;;  %v3058_v13 = vpop.f32.mrb[15].mxu0  ;;  %v3174_v14 = vpop.f32.mrb[15].mxu1 }
 0x112   :  { %v4024_v15 = vmax.f32 %v521_v9, %v1000_v10  ;;  %v522_v16 = vmax.f32 %v345_v11, 0.0  ;;  %v1001_v18 = vmax.f32 %v824_v12, 0.0  ;;  %3296 = vmatmul.mubr.bf16.gmra.mrb[120].mxu0 %v3561_v5  ;;  %3412 = vmatmul.mubr.bf16.gmra.mrb[120].mxu1 %v3562_v6  ;;  %v3567_v9 = vld [vmem:[%s4615_s0 + $0x1c8] sm:$0xff]  }
 0x113   :  { %3299 = vmatprep.mubr.msk.bf16.mxu0 %vm3604_vm0, %v3603_v0  ;;  %3415 = vmatprep.mubr.msk.bf16.mxu1 %vm3604_vm0, %v3603_v0  ;;  %v3568_v10 = vld [vmem:[%s4615_s0 + $0x28c] sm:$0xff]  }
 0x114   :  { %v4030_v19 = vmax.f32 %v522_v16, %v1001_v18 }
 0x115   :  { %v349_v21 = vpop.f32.mrb[16].mxu0  ;;  %v828_v22 = vpop.f32.mrb[16].mxu1 }
 0x116   :  { %v350_v23 = vadd.f32 %v3954_v63, %v349_v21  ;;  %v829_v24 = vadd.f32 %v3954_v63, %v828_v22  ;;  %v3061_v25 = vpop.f32.mrb[17].mxu0  ;;  %v3177_v26 = vpop.f32.mrb[17].mxu1 }
 0x117   :  { %v352_v29 = vpop.f32.mrb[18].mxu0  ;;  %v831_v30 = vpop.f32.mrb[18].mxu1 }
 0x118   :  { %v523_v31 = vmax.f32 %v350_v23, 0.0  ;;  %v1002_v32 = vmax.f32 %v829_v24, 0.0  ;;  %v353_v33 = vadd.f32 %v3954_v63, %v352_v29  ;;  %v832_v34 = vadd.f32 %v3954_v63, %v831_v30  ;;  %v3062_v35 = vpop.f32.mrb[19].mxu0  ;;  %v3178_v36 = vpop.f32.mrb[19].mxu1 }
 0x11a   :  { %v4042_v38 = vmax.f32 %v523_v31, %v1002_v32  ;;  %v524_v39 = vmax.f32 %v353_v33, 0.0  ;;  %v1003_v41 = vmax.f32 %v832_v34, 0.0  ;;  %3300 = vmatmul.mubr.bf16.gmra.mrb[124].mxu0 %v3563_v27  ;;  %3416 = vmatmul.mubr.bf16.gmra.mrb[124].mxu1 %v3564_v28  ;;  %v3569_v33 = vld [vmem:[%s4615_s0 + $0x1d0] sm:$0xff]  }
 0x11b   :  { %3303 = vmatprep.mubr.msk.bf16.mxu0 %vm3604_vm0, %v3603_v0  ;;  %3419 = vmatprep.mubr.msk.bf16.mxu1 %vm3604_vm0, %v3603_v0  ;;  %v3570_v34 = vld [vmem:[%s4615_s0 + $0x294] sm:$0xff]  }
 0x11c   :  { %v4048_v42 = vmax.f32 %v524_v39, %v1003_v41 }
 0x11d   :  { %v357_v43 = vpop.f32.mrb[20].mxu0  ;;  %v836_v44 = vpop.f32.mrb[20].mxu1 }
 0x11e   :  { %v358_v45 = vadd.f32 %v3954_v63, %v357_v43  ;;  %v837_v46 = vadd.f32 %v3954_v63, %v836_v44  ;;  %v3065_v47 = vpop.f32.mrb[21].mxu0  ;;  %v3181_v48 = vpop.f32.mrb[21].mxu1 }
 0x11f   :  { %v360_v51 = vpop.f32.mrb[22].mxu0  ;;  %v839_v52 = vpop.f32.mrb[22].mxu1 }
 0x120   :  { %v525_v53 = vmax.f32 %v358_v45, 0.0  ;;  %v1004_v54 = vmax.f32 %v837_v46, 0.0  ;;  %v361_v55 = vadd.f32 %v3954_v63, %v360_v51  ;;  %v840_v56 = vadd.f32 %v3954_v63, %v839_v52  ;;  %v3066_v58 = vpop.f32.mrb[23].mxu0  ;;  %v3182_v59 = vpop.f32.mrb[23].mxu1 }
 0x121   :  { %v3571_v58 = vld [vmem:[%s4615_s0 + $0x1d8] sm:$0xff]  }
 0x122   :  { %v4060_v61 = vmax.f32 %v525_v53, %v1004_v54  ;;  %v526_v62 = vmax.f32 %v361_v55, 0.0  ;;  %v1005_v1 = vmax.f32 %v840_v56, 0.0  ;;  %3304 = vmatmul.mubr.bf16.gmra.mrb[128].mxu0 %v3565_v49  ;;  %3420 = vmatmul.mubr.bf16.gmra.mrb[128].mxu1 %v3566_v50  ;;  %v3572_v59 = vld [vmem:[%s4615_s0 + $0x29c] sm:$0xff]  }
 0x123   :  { %3307 = vmatprep.mubr.msk.bf16.mxu0 %vm3604_vm0, %v3603_v0  ;;  %3423 = vmatprep.mubr.msk.bf16.mxu1 %vm3604_vm0, %v3603_v0 }
 0x124   :  { %v4066_v2 = vmax.f32 %v526_v62, %v1005_v1 }
 0x125   :  { %v365_v3 = vpop.f32.mrb[24].mxu0  ;;  %v844_v4 = vpop.f32.mrb[24].mxu1 }
 0x126   :  { %v366_v5 = vadd.f32 %v3954_v63, %v365_v3  ;;  %v845_v6 = vadd.f32 %v3954_v63, %v844_v4  ;;  %v3069_v7 = vpop.f32.mrb[25].mxu0  ;;  %v3185_v8 = vpop.f32.mrb[25].mxu1 }
 0x127   :  { %v368_v11 = vpop.f32.mrb[26].mxu0  ;;  %v847_v12 = vpop.f32.mrb[26].mxu1 }
 0x128   :  { %v527_v13 = vmax.f32 %v366_v5, 0.0  ;;  %v1006_v14 = vmax.f32 %v845_v6, 0.0  ;;  %v369_v16 = vadd.f32 %v3954_v63, %v368_v11  ;;  %v848_v18 = vadd.f32 %v3954_v63, %v847_v12  ;;  %v3070_v21 = vpop.f32.mrb[27].mxu0  ;;  %v3186_v22 = vpop.f32.mrb[27].mxu1 }
 0x12a   :  { %v4078_v23 = vmax.f32 %v527_v13, %v1006_v14  ;;  %v528_v24 = vmax.f32 %v369_v16, 0.0  ;;  %v1007_v25 = vmax.f32 %v848_v18, 0.0  ;;  %3308 = vmatmul.mubr.bf16.gmra.mrb[132].mxu0 %v3567_v9  ;;  %3424 = vmatmul.mubr.bf16.gmra.mrb[132].mxu1 %v3568_v10 }
 0x12b   :  { %3311 = vmatprep.mubr.msk.bf16.mxu0 %vm3604_vm0, %v3603_v0  ;;  %3427 = vmatprep.mubr.msk.bf16.mxu1 %vm3604_vm0, %v3603_v0 }
 0x12c   :  { %v4084_v26 = vmax.f32 %v528_v24, %v1007_v25  ;;  %v3573_v24 = vld [vmem:[%s4615_s0 + $0x1e0] sm:$0xff]  }
 0x12d   :  { %v373_v27 = vpop.f32.mrb[28].mxu0  ;;  %v852_v28 = vpop.f32.mrb[28].mxu1  ;;  %v3574_v25 = vld [vmem:[%s4615_s0 + $0x2a4] sm:$0xff]  }
 0x12e   :  { %v374_v29 = vadd.f32 %v3954_v63, %v373_v27  ;;  %v853_v30 = vadd.f32 %v3954_v63, %v852_v28  ;;  %v3073_v31 = vpop.f32.mrb[29].mxu0  ;;  %v3189_v32 = vpop.f32.mrb[29].mxu1 }
 0x12f   :  { %v376_v35 = vpop.f32.mrb[30].mxu0  ;;  %v855_v36 = vpop.f32.mrb[30].mxu1 }
 0x130   :  { %v529_v39 = vmax.f32 %v374_v29, 0.0  ;;  %v1008_v41 = vmax.f32 %v853_v30, 0.0  ;;  %v377_v43 = vadd.f32 %v3954_v63, %v376_v35  ;;  %v856_v44 = vadd.f32 %v3954_v63, %v855_v36  ;;  %v3074_v45 = vpop.f32.mrb[31].mxu0  ;;  %v3190_v46 = vpop.f32.mrb[31].mxu1 }
 0x132   :  { %v4096_v47 = vmax.f32 %v529_v39, %v1008_v41  ;;  %v530_v48 = vmax.f32 %v377_v43, 0.0  ;;  %v1009_v49 = vmax.f32 %v856_v44, 0.0  ;;  %3312 = vmatmul.mubr.bf16.gmra.mrb[136].mxu0 %v3569_v33  ;;  %3428 = vmatmul.mubr.bf16.gmra.mrb[136].mxu1 %v3570_v34 }
 0x133   :  { %3315 = vmatprep.mubr.msk.bf16.mxu0 %vm3604_vm0, %v3603_v0  ;;  %3431 = vmatprep.mubr.msk.bf16.mxu1 %vm3604_vm0, %v3603_v0 }
 0x134   :  { %v4102_v50 = vmax.f32 %v530_v48, %v1009_v49 }
 0x135   :  { %v381_v51 = vpop.f32.mrb[32].mxu0  ;;  %v860_v52 = vpop.f32.mrb[32].mxu1 }
 0x136   :  { %v382_v53 = vadd.f32 %v3954_v63, %v381_v51  ;;  %v861_v54 = vadd.f32 %v3954_v63, %v860_v52  ;;  %v3077_v55 = vpop.f32.mrb[33].mxu0  ;;  %v3193_v56 = vpop.f32.mrb[33].mxu1  ;;  %v3575_v51 = vld [vmem:[%s4615_s0 + $0x1e8] sm:$0xff]  }
 0x137   :  { %v384_v62 = vpop.f32.mrb[34].mxu0  ;;  %v863_v1 = vpop.f32.mrb[34].mxu1  ;;  %v3576_v52 = vld [vmem:[%s4615_s0 + $0x2ac] sm:$0xff]  }
 0x138   :  { %v531_v3 = vmax.f32 %v382_v53, 0.0  ;;  %v1010_v4 = vmax.f32 %v861_v54, 0.0  ;;  %v385_v5 = vadd.f32 %v3954_v63, %v384_v62  ;;  %v864_v6 = vadd.f32 %v3954_v63, %v863_v1  ;;  %v3078_v7 = vpop.f32.mrb[35].mxu0  ;;  %v3194_v8 = vpop.f32.mrb[35].mxu1 }
 0x13a   :  { %v4114_v9 = vmax.f32 %v531_v3, %v1010_v4  ;;  %v532_v10 = vmax.f32 %v385_v5, 0.0  ;;  %v1011_v11 = vmax.f32 %v864_v6, 0.0  ;;  %3316 = vmatmul.mubr.bf16.gmra.mrb[140].mxu0 %v3571_v58  ;;  %3432 = vmatmul.mubr.bf16.gmra.mrb[140].mxu1 %v3572_v59 }
 0x13b   :  { %3319 = vmatprep.mubr.msk.bf16.mxu0 %vm3604_vm0, %v3603_v0  ;;  %3435 = vmatprep.mubr.msk.bf16.mxu1 %vm3604_vm0, %v3603_v0 }
 0x13c   :  { %v4120_v12 = vmax.f32 %v532_v10, %v1011_v11 }
 0x13d   :  { %v389_v13 = vpop.f32.mrb[36].mxu0  ;;  %v868_v14 = vpop.f32.mrb[36].mxu1 }
 0x13e   :  { %v390_v16 = vadd.f32 %v3954_v63, %v389_v13  ;;  %v869_v18 = vadd.f32 %v3954_v63, %v868_v14  ;;  %v3081_v21 = vpop.f32.mrb[37].mxu0  ;;  %v3197_v22 = vpop.f32.mrb[37].mxu1 }
 0x13f   :  { %v392_v27 = vpop.f32.mrb[38].mxu0  ;;  %v871_v28 = vpop.f32.mrb[38].mxu1 }
 0x140   :  { %v533_v29 = vmax.f32 %v390_v16, 0.0  ;;  %v1012_v30 = vmax.f32 %v869_v18, 0.0  ;;  %v393_v31 = vadd.f32 %v3954_v63, %v392_v27  ;;  %v872_v32 = vadd.f32 %v3954_v63, %v871_v28  ;;  %v3082_v33 = vpop.f32.mrb[39].mxu0  ;;  %v3198_v34 = vpop.f32.mrb[39].mxu1  ;;  %v3577_v16 = vld [vmem:[%s4615_s0 + $0x1f0] sm:$0xff]  }
 0x141   :  { %v3578_v18 = vld [vmem:[%s4615_s0 + $0x2b4] sm:$0xff]  }
 0x142   :  { %v4132_v35 = vmax.f32 %v533_v29, %v1012_v30  ;;  %v534_v36 = vmax.f32 %v393_v31, 0.0  ;;  %v1013_v39 = vmax.f32 %v872_v32, 0.0  ;;  %3320 = vmatmul.mubr.bf16.gmra.mrb[144].mxu0 %v3573_v24  ;;  %3436 = vmatmul.mubr.bf16.gmra.mrb[144].mxu1 %v3574_v25 }
 0x143   :  { %3323 = vmatprep.mubr.msk.bf16.mxu0 %vm3604_vm0, %v3603_v0  ;;  %3439 = vmatprep.mubr.msk.bf16.mxu1 %vm3604_vm0, %v3603_v0 }
 0x144   :  { %v4138_v41 = vmax.f32 %v534_v36, %v1013_v39 }
 0x145   :  { %v397_v43 = vpop.f32.mrb[40].mxu0  ;;  %v876_v44 = vpop.f32.mrb[40].mxu1 }
 0x146   :  { %v398_v45 = vadd.f32 %v3954_v63, %v397_v43  ;;  %v877_v46 = vadd.f32 %v3954_v63, %v876_v44  ;;  %v3085_v48 = vpop.f32.mrb[41].mxu0  ;;  %v3201_v49 = vpop.f32.mrb[41].mxu1 }
 0x147   :  { %v400_v53 = vpop.f32.mrb[42].mxu0  ;;  %v879_v54 = vpop.f32.mrb[42].mxu1  ;;  %v3579_v48 = vld [vmem:[%s4615_s0 + $0x1f8] sm:$0xff]  }
 0x148   :  { %v535_v55 = vmax.f32 %v398_v45, 0.0  ;;  %v1014_v56 = vmax.f32 %v877_v46, 0.0  ;;  %v401_v58 = vadd.f32 %v3954_v63, %v400_v53  ;;  %v880_v59 = vadd.f32 %v3954_v63, %v879_v54  ;;  %v3086_v62 = vpop.f32.mrb[43].mxu0  ;;  %v3202_v1 = vpop.f32.mrb[43].mxu1  ;;  %v3580_v49 = vld [vmem:[%s4615_s0 + $0x2bc] sm:$0xff]  }
 0x14a   :  { %v4150_v3 = vmax.f32 %v535_v55, %v1014_v56  ;;  %v536_v4 = vmax.f32 %v401_v58, 0.0  ;;  %v1015_v5 = vmax.f32 %v880_v59, 0.0  ;;  %3324 = vmatmul.mubr.bf16.gmra.mrb[148].mxu0 %v3575_v51  ;;  %3440 = vmatmul.mubr.bf16.gmra.mrb[148].mxu1 %v3576_v52 }
 0x14b   :  { %3327 = vmatprep.mubr.msk.bf16.mxu0 %vm3604_vm0, %v3603_v0  ;;  %3443 = vmatprep.mubr.msk.bf16.mxu1 %vm3604_vm0, %v3603_v0 }
 0x14c   :  { %v4156_v6 = vmax.f32 %v536_v4, %v1015_v5 }
 0x14d   :  { %v405_v7 = vpop.f32.mrb[44].mxu0  ;;  %v884_v8 = vpop.f32.mrb[44].mxu1 }
 0x14e   :  { %v406_v10 = vadd.f32 %v3954_v63, %v405_v7  ;;  %v885_v11 = vadd.f32 %v3954_v63, %v884_v8  ;;  %v3089_v13 = vpop.f32.mrb[45].mxu0  ;;  %v3205_v14 = vpop.f32.mrb[45].mxu1 }
 0x14f   :  { %v408_v21 = vpop.f32.mrb[46].mxu0  ;;  %v887_v22 = vpop.f32.mrb[46].mxu1 }
 0x150   :  { %v537_v24 = vmax.f32 %v406_v10, 0.0  ;;  %v1016_v25 = vmax.f32 %v885_v11, 0.0  ;;  %v409_v27 = vadd.f32 %v3954_v63, %v408_v21  ;;  %v888_v28 = vadd.f32 %v3954_v63, %v887_v22  ;;  %v3090_v29 = vpop.f32.mrb[47].mxu0  ;;  %v3206_v30 = vpop.f32.mrb[47].mxu1 }
 0x152   :  { %v4168_v31 = vmax.f32 %v537_v24, %v1016_v25  ;;  %v538_v32 = vmax.f32 %v409_v27, 0.0  ;;  %v1017_v33 = vmax.f32 %v888_v28, 0.0  ;;  %3328 = vmatmul.mubr.bf16.gmra.mrb[152].mxu0 %v3577_v16  ;;  %3444 = vmatmul.mubr.bf16.gmra.mrb[152].mxu1 %v3578_v18  ;;  %v3581_v16 = vld [vmem:[%s4615_s0 + $0x200] sm:$0xff]  }
 0x153   :  { %3331 = vmatprep.mubr.msk.bf16.mxu0 %vm3604_vm0, %v3603_v0  ;;  %3447 = vmatprep.mubr.msk.bf16.mxu1 %vm3604_vm0, %v3603_v0  ;;  %v3582_v18 = vld [vmem:[%s4615_s0 + $0x2c4] sm:$0xff]  }
 0x154   :  { %v4174_v34 = vmax.f32 %v538_v32, %v1017_v33 }
 0x155   :  { %v413_v36 = vpop.f32.mrb[48].mxu0  ;;  %v892_v39 = vpop.f32.mrb[48].mxu1 }
 0x156   :  { %v414_v43 = vadd.f32 %v3954_v63, %v413_v36  ;;  %v893_v44 = vadd.f32 %v3954_v63, %v892_v39  ;;  %v3093_v45 = vpop.f32.mrb[49].mxu0  ;;  %v3209_v46 = vpop.f32.mrb[49].mxu1 }
 0x157   :  { %v416_v51 = vpop.f32.mrb[50].mxu0  ;;  %v895_v52 = vpop.f32.mrb[50].mxu1 }
 0x158   :  { %v539_v53 = vmax.f32 %v414_v43, 0.0  ;;  %v1018_v54 = vmax.f32 %v893_v44, 0.0  ;;  %v417_v55 = vadd.f32 %v3954_v63, %v416_v51  ;;  %v896_v56 = vadd.f32 %v3954_v63, %v895_v52  ;;  %v3094_v58 = vpop.f32.mrb[51].mxu0  ;;  %v3210_v59 = vpop.f32.mrb[51].mxu1  ;;  %v3583_v51 = vld [vmem:[%s4615_s0 + $0x208] sm:$0xff]  }
 0x159   :  { %v3584_v52 = vld [vmem:[%s4615_s0 + $0x2cc] sm:$0xff]  }
 0x15a   :  { %v4186_v62 = vmax.f32 %v539_v53, %v1018_v54  ;;  %v540_v1 = vmax.f32 %v417_v55, 0.0  ;;  %v1019_v4 = vmax.f32 %v896_v56, 0.0  ;;  %3332 = vmatmul.mubr.bf16.gmra.mrb[156].mxu0 %v3579_v48  ;;  %3448 = vmatmul.mubr.bf16.gmra.mrb[156].mxu1 %v3580_v49 }
 0x15b   :  { %3335 = vmatprep.mubr.msk.bf16.mxu0 %vm3604_vm0, %v3603_v0  ;;  %3451 = vmatprep.mubr.msk.bf16.mxu1 %vm3604_vm0, %v3603_v0 }
 0x15c   :  { %v4192_v5 = vmax.f32 %v540_v1, %v1019_v4 }
 0x15d   :  { %v421_v7 = vpop.f32.mrb[52].mxu0  ;;  %v900_v8 = vpop.f32.mrb[52].mxu1 }
 0x15e   :  { %v422_v10 = vadd.f32 %v3954_v63, %v421_v7  ;;  %v901_v11 = vadd.f32 %v3954_v63, %v900_v8  ;;  %v3097_v13 = vpop.f32.mrb[53].mxu0  ;;  %v3213_v14 = vpop.f32.mrb[53].mxu1 }
 0x15f   :  { %v424_v21 = vpop.f32.mrb[54].mxu0  ;;  %v903_v22 = vpop.f32.mrb[54].mxu1 }
 0x160   :  { %v541_v24 = vmax.f32 %v422_v10, 0.0  ;;  %v1020_v25 = vmax.f32 %v901_v11, 0.0  ;;  %v425_v27 = vadd.f32 %v3954_v63, %v424_v21  ;;  %v904_v28 = vadd.f32 %v3954_v63, %v903_v22  ;;  %v3098_v29 = vpop.f32.mrb[55].mxu0  ;;  %v3214_v30 = vpop.f32.mrb[55].mxu1 }
 0x162   :  { %v4204_v32 = vmax.f32 %v541_v24, %v1020_v25  ;;  %v542_v33 = vmax.f32 %v425_v27, 0.0  ;;  %v1021_v36 = vmax.f32 %v904_v28, 0.0  ;;  %3336 = vmatmul.mubr.bf16.gmra.mrb[160].mxu0 %v3581_v16  ;;  %3452 = vmatmul.mubr.bf16.gmra.mrb[160].mxu1 %v3582_v18  ;;  %v3585_v24 = vld [vmem:[%s4615_s0 + $0x210] sm:$0xff]  }
 0x163   :  { %3339 = vmatprep.mubr.msk.bf16.mxu0 %vm3604_vm0, %v3603_v0  ;;  %3455 = vmatprep.mubr.msk.bf16.mxu1 %vm3604_vm0, %v3603_v0  ;;  %v3586_v25 = vld [vmem:[%s4615_s0 + $0x2d4] sm:$0xff]  }
 0x164   :  { %v4210_v39 = vmax.f32 %v542_v33, %v1021_v36 }
 0x165   :  { %v429_v43 = vpop.f32.mrb[56].mxu0  ;;  %v908_v44 = vpop.f32.mrb[56].mxu1 }
 0x166   :  { %v430_v45 = vadd.f32 %v3954_v63, %v429_v43  ;;  %v909_v46 = vadd.f32 %v3954_v63, %v908_v44  ;;  %v3101_v48 = vpop.f32.mrb[57].mxu0  ;;  %v3217_v49 = vpop.f32.mrb[57].mxu1 }
 0x167   :  { %v432_v53 = vpop.f32.mrb[58].mxu0  ;;  %v911_v54 = vpop.f32.mrb[58].mxu1 }
 0x168   :  { %v543_v55 = vmax.f32 %v430_v45, 0.0  ;;  %v1022_v56 = vmax.f32 %v909_v46, 0.0  ;;  %v433_v58 = vadd.f32 %v3954_v63, %v432_v53  ;;  %v912_v59 = vadd.f32 %v3954_v63, %v911_v54  ;;  %v3102_v1 = vpop.f32.mrb[59].mxu0  ;;  %v3218_v4 = vpop.f32.mrb[59].mxu1 }
 0x16a   :  { %v4222_v7 = vmax.f32 %v543_v55, %v1022_v56  ;;  %v544_v8 = vmax.f32 %v433_v58, 0.0  ;;  %v1023_v10 = vmax.f32 %v912_v59, 0.0  ;;  %3340 = vmatmul.mubr.bf16.gmra.mrb[164].mxu0 %v3583_v51  ;;  %3456 = vmatmul.mubr.bf16.gmra.mrb[164].mxu1 %v3584_v52  ;;  %v3587_v58 = vld [vmem:[%s4615_s0 + $0x218] sm:$0xff]  }
 0x16b   :  { %3343 = vmatprep.mubr.msk.bf16.mxu0 %vm3604_vm0, %v3603_v0  ;;  %3459 = vmatprep.mubr.msk.bf16.mxu1 %vm3604_vm0, %v3603_v0  ;;  %v3588_v59 = vld [vmem:[%s4615_s0 + $0x2dc] sm:$0xff]  }
 0x16c   :  { %v4228_v11 = vmax.f32 %v544_v8, %v1023_v10 }
 0x16d   :  { %v437_v13 = vpop.f32.mrb[60].mxu0  ;;  %v916_v14 = vpop.f32.mrb[60].mxu1 }
 0x16e   :  { %v438_v16 = vadd.f32 %v3954_v63, %v437_v13  ;;  %v917_v18 = vadd.f32 %v3954_v63, %v916_v14  ;;  %v3105_v21 = vpop.f32.mrb[61].mxu0  ;;  %v3221_v22 = vpop.f32.mrb[61].mxu1 }
 0x16f   :  { %v440_v27 = vpop.f32.mrb[62].mxu0  ;;  %v919_v28 = vpop.f32.mrb[62].mxu1 }
 0x170   :  { %v545_v29 = vmax.f32 %v438_v16, 0.0  ;;  %v1024_v30 = vmax.f32 %v917_v18, 0.0  ;;  %v441_v33 = vadd.f32 %v3954_v63, %v440_v27  ;;  %v920_v36 = vadd.f32 %v3954_v63, %v919_v28  ;;  %v3106_v43 = vpop.f32.mrb[63].mxu0  ;;  %v3222_v44 = vpop.f32.mrb[63].mxu1 }
 0x171   :  { %v3589_v43 = vld [vmem:[%s4615_s0 + $0x220] sm:$0xff]  }
 0x172   :  { %v4240_v45 = vmax.f32 %v545_v29, %v1024_v30  ;;  %v546_v46 = vmax.f32 %v441_v33, 0.0  ;;  %v1025_v48 = vmax.f32 %v920_v36, 0.0  ;;  %3344 = vmatmul.mubr.bf16.gmra.mrb[168].mxu0 %v3585_v24  ;;  %3460 = vmatmul.mubr.bf16.gmra.mrb[168].mxu1 %v3586_v25  ;;  %v3590_v44 = vld [vmem:[%s4615_s0 + $0x2e4] sm:$0xff]  }
 0x173   :  { %3347 = vmatprep.mubr.msk.bf16.mxu0 %vm3604_vm0, %v3603_v0  ;;  %3463 = vmatprep.mubr.msk.bf16.mxu1 %vm3604_vm0, %v3603_v0 }
 0x174   :  { %v4246_v49 = vmax.f32 %v546_v46, %v1025_v48 }
 0x175   :  { %v445_v51 = vpop.f32.mrb[64].mxu0  ;;  %v924_v52 = vpop.f32.mrb[64].mxu1 }
 0x176   :  { %v446_v53 = vadd.f32 %v3954_v63, %v445_v51  ;;  %v925_v54 = vadd.f32 %v3954_v63, %v924_v52  ;;  %v3109_v55 = vpop.f32.mrb[65].mxu0  ;;  %v3225_v56 = vpop.f32.mrb[65].mxu1 }
 0x177   :  { %v448_v1 = vpop.f32.mrb[66].mxu0  ;;  %v927_v4 = vpop.f32.mrb[66].mxu1 }
 0x178   :  { %v547_v8 = vmax.f32 %v446_v53, 0.0  ;;  %v1026_v10 = vmax.f32 %v925_v54, 0.0  ;;  %v449_v13 = vadd.f32 %v3954_v63, %v448_v1  ;;  %v928_v14 = vadd.f32 %v3954_v63, %v927_v4  ;;  %v3110_v16 = vpop.f32.mrb[67].mxu0  ;;  %v3226_v18 = vpop.f32.mrb[67].mxu1 }
 0x17a   :  { %v4258_v21 = vmax.f32 %v547_v8, %v1026_v10  ;;  %v548_v22 = vmax.f32 %v449_v13, 0.0  ;;  %v1027_v24 = vmax.f32 %v928_v14, 0.0  ;;  %3348 = vmatmul.mubr.bf16.gmra.mrb[172].mxu0 %v3587_v58  ;;  %3464 = vmatmul.mubr.bf16.gmra.mrb[172].mxu1 %v3588_v59 }
 0x17b   :  { %3351 = vmatprep.mubr.msk.bf16.mxu0 %vm3604_vm0, %v3603_v0  ;;  %3467 = vmatprep.mubr.msk.bf16.mxu1 %vm3604_vm0, %v3603_v0 }
 0x17c   :  { %v4264_v25 = vmax.f32 %v548_v22, %v1027_v24  ;;  %v3591_v22 = vld [vmem:[%s4615_s0 + $0x228] sm:$0xff]  }
 0x17d   :  { %v453_v27 = vpop.f32.mrb[68].mxu0  ;;  %v932_v28 = vpop.f32.mrb[68].mxu1  ;;  %v3592_v24 = vld [vmem:[%s4615_s0 + $0x2ec] sm:$0xff]  }
 0x17e   :  { %v454_v29 = vadd.f32 %v3954_v63, %v453_v27  ;;  %v933_v30 = vadd.f32 %v3954_v63, %v932_v28  ;;  %v3113_v33 = vpop.f32.mrb[69].mxu0  ;;  %v3229_v36 = vpop.f32.mrb[69].mxu1 }
 0x17f   :  { %v456_v46 = vpop.f32.mrb[70].mxu0  ;;  %v935_v48 = vpop.f32.mrb[70].mxu1 }
 0x180   :  { %v549_v51 = vmax.f32 %v454_v29, 0.0  ;;  %v1028_v52 = vmax.f32 %v933_v30, 0.0  ;;  %v457_v53 = vadd.f32 %v3954_v63, %v456_v46  ;;  %v936_v54 = vadd.f32 %v3954_v63, %v935_v48  ;;  %v3114_v55 = vpop.f32.mrb[71].mxu0  ;;  %v3230_v56 = vpop.f32.mrb[71].mxu1 }
 0x182   :  { %v4276_v58 = vmax.f32 %v549_v51, %v1028_v52  ;;  %v550_v59 = vmax.f32 %v457_v53, 0.0  ;;  %v1029_v1 = vmax.f32 %v936_v54, 0.0  ;;  %3352 = vmatmul.mubr.bf16.gmra.mrb[176].mxu0 %v3589_v43  ;;  %3468 = vmatmul.mubr.bf16.gmra.mrb[176].mxu1 %v3590_v44 }
 0x183   :  { %3355 = vmatprep.mubr.msk.bf16.mxu0 %vm3604_vm0, %v3603_v0  ;;  %3471 = vmatprep.mubr.msk.bf16.mxu1 %vm3604_vm0, %v3603_v0 }
 0x184   :  { %v4282_v4 = vmax.f32 %v550_v59, %v1029_v1 }
 0x185   :  { %v461_v8 = vpop.f32.mrb[72].mxu0  ;;  %v940_v10 = vpop.f32.mrb[72].mxu1 }
 0x186   :  { %v462_v13 = vadd.f32 %v3954_v63, %v461_v8  ;;  %v941_v14 = vadd.f32 %v3954_v63, %v940_v10  ;;  %v3117_v16 = vpop.f32.mrb[73].mxu0  ;;  %v3233_v18 = vpop.f32.mrb[73].mxu1  ;;  %v3593_v8 = vld [vmem:[%s4615_s0 + $0x230] sm:$0xff]  }
 0x187   :  { %v464_v27 = vpop.f32.mrb[74].mxu0  ;;  %v943_v28 = vpop.f32.mrb[74].mxu1  ;;  %v3594_v10 = vld [vmem:[%s4615_s0 + $0x2f4] sm:$0xff]  }
 0x188   :  { %v551_v29 = vmax.f32 %v462_v13, 0.0  ;;  %v1030_v30 = vmax.f32 %v941_v14, 0.0  ;;  %v465_v33 = vadd.f32 %v3954_v63, %v464_v27  ;;  %v944_v36 = vadd.f32 %v3954_v63, %v943_v28  ;;  %v3118_v43 = vpop.f32.mrb[75].mxu0  ;;  %v3234_v44 = vpop.f32.mrb[75].mxu1 }
 0x18a   :  { %v4294_v46 = vmax.f32 %v551_v29, %v1030_v30  ;;  %v552_v48 = vmax.f32 %v465_v33, 0.0  ;;  %v1031_v51 = vmax.f32 %v944_v36, 0.0  ;;  %3356 = vmatmul.mubr.bf16.gmra.mrb[180].mxu0 %v3591_v22  ;;  %3472 = vmatmul.mubr.bf16.gmra.mrb[180].mxu1 %v3592_v24 }
 0x18b   :  { %3359 = vmatprep.mubr.msk.bf16.mxu0 %vm3604_vm0, %v3603_v0  ;;  %3475 = vmatprep.mubr.msk.bf16.mxu1 %vm3604_vm0, %v3603_v0 }
 0x18c   :  { %v4300_v52 = vmax.f32 %v552_v48, %v1031_v51 }
 0x18d   :  { %v469_v53 = vpop.f32.mrb[76].mxu0  ;;  %v948_v54 = vpop.f32.mrb[76].mxu1 }
 0x18e   :  { %v470_v55 = vadd.f32 %v3954_v63, %v469_v53  ;;  %v949_v56 = vadd.f32 %v3954_v63, %v948_v54  ;;  %v3121_v59 = vpop.f32.mrb[77].mxu0  ;;  %v3237_v1 = vpop.f32.mrb[77].mxu1 }
 0x18f   :  { %v472_v13 = vpop.f32.mrb[78].mxu0  ;;  %v951_v14 = vpop.f32.mrb[78].mxu1 }
 0x190   :  { %v553_v16 = vmax.f32 %v470_v55, 0.0  ;;  %v1032_v18 = vmax.f32 %v949_v56, 0.0  ;;  %v473_v22 = vadd.f32 %v3954_v63, %v472_v13  ;;  %v952_v24 = vadd.f32 %v3954_v63, %v951_v14  ;;  %v3122_v27 = vpop.f32.mrb[79].mxu0  ;;  %v3238_v28 = vpop.f32.mrb[79].mxu1  ;;  %v3595_v55 = vld [vmem:[%s4615_s0 + $0x238] sm:$0xff]  }
 0x191   :  { %v3596_v56 = vld [vmem:[%s4615_s0 + $0x2fc] sm:$0xff]  }
 0x192   :  { %v4312_v29 = vmax.f32 %v553_v16, %v1032_v18  ;;  %v554_v30 = vmax.f32 %v473_v22, 0.0  ;;  %v1033_v33 = vmax.f32 %v952_v24, 0.0  ;;  %3360 = vmatmul.mubr.bf16.gmra.mrb[184].mxu0 %v3593_v8  ;;  %3476 = vmatmul.mubr.bf16.gmra.mrb[184].mxu1 %v3594_v10 }
 0x193   :  { %3363 = vmatprep.mubr.msk.bf16.mxu0 %vm3604_vm0, %v3603_v0  ;;  %3479 = vmatprep.mubr.msk.bf16.mxu1 %vm3604_vm0, %v3603_v0 }
 0x194   :  { %v4318_v36 = vmax.f32 %v554_v30, %v1033_v33 }
 0x195   :  { %v477_v43 = vpop.f32.mrb[80].mxu0  ;;  %v956_v44 = vpop.f32.mrb[80].mxu1 }
 0x196   :  { %v478_v48 = vadd.f32 %v3954_v63, %v477_v43  ;;  %v957_v51 = vadd.f32 %v3954_v63, %v956_v44  ;;  %v3125_v53 = vpop.f32.mrb[81].mxu0  ;;  %v3241_v54 = vpop.f32.mrb[81].mxu1 }
 0x197   :  { %v480_v59 = vpop.f32.mrb[82].mxu0  ;;  %v959_v1 = vpop.f32.mrb[82].mxu1  ;;  %v3597_v53 = vld [vmem:[%s4615_s0 + $0x240] sm:$0xff]  }
 0x198   :  { %v555_v8 = vmax.f32 %v478_v48, 0.0  ;;  %v1034_v10 = vmax.f32 %v957_v51, 0.0  ;;  %v481_v13 = vadd.f32 %v3954_v63, %v480_v59  ;;  %v960_v14 = vadd.f32 %v3954_v63, %v959_v1  ;;  %v3126_v16 = vpop.f32.mrb[83].mxu0  ;;  %v3242_v18 = vpop.f32.mrb[83].mxu1  ;;  %v3598_v54 = vld [vmem:[%s4615_s0 + $0x304] sm:$0xff]  }
 0x19a   :  { %v4330_v22 = vmax.f32 %v555_v8, %v1034_v10  ;;  %v556_v24 = vmax.f32 %v481_v13, 0.0  ;;  %v1035_v27 = vmax.f32 %v960_v14, 0.0  ;;  %3364 = vmatmul.mubr.bf16.gmra.mrb[188].mxu0 %v3595_v55  ;;  %3480 = vmatmul.mubr.bf16.gmra.mrb[188].mxu1 %v3596_v56  ;;  %v4349_v8 = vld [vmem:[%s4616_s2] ss:$0 sm:$0xff] }
 0x19b   :  { %3367 = vmatprep.mubr.msk.bf16.mxu0 %vm3604_vm0, %v3603_v0  ;;  %3483 = vmatprep.mubr.msk.bf16.mxu1 %vm3604_vm0, %v3603_v0 }
 0x19c   :  { %v4336_v28 = vmax.f32 %v556_v24, %v1035_v27 }
 0x19d   :  { %v485_v30 = vpop.f32.mrb[84].mxu0  ;;  %v964_v33 = vpop.f32.mrb[84].mxu1 }
 0x19e   :  { %v486_v43 = vadd.f32 %v3954_v63, %v485_v30  ;;  %v965_v44 = vadd.f32 %v3954_v63, %v964_v33  ;;  %v3129_v48 = vpop.f32.mrb[85].mxu0  ;;  %v3245_v51 = vpop.f32.mrb[85].mxu1 }
 0x19f   :  { %v488_v55 = vpop.f32.mrb[86].mxu0  ;;  %v967_v56 = vpop.f32.mrb[86].mxu1 }
 0x1a0   :  { %v557_v59 = vmax.f32 %v486_v43, 0.0  ;;  %v1036_v1 = vmax.f32 %v965_v44, 0.0  ;;  %v489_v63 = vadd.f32 %v4349_v8, %v488_v55  ;;  %v968_v10 = vadd.f32 %v4349_v8, %v967_v56  ;;  %v3130_v13 = vpop.f32.mrb[87].mxu0  ;;  %v3246_v14 = vpop.f32.mrb[87].mxu1 }
 0x1a2   :  { %v4353_v16 = vmax.f32 %v557_v59, %v1036_v1  ;;  %v558_v18 = vmax.f32 %v489_v63, 0.0  ;;  %v1037_v24 = vmax.f32 %v968_v10, 0.0  ;;  %3368 = vmatmul.mubr.bf16.gmra.mrb[192].mxu0 %v3597_v53  ;;  %3484 = vmatmul.mubr.bf16.gmra.mrb[192].mxu1 %v3598_v54  ;;  %v3599_v53 = vld [vmem:[%s4615_s0 + $0x248] ss:$0 sps:$4 sm:$0xff]   ;;  %v3600_v54 = vld [vmem:[%s4615_s0 + $0x30c] ss:$0 sps:$4 sm:$0xff]  }
 0x1a3   :  { %3371 = vmatprep.mubr.msk.bf16.mxu0 %vm3604_vm0, %v3603_v0  ;;  %3487 = vmatprep.mubr.msk.bf16.mxu1 %vm3604_vm0, %v3603_v0 }
 0x1a4   :  { %4618 = vst [vmem:[#allocation2_spill] sm:$0xff] %v4353_v16  ;;  %v4359_v27 = vmax.f32 %v558_v18, %v1037_v24 }
 0x1a5   :  { %v493_v30 = vpop.f32.mrb[88].mxu0  ;;  %v972_v33 = vpop.f32.mrb[88].mxu1 }
 0x1a6   :  { %4619 = vst [vmem:[#allocation3_spill] sm:$0xff] %v4359_v27  ;;  %v494_v43 = vadd.f32 %v4349_v8, %v493_v30  ;;  %v973_v44 = vadd.f32 %v4349_v8, %v972_v33  ;;  %v3133_v48 = vpop.f32.mrb[89].mxu0  ;;  %v3249_v51 = vpop.f32.mrb[89].mxu1 }
 0x1a7   :  { %v496_v55 = vpop.f32.mrb[90].mxu0  ;;  %v975_v0 = vpop.f32.mrb[90].mxu1 }
 0x1a8   :  { %v559_v56 = vmax.f32 %v494_v43, 0.0  ;;  %v1038_v59 = vmax.f32 %v973_v44, 0.0  ;;  %v497_v1 = vadd.f32 %v4349_v8, %v496_v55  ;;  %v976_v63 = vadd.f32 %v4349_v8, %v975_v0  ;;  %v3134_v10 = vpop.f32.mrb[91].mxu0  ;;  %v3250_v13 = vpop.f32.mrb[91].mxu1 }
 0x1aa   :  { %v4371_v14 = vmax.f32 %v559_v56, %v1038_v59  ;;  %v560_v18 = vmax.f32 %v497_v1, 0.0  ;;  %v1039_v24 = vmax.f32 %v976_v63, 0.0  ;;  %3372 = vmatmul.mubr.bf16.gmra.mrb[196].mxu0 %v3599_v53  ;;  %3488 = vmatmul.mubr.bf16.gmra.mrb[196].mxu1 %v3600_v54 }
 0x1ac   :  { %4620 = vst [vmem:[#allocation4_spill] sm:$0xff] %v4371_v14  ;;  %v4373_v30 = vmax.f32 %v560_v18, %v1039_v24 }
 0x1ad   :  { %v501_v33 = vpop.f32.mrb[92].mxu0  ;;  %v980_v48 = vpop.f32.mrb[92].mxu1 }
 0x1ae   :  { %4621 = vst [vmem:[#allocation5_spill] sm:$0xff] %v4373_v30  ;;  %v502_v51 = vadd.f32 %v4349_v8, %v501_v33  ;;  %v981_v43 = vadd.f32 %v4349_v8, %v980_v48  ;;  %v3137_v44 = vpop.f32.mrb[93].mxu0  ;;  %v3253_v55 = vpop.f32.mrb[93].mxu1 }
 0x1af   :  { %v504_v27 = vpop.f32.mrb[94].mxu0  ;;  %v983_v0 = vpop.f32.mrb[94].mxu1 }
 0x1b0   :  { %v561_v10 = vmax.f32 %v502_v51, 0.0  ;;  %v1040_v13 = vmax.f32 %v981_v43, 0.0  ;;  %v505_v56 = vadd.f32 %v4349_v8, %v504_v27  ;;  %v984_v59 = vadd.f32 %v4349_v8, %v983_v0  ;;  %v3138_v53 = vpop.f32.mrb[95].mxu0  ;;  %v3254_v54 = vpop.f32.mrb[95].mxu1 }
 0x1b2   :  { %v4379_v1 = vmax.f32 %v561_v10, %v1040_v13  ;;  %v562_v63 = vmax.f32 %v505_v56, 0.0  ;;  %v1041_v18 = vmax.f32 %v984_v59, 0.0 }
 0x1b4   :  { %4622 = vst [vmem:[#allocation6_spill] sm:$0xff] %v4379_v1  ;;  %v4381_v24 = vmax.f32 %v562_v63, %v1041_v18 }
 0x1b5   :  { %v509_v33 = vpop.f32.mrb[96].mxu0  ;;  %v988_v48 = vpop.f32.mrb[96].mxu1 }
 0x1b6   :  { %4623 = vst [vmem:[#allocation7_spill] sm:$0xff] %v4381_v24  ;;  %v510_v44 = vadd.f32 %v4349_v8, %v509_v33  ;;  %v989_v55 = vadd.f32 %v4349_v8, %v988_v48  ;;  %v3141_v51 = vpop.f32.mrb[97].mxu0  ;;  %v3257_v43 = vpop.f32.mrb[97].mxu1 }
 0x1b7   :  { %v512_v30 = vpop.f32.mrb[98].mxu0  ;;  %v991_v27 = vpop.f32.mrb[98].mxu1 }
 0x1b8   :  { %v563_v14 = vmax.f32 %v510_v44, 0.0  ;;  %v1042_v0 = vmax.f32 %v989_v55, 0.0  ;;  %v3142_v53 = vpop.f32.mrb[99].mxu0  ;;  %v3258_v54 = vpop.f32.mrb[99].mxu1 }
 0x1ba   :  { %v4385_v10 = vmax.f32 %v563_v14, %v1042_v0 }
 0x1bc   :  { %4624 = vst [vmem:[#allocation8_spill] sm:$0xff] %v4385_v10 }
 0x1bd   :  { %v1324_v13 = vpop.f32.mrb[100].mxu0  ;;  %v1852_v56 = vpop.f32.mrb[100].mxu1 }
 0x1be   :  { %v1325_v59 = vadd.f32 %v4349_v8, %v1324_v13  ;;  %v1853_v63 = vadd.f32 %v4349_v8, %v1852_v56  ;;  %v3277_v18 = vpop.f32.mrb[101].mxu0  ;;  %v3393_v33 = vpop.f32.mrb[101].mxu1 }
 0x1bf   :  { %v1327_v24 = vpop.f32.mrb[102].mxu0  ;;  %v1855_v48 = vpop.f32.mrb[102].mxu1 }
 0x1c0   :  { %v1522_v51 = vmax.f32 %v1325_v59, 0.0  ;;  %v2050_v43 = vmax.f32 %v1853_v63, 0.0  ;;  %v1328_v30 = vadd.f32 %v4349_v8, %v1327_v24  ;;  %v1856_v44 = vadd.f32 %v4349_v8, %v1855_v48  ;;  %v3278_v55 = vpop.f32.mrb[103].mxu0  ;;  %v3394_v27 = vpop.f32.mrb[103].mxu1 }
 0x1c2   :  { %v1571_v14 = vmax.f32 %v3970_v17, %v1522_v51  ;;  %v1523_v0 = vmax.f32 %v1328_v30, 0.0  ;;  %v2051_v13 = vmax.f32 %v1856_v44, 0.0 }
 0x1c4   :  { %v2099_v53 = vmax.f32 %v1571_v14, %v2050_v43  ;;  %v1572_v54 = vmax.f32 %v3976_v20, %v1523_v0 }
 0x1c5   :  { %v1332_v56 = vpop.f32.mrb[104].mxu0  ;;  %v1860_v18 = vpop.f32.mrb[104].mxu1 }
 0x1c6   :  { %v2100_v33 = vmax.f32 %v1572_v54, %v2051_v13  ;;  %v1333_v10 = vadd.f32 %v4349_v8, %v1332_v56  ;;  %v1861_v59 = vadd.f32 %v4349_v8, %v1860_v18  ;;  %v3281_v63 = vpop.f32.mrb[105].mxu0  ;;  %v3397_v24 = vpop.f32.mrb[105].mxu1 }
 0x1c7   :  { %v1335_v1 = vpop.f32.mrb[106].mxu0  ;;  %v1863_v48 = vpop.f32.mrb[106].mxu1 }
 0x1c8   :  { %v2755_v55 = vpack.c.bf16 %v2100_v33, %v2099_v53  ;;  %v1524_v27 = vmax.f32 %v1333_v10, 0.0  ;;  %v2052_v16 = vmax.f32 %v1861_v59, 0.0  ;;  %v1336_v17 = vadd.f32 %v4349_v8, %v1335_v1  ;;  %v3282_v51 = vpop.f32.mrb[107].mxu0  ;;  %v3398_v43 = vpop.f32.mrb[107].mxu1 }
 0x1c9   :  { %v1864_v20 = vadd.f32 %v4349_v8, %v1863_v48 }
 0x1ca   :  { %2756 = vst [vmem:[%s4617_s3] sm:$0xff] %v2755_v55   ;;  %v1573_v30 = vmax.f32 %v3988_v37, %v1524_v27  ;;  %v1525_v44 = vmax.f32 %v1336_v17, 0.0 }
 0x1cb   :  { %v2053_v54 = vmax.f32 %v1864_v20, 0.0 }
 0x1cc   :  { %v2101_v14 = vmax.f32 %v1573_v30, %v2052_v16  ;;  %v1574_v0 = vmax.f32 %v3994_v40, %v1525_v44 }
 0x1cd   :  { %v1340_v53 = vpop.f32.mrb[108].mxu0  ;;  %v1868_v10 = vpop.f32.mrb[108].mxu1 }
 0x1ce   :  { %v2102_v13 = vmax.f32 %v1574_v0, %v2053_v54  ;;  %v1341_v1 = vadd.f32 %v4349_v8, %v1340_v53  ;;  %v1869_v56 = vadd.f32 %v4349_v8, %v1868_v10  ;;  %v3285_v18 = vpop.f32.mrb[109].mxu0  ;;  %v3401_v33 = vpop.f32.mrb[109].mxu1 }
 0x1cf   :  { %v1343_v59 = vpop.f32.mrb[110].mxu0  ;;  %v1871_v63 = vpop.f32.mrb[110].mxu1 }
 0x1d0   :  { %v2760_v24 = vpack.c.bf16 %v2102_v13, %v2101_v14  ;;  %v1526_v48 = vmax.f32 %v1341_v1, 0.0  ;;  %v2054_v55 = vmax.f32 %v1869_v56, 0.0  ;;  %v1344_v37 = vadd.f32 %v4349_v8, %v1343_v59  ;;  %v3286_v16 = vpop.f32.mrb[111].mxu0  ;;  %v3402_v27 = vpop.f32.mrb[111].mxu1 }
 0x1d1   :  { %v1872_v40 = vadd.f32 %v4349_v8, %v1871_v63 }
 0x1d2   :  { %2872 = vst [vmem:[%s4617_s3 + $0x8] sm:$0xff] %v2760_v24   ;;  %v1575_v17 = vmax.f32 %v4006_v57, %v1526_v48  ;;  %v1527_v51 = vmax.f32 %v1344_v37, 0.0 }
 0x1d3   :  { %v2055_v30 = vmax.f32 %v1872_v40, 0.0 }
 0x1d4   :  { %v2103_v43 = vmax.f32 %v1575_v17, %v2054_v55  ;;  %v1576_v20 = vmax.f32 %v4012_v60, %v1527_v51 }
 0x1d5   :  { %v1348_v44 = vpop.f32.mrb[112].mxu0  ;;  %v1876_v14 = vpop.f32.mrb[112].mxu1 }
 0x1d6   :  { %v2104_v0 = vmax.f32 %v1576_v20, %v2055_v30  ;;  %v1349_v54 = vadd.f32 %v4349_v8, %v1348_v44  ;;  %v1877_v53 = vadd.f32 %v4349_v8, %v1876_v14  ;;  %v3289_v10 = vpop.f32.mrb[113].mxu0  ;;  %v3405_v13 = vpop.f32.mrb[113].mxu1 }
 0x1d7   :  { %v1351_v1 = vpop.f32.mrb[114].mxu0  ;;  %v1879_v56 = vpop.f32.mrb[114].mxu1 }
 0x1d8   :  { %v2765_v18 = vpack.c.bf16 %v2104_v0, %v2103_v43  ;;  %v1528_v33 = vmax.f32 %v1349_v54, 0.0  ;;  %v2056_v59 = vmax.f32 %v1877_v53, 0.0  ;;  %v1352_v57 = vadd.f32 %v4349_v8, %v1351_v1  ;;  %v3290_v63 = vpop.f32.mrb[115].mxu0  ;;  %v3406_v24 = vpop.f32.mrb[115].mxu1 }
 0x1d9   :  { %v1880_v60 = vadd.f32 %v4349_v8, %v1879_v56 }
 0x1da   :  { %2873 = vst [vmem:[%s4617_s3 + $0x10] sm:$0xff] %v2765_v18   ;;  %v1577_v48 = vmax.f32 %v4024_v15, %v1528_v33  ;;  %v1529_v55 = vmax.f32 %v1352_v57, 0.0 }
 0x1db   :  { %v2057_v27 = vmax.f32 %v1880_v60, 0.0 }
 0x1dc   :  { %v2105_v37 = vmax.f32 %v1577_v48, %v2056_v59  ;;  %v1578_v16 = vmax.f32 %v4030_v19, %v1529_v55 }
 0x1dd   :  { %v1356_v40 = vpop.f32.mrb[116].mxu0  ;;  %v1884_v17 = vpop.f32.mrb[116].mxu1 }
 0x1de   :  { %v2106_v51 = vmax.f32 %v1578_v16, %v2057_v27  ;;  %v1357_v43 = vadd.f32 %v4349_v8, %v1356_v40  ;;  %v1885_v20 = vadd.f32 %v4349_v8, %v1884_v17  ;;  %v3293_v30 = vpop.f32.mrb[117].mxu0  ;;  %v3409_v44 = vpop.f32.mrb[117].mxu1 }
 0x1df   :  { %v1359_v14 = vpop.f32.mrb[118].mxu0  ;;  %v1887_v0 = vpop.f32.mrb[118].mxu1 }
 0x1e0   :  { %v2770_v54 = vpack.c.bf16 %v2106_v51, %v2105_v37  ;;  %v1530_v53 = vmax.f32 %v1357_v43, 0.0  ;;  %v2058_v10 = vmax.f32 %v1885_v20, 0.0  ;;  %v1360_v15 = vadd.f32 %v4349_v8, %v1359_v14  ;;  %v3294_v13 = vpop.f32.mrb[119].mxu0  ;;  %v3410_v1 = vpop.f32.mrb[119].mxu1 }
 0x1e1   :  { %v1888_v19 = vadd.f32 %v4349_v8, %v1887_v0 }
 0x1e2   :  { %2874 = vst [vmem:[%s4617_s3 + $0x18] sm:$0xff] %v2770_v54   ;;  %v1579_v56 = vmax.f32 %v4042_v38, %v1530_v53  ;;  %v1531_v18 = vmax.f32 %v1360_v15, 0.0 }
 0x1e3   :  { %v2059_v57 = vmax.f32 %v1888_v19, 0.0 }
 0x1e4   :  { %v2107_v33 = vmax.f32 %v1579_v56, %v2058_v10  ;;  %v1580_v59 = vmax.f32 %v4048_v42, %v1531_v18 }
 0x1e5   :  { %v1364_v63 = vpop.f32.mrb[120].mxu0  ;;  %v1892_v24 = vpop.f32.mrb[120].mxu1 }
 0x1e6   :  { %v2108_v60 = vmax.f32 %v1580_v59, %v2059_v57  ;;  %v1365_v48 = vadd.f32 %v4349_v8, %v1364_v63  ;;  %v1893_v55 = vadd.f32 %v4349_v8, %v1892_v24  ;;  %v3297_v37 = vpop.f32.mrb[121].mxu0  ;;  %v3413_v16 = vpop.f32.mrb[121].mxu1 }
 0x1e7   :  { %v1367_v27 = vpop.f32.mrb[122].mxu0  ;;  %v1895_v40 = vpop.f32.mrb[122].mxu1 }
 0x1e8   :  { %v2775_v17 = vpack.c.bf16 %v2108_v60, %v2107_v33  ;;  %v1532_v51 = vmax.f32 %v1365_v48, 0.0  ;;  %v2060_v43 = vmax.f32 %v1893_v55, 0.0  ;;  %v1368_v38 = vadd.f32 %v4349_v8, %v1367_v27  ;;  %v3298_v20 = vpop.f32.mrb[123].mxu0  ;;  %v3414_v30 = vpop.f32.mrb[123].mxu1 }
 0x1e9   :  { %v1896_v42 = vadd.f32 %v4349_v8, %v1895_v40 }
 0x1ea   :  { %2875 = vst [vmem:[%s4617_s3 + $0x20] sm:$0xff] %v2775_v17   ;;  %v1581_v44 = vmax.f32 %v4060_v61, %v1532_v51  ;;  %v1533_v14 = vmax.f32 %v1368_v38, 0.0 }
 0x1eb   :  { %v2061_v53 = vmax.f32 %v1896_v42, 0.0 }
 0x1ec   :  { %v2109_v0 = vmax.f32 %v1581_v44, %v2060_v43  ;;  %v1582_v54 = vmax.f32 %v4066_v2, %v1533_v14 }
 0x1ed   :  { %v1372_v10 = vpop.f32.mrb[124].mxu0  ;;  %v1900_v15 = vpop.f32.mrb[124].mxu1 }
 0x1ee   :  { %v2110_v13 = vmax.f32 %v1582_v54, %v2061_v53  ;;  %v1373_v1 = vadd.f32 %v4349_v8, %v1372_v10  ;;  %v1901_v19 = vadd.f32 %v4349_v8, %v1900_v15  ;;  %v3301_v56 = vpop.f32.mrb[125].mxu0  ;;  %v3417_v18 = vpop.f32.mrb[125].mxu1 }
 0x1ef   :  { %v1375_v33 = vpop.f32.mrb[126].mxu0  ;;  %v1903_v59 = vpop.f32.mrb[126].mxu1 }
 0x1f0   :  { %v2780_v57 = vpack.c.bf16 %v2110_v13, %v2109_v0  ;;  %v1534_v63 = vmax.f32 %v1373_v1, 0.0  ;;  %v2062_v24 = vmax.f32 %v1901_v19, 0.0  ;;  %v1376_v61 = vadd.f32 %v4349_v8, %v1375_v33  ;;  %v3302_v60 = vpop.f32.mrb[127].mxu0  ;;  %v3418_v48 = vpop.f32.mrb[127].mxu1 }
 0x1f1   :  { %v1904_v2 = vadd.f32 %v4349_v8, %v1903_v59 }
 0x1f2   :  { %2876 = vst [vmem:[%s4617_s3 + $0x28] sm:$0xff] %v2780_v57   ;;  %v1583_v55 = vmax.f32 %v4078_v23, %v1534_v63  ;;  %v1535_v37 = vmax.f32 %v1376_v61, 0.0 }
 0x1f3   :  { %v2063_v40 = vmax.f32 %v1904_v2, 0.0 }
 0x1f4   :  { %v2111_v16 = vmax.f32 %v1583_v55, %v2062_v24  ;;  %v1584_v27 = vmax.f32 %v4084_v26, %v1535_v37 }
 0x1f5   :  { %v1380_v17 = vpop.f32.mrb[128].mxu0  ;;  %v1908_v51 = vpop.f32.mrb[128].mxu1 }
 0x1f6   :  { %v2112_v43 = vmax.f32 %v1584_v27, %v2063_v40  ;;  %v1381_v38 = vadd.f32 %v4349_v8, %v1380_v17  ;;  %v1909_v20 = vadd.f32 %v4349_v8, %v1908_v51  ;;  %v3305_v30 = vpop.f32.mrb[129].mxu0  ;;  %v3421_v42 = vpop.f32.mrb[129].mxu1 }
 0x1f7   :  { %v1383_v44 = vpop.f32.mrb[130].mxu0  ;;  %v1911_v14 = vpop.f32.mrb[130].mxu1 }
 0x1f8   :  { %v2785_v0 = vpack.c.bf16 %v2112_v43, %v2111_v16  ;;  %v1536_v54 = vmax.f32 %v1381_v38, 0.0  ;;  %v2064_v53 = vmax.f32 %v1909_v20, 0.0  ;;  %v1384_v23 = vadd.f32 %v4349_v8, %v1383_v44  ;;  %v3306_v10 = vpop.f32.mrb[131].mxu0  ;;  %v3422_v15 = vpop.f32.mrb[131].mxu1 }
 0x1f9   :  { %v1912_v26 = vadd.f32 %v4349_v8, %v1911_v14 }
 0x1fa   :  { %2877 = vst [vmem:[%s4617_s3 + $0x30] sm:$0xff] %v2785_v0   ;;  %v1585_v13 = vmax.f32 %v4096_v47, %v1536_v54  ;;  %v1537_v1 = vmax.f32 %v1384_v23, 0.0 }
 0x1fb   :  { %v2065_v18 = vmax.f32 %v1912_v26, 0.0 }
 0x1fc   :  { %v2113_v19 = vmax.f32 %v1585_v13, %v2064_v53  ;;  %v1586_v56 = vmax.f32 %v4102_v50, %v1537_v1 }
 0x1fd   :  { %v1388_v33 = vpop.f32.mrb[132].mxu0  ;;  %v1916_v59 = vpop.f32.mrb[132].mxu1 }
 0x1fe   :  { %v2114_v57 = vmax.f32 %v1586_v56, %v2065_v18  ;;  %v1389_v63 = vadd.f32 %v4349_v8, %v1388_v33  ;;  %v1917_v24 = vadd.f32 %v4349_v8, %v1916_v59  ;;  %v3309_v61 = vpop.f32.mrb[133].mxu0  ;;  %v3425_v60 = vpop.f32.mrb[133].mxu1 }
 0x1ff   :  { %v1391_v48 = vpop.f32.mrb[134].mxu0  ;;  %v1919_v2 = vpop.f32.mrb[134].mxu1 }
 0x200   :  { %v2790_v55 = vpack.c.bf16 %v2114_v57, %v2113_v19  ;;  %v1538_v37 = vmax.f32 %v1389_v63, 0.0  ;;  %v2066_v16 = vmax.f32 %v1917_v24, 0.0  ;;  %v1392_v47 = vadd.f32 %v4349_v8, %v1391_v48  ;;  %v3310_v27 = vpop.f32.mrb[135].mxu0  ;;  %v3426_v40 = vpop.f32.mrb[135].mxu1 }
 0x201   :  { %v1920_v50 = vadd.f32 %v4349_v8, %v1919_v2 }
 0x202   :  { %2878 = vst [vmem:[%s4617_s3 + $0x38] sm:$0xff] %v2790_v55   ;;  %v1587_v17 = vmax.f32 %v4114_v9, %v1538_v37  ;;  %v1539_v51 = vmax.f32 %v1392_v47, 0.0 }
 0x203   :  { %v2067_v20 = vmax.f32 %v1920_v50, 0.0 }
 0x204   :  { %v2115_v43 = vmax.f32 %v1587_v17, %v2066_v16  ;;  %v1588_v38 = vmax.f32 %v4120_v12, %v1539_v51 }
 0x205   :  { %v1396_v30 = vpop.f32.mrb[136].mxu0  ;;  %v1924_v42 = vpop.f32.mrb[136].mxu1 }
 0x206   :  { %v2116_v44 = vmax.f32 %v1588_v38, %v2067_v20  ;;  %v1397_v14 = vadd.f32 %v4349_v8, %v1396_v30  ;;  %v1925_v0 = vadd.f32 %v4349_v8, %v1924_v42  ;;  %v3313_v54 = vpop.f32.mrb[137].mxu0  ;;  %v3429_v53 = vpop.f32.mrb[137].mxu1 }
 0x207   :  { %v1399_v23 = vpop.f32.mrb[138].mxu0  ;;  %v1927_v10 = vpop.f32.mrb[138].mxu1 }
 0x208   :  { %v2795_v15 = vpack.c.bf16 %v2116_v44, %v2115_v43  ;;  %v1540_v26 = vmax.f32 %v1397_v14, 0.0  ;;  %v2068_v13 = vmax.f32 %v1925_v0, 0.0  ;;  %v1400_v9 = vadd.f32 %v4349_v8, %v1399_v23  ;;  %v3314_v1 = vpop.f32.mrb[139].mxu0  ;;  %v3430_v19 = vpop.f32.mrb[139].mxu1 }
 0x209   :  { %v1928_v12 = vadd.f32 %v4349_v8, %v1927_v10 }
 0x20a   :  { %2879 = vst [vmem:[%s4617_s3 + $0x40] sm:$0xff] %v2795_v15   ;;  %v1589_v56 = vmax.f32 %v4132_v35, %v1540_v26  ;;  %v1541_v18 = vmax.f32 %v1400_v9, 0.0 }
 0x20b   :  { %v2069_v57 = vmax.f32 %v1928_v12, 0.0 }
 0x20c   :  { %v2117_v33 = vmax.f32 %v1589_v56, %v2068_v13  ;;  %v1590_v59 = vmax.f32 %v4138_v41, %v1541_v18 }
 0x20d   :  { %v1404_v63 = vpop.f32.mrb[140].mxu0  ;;  %v1932_v24 = vpop.f32.mrb[140].mxu1 }
 0x20e   :  { %v2118_v61 = vmax.f32 %v1590_v59, %v2069_v57  ;;  %v1405_v60 = vadd.f32 %v4349_v8, %v1404_v63  ;;  %v1933_v48 = vadd.f32 %v4349_v8, %v1932_v24  ;;  %v3317_v2 = vpop.f32.mrb[141].mxu0  ;;  %v3433_v55 = vpop.f32.mrb[141].mxu1 }
 0x20f   :  { %v1407_v37 = vpop.f32.mrb[142].mxu0  ;;  %v1935_v16 = vpop.f32.mrb[142].mxu1 }
 0x210   :  { %v2800_v47 = vpack.c.bf16 %v2118_v61, %v2117_v33  ;;  %v1542_v27 = vmax.f32 %v1405_v60, 0.0  ;;  %v2070_v40 = vmax.f32 %v1933_v48, 0.0  ;;  %v1408_v35 = vadd.f32 %v4349_v8, %v1407_v37  ;;  %v3318_v50 = vpop.f32.mrb[143].mxu0  ;;  %v3434_v17 = vpop.f32.mrb[143].mxu1 }
 0x211   :  { %v1936_v41 = vadd.f32 %v4349_v8, %v1935_v16 }
 0x212   :  { %2880 = vst [vmem:[%s4617_s3 + $0x48] sm:$0xff] %v2800_v47   ;;  %v1591_v51 = vmax.f32 %v4150_v3, %v1542_v27  ;;  %v1543_v43 = vmax.f32 %v1408_v35, 0.0 }
 0x213   :  { %v2071_v30 = vmax.f32 %v1936_v41, 0.0 }
 0x214   :  { %v2119_v38 = vmax.f32 %v1591_v51, %v2070_v40  ;;  %v1592_v20 = vmax.f32 %v4156_v6, %v1543_v43 }
 0x215   :  { %v1412_v42 = vpop.f32.mrb[144].mxu0  ;;  %v1940_v44 = vpop.f32.mrb[144].mxu1 }
 0x216   :  { %v2120_v14 = vmax.f32 %v1592_v20, %v2071_v30  ;;  %v1413_v0 = vadd.f32 %v4349_v8, %v1412_v42  ;;  %v1941_v54 = vadd.f32 %v4349_v8, %v1940_v44  ;;  %v3321_v53 = vpop.f32.mrb[145].mxu0  ;;  %v3437_v23 = vpop.f32.mrb[145].mxu1 }
 0x217   :  { %v1415_v10 = vpop.f32.mrb[146].mxu0  ;;  %v1943_v15 = vpop.f32.mrb[146].mxu1 }
 0x218   :  { %v2805_v26 = vpack.c.bf16 %v2120_v14, %v2119_v38  ;;  %v1544_v13 = vmax.f32 %v1413_v0, 0.0  ;;  %v2072_v9 = vmax.f32 %v1941_v54, 0.0  ;;  %v1416_v3 = vadd.f32 %v4349_v8, %v1415_v10  ;;  %v3322_v1 = vpop.f32.mrb[147].mxu0  ;;  %v3438_v19 = vpop.f32.mrb[147].mxu1 }
 0x219   :  { %v1944_v6 = vadd.f32 %v4349_v8, %v1943_v15 }
 0x21a   :  { %2881 = vst [vmem:[%s4617_s3 + $0x50] sm:$0xff] %v2805_v26   ;;  %v1593_v12 = vmax.f32 %v4168_v31, %v1544_v13  ;;  %v1545_v56 = vmax.f32 %v1416_v3, 0.0 }
 0x21b   :  { %v2073_v59 = vmax.f32 %v1944_v6, 0.0 }
 0x21c   :  { %v2121_v18 = vmax.f32 %v1593_v12, %v2072_v9  ;;  %v1594_v33 = vmax.f32 %v4174_v34, %v1545_v56 }
 0x21d   :  { %v1420_v57 = vpop.f32.mrb[148].mxu0  ;;  %v1948_v63 = vpop.f32.mrb[148].mxu1 }
 0x21e   :  { %v2122_v24 = vmax.f32 %v1594_v33, %v2073_v59  ;;  %v1421_v61 = vadd.f32 %v4349_v8, %v1420_v57  ;;  %v1949_v60 = vadd.f32 %v4349_v8, %v1948_v63  ;;  %v3325_v48 = vpop.f32.mrb[149].mxu0  ;;  %v3441_v2 = vpop.f32.mrb[149].mxu1 }
 0x21f   :  { %v1423_v55 = vpop.f32.mrb[150].mxu0  ;;  %v1951_v37 = vpop.f32.mrb[150].mxu1 }
 0x220   :  { %v2810_v16 = vpack.c.bf16 %v2122_v24, %v2121_v18  ;;  %v1546_v47 = vmax.f32 %v1421_v61, 0.0  ;;  %v2074_v27 = vmax.f32 %v1949_v60, 0.0  ;;  %v1424_v31 = vadd.f32 %v4349_v8, %v1423_v55  ;;  %v3326_v40 = vpop.f32.mrb[151].mxu0  ;;  %v3442_v35 = vpop.f32.mrb[151].mxu1 }
 0x221   :  { %v1952_v34 = vadd.f32 %v4349_v8, %v1951_v37 }
 0x222   :  { %2882 = vst [vmem:[%s4617_s3 + $0x58] sm:$0xff] %v2810_v16   ;;  %v1595_v50 = vmax.f32 %v4186_v62, %v1546_v47  ;;  %v1547_v17 = vmax.f32 %v1424_v31, 0.0 }
 0x223   :  { %v2075_v43 = vmax.f32 %v1952_v34, 0.0 }
 0x224   :  { %v2123_v41 = vmax.f32 %v1595_v50, %v2074_v27  ;;  %v1596_v51 = vmax.f32 %v4192_v5, %v1547_v17 }
 0x225   :  { %v1428_v38 = vpop.f32.mrb[152].mxu0  ;;  %v1956_v20 = vpop.f32.mrb[152].mxu1 }
 0x226   :  { %v2124_v30 = vmax.f32 %v1596_v51, %v2075_v43  ;;  %v1429_v42 = vadd.f32 %v4349_v8, %v1428_v38  ;;  %v1957_v44 = vadd.f32 %v4349_v8, %v1956_v20  ;;  %v3329_v14 = vpop.f32.mrb[153].mxu0  ;;  %v3445_v0 = vpop.f32.mrb[153].mxu1 }
 0x227   :  { %v1431_v54 = vpop.f32.mrb[154].mxu0  ;;  %v1959_v53 = vpop.f32.mrb[154].mxu1 }
 0x228   :  { %v2815_v23 = vpack.c.bf16 %v2124_v30, %v2123_v41  ;;  %v1548_v10 = vmax.f32 %v1429_v42, 0.0  ;;  %v2076_v15 = vmax.f32 %v1957_v44, 0.0  ;;  %v1432_v62 = vadd.f32 %v4349_v8, %v1431_v54  ;;  %v3330_v26 = vpop.f32.mrb[155].mxu0  ;;  %v3446_v13 = vpop.f32.mrb[155].mxu1 }
 0x229   :  { %v1960_v5 = vadd.f32 %v4349_v8, %v1959_v53 }
 0x22a   :  { %2883 = vst [vmem:[%s4617_s3 + $0x60] sm:$0xff] %v2815_v23   ;;  %v1597_v9 = vmax.f32 %v4204_v32, %v1548_v10  ;;  %v1549_v3 = vmax.f32 %v1432_v62, 0.0 }
 0x22b   :  { %v2077_v6 = vmax.f32 %v1960_v5, 0.0 }
 0x22c   :  { %v2125_v1 = vmax.f32 %v1597_v9, %v2076_v15  ;;  %v1598_v19 = vmax.f32 %v4210_v39, %v1549_v3 }
 0x22d   :  { %v1436_v12 = vpop.f32.mrb[156].mxu0  ;;  %v1964_v56 = vpop.f32.mrb[156].mxu1 }
 0x22e   :  { %v2126_v18 = vmax.f32 %v1598_v19, %v2077_v6  ;;  %v1437_v33 = vadd.f32 %v4349_v8, %v1436_v12  ;;  %v1965_v59 = vadd.f32 %v4349_v8, %v1964_v56  ;;  %v3333_v57 = vpop.f32.mrb[157].mxu0  ;;  %v3449_v63 = vpop.f32.mrb[157].mxu1 }
 0x22f   :  { %v1439_v24 = vpop.f32.mrb[158].mxu0  ;;  %v1967_v61 = vpop.f32.mrb[158].mxu1 }
 0x230   :  { %v2820_v60 = vpack.c.bf16 %v2126_v18, %v2125_v1  ;;  %v1550_v48 = vmax.f32 %v1437_v33, 0.0  ;;  %v2078_v2 = vmax.f32 %v1965_v59, 0.0  ;;  %v1440_v32 = vadd.f32 %v4349_v8, %v1439_v24  ;;  %v3334_v55 = vpop.f32.mrb[159].mxu0  ;;  %v3450_v37 = vpop.f32.mrb[159].mxu1 }
 0x231   :  { %v1968_v39 = vadd.f32 %v4349_v8, %v1967_v61 }
 0x232   :  { %2884 = vst [vmem:[%s4617_s3 + $0x68] sm:$0xff] %v2820_v60   ;;  %v1599_v16 = vmax.f32 %v4222_v7, %v1550_v48  ;;  %v1551_v47 = vmax.f32 %v1440_v32, 0.0 }
 0x233   :  { %v2079_v40 = vmax.f32 %v1968_v39, 0.0 }
 0x234   :  { %v2127_v27 = vmax.f32 %v1599_v16, %v2078_v2  ;;  %v1600_v31 = vmax.f32 %v4228_v11, %v1551_v47 }
 0x235   :  { %v1444_v35 = vpop.f32.mrb[160].mxu0  ;;  %v1972_v34 = vpop.f32.mrb[160].mxu1 }
 0x236   :  { %v2128_v50 = vmax.f32 %v1600_v31, %v2079_v40  ;;  %v1445_v17 = vadd.f32 %v4349_v8, %v1444_v35  ;;  %v1973_v41 = vadd.f32 %v4349_v8, %v1972_v34  ;;  %v3337_v51 = vpop.f32.mrb[161].mxu0  ;;  %v3453_v43 = vpop.f32.mrb[161].mxu1 }
 0x237   :  { %v1447_v38 = vpop.f32.mrb[162].mxu0  ;;  %v1975_v20 = vpop.f32.mrb[162].mxu1 }
 0x238   :  { %v2825_v30 = vpack.c.bf16 %v2128_v50, %v2127_v27  ;;  %v1552_v42 = vmax.f32 %v1445_v17, 0.0  ;;  %v2080_v44 = vmax.f32 %v1973_v41, 0.0  ;;  %v1448_v7 = vadd.f32 %v4349_v8, %v1447_v38  ;;  %v3338_v14 = vpop.f32.mrb[163].mxu0  ;;  %v3454_v0 = vpop.f32.mrb[163].mxu1 }
 0x239   :  { %v1976_v11 = vadd.f32 %v4349_v8, %v1975_v20 }
 0x23a   :  { %2885 = vst [vmem:[%s4617_s3 + $0x70] sm:$0xff] %v2825_v30   ;;  %v1601_v54 = vmax.f32 %v4240_v45, %v1552_v42  ;;  %v1553_v53 = vmax.f32 %v1448_v7, 0.0 }
 0x23b   :  { %v2081_v15 = vmax.f32 %v1976_v11, 0.0 }
 0x23c   :  { %v2129_v23 = vmax.f32 %v1601_v54, %v2080_v44  ;;  %v1602_v10 = vmax.f32 %v4246_v49, %v1553_v53 }
 0x23d   :  { %v1452_v62 = vpop.f32.mrb[164].mxu0  ;;  %v1980_v26 = vpop.f32.mrb[164].mxu1 }
 0x23e   :  { %v2130_v13 = vmax.f32 %v1602_v10, %v2081_v15  ;;  %v1453_v5 = vadd.f32 %v4349_v8, %v1452_v62  ;;  %v1981_v9 = vadd.f32 %v4349_v8, %v1980_v26  ;;  %v3341_v3 = vpop.f32.mrb[165].mxu0  ;;  %v3457_v1 = vpop.f32.mrb[165].mxu1 }
 0x23f   :  { %v1455_v19 = vpop.f32.mrb[166].mxu0  ;;  %v1983_v6 = vpop.f32.mrb[166].mxu1 }
 0x240   :  { %v2830_v12 = vpack.c.bf16 %v2130_v13, %v2129_v23  ;;  %v1554_v56 = vmax.f32 %v1453_v5, 0.0  ;;  %v2082_v18 = vmax.f32 %v1981_v9, 0.0  ;;  %v1456_v45 = vadd.f32 %v4349_v8, %v1455_v19  ;;  %v3342_v33 = vpop.f32.mrb[167].mxu0  ;;  %v3458_v59 = vpop.f32.mrb[167].mxu1 }
 0x241   :  { %v1984_v49 = vadd.f32 %v4349_v8, %v1983_v6 }
 0x242   :  { %2886 = vst [vmem:[%s4617_s3 + $0x78] sm:$0xff] %v2830_v12   ;;  %v1603_v57 = vmax.f32 %v4258_v21, %v1554_v56  ;;  %v1555_v63 = vmax.f32 %v1456_v45, 0.0 }
 0x243   :  { %v2083_v60 = vmax.f32 %v1984_v49, 0.0 }
 0x244   :  { %v2131_v24 = vmax.f32 %v1603_v57, %v2082_v18  ;;  %v1604_v61 = vmax.f32 %v4264_v25, %v1555_v63 }
 0x245   :  { %v1460_v48 = vpop.f32.mrb[168].mxu0  ;;  %v1988_v2 = vpop.f32.mrb[168].mxu1 }
 0x246   :  { %v2132_v32 = vmax.f32 %v1604_v61, %v2083_v60  ;;  %v1461_v55 = vadd.f32 %v4349_v8, %v1460_v48  ;;  %v1989_v37 = vadd.f32 %v4349_v8, %v1988_v2  ;;  %v3345_v39 = vpop.f32.mrb[169].mxu0  ;;  %v3461_v16 = vpop.f32.mrb[169].mxu1 }
 0x247   :  { %v1463_v47 = vpop.f32.mrb[170].mxu0  ;;  %v1991_v27 = vpop.f32.mrb[170].mxu1 }
 0x248   :  { %v2835_v31 = vpack.c.bf16 %v2132_v32, %v2131_v24  ;;  %v1556_v40 = vmax.f32 %v1461_v55, 0.0  ;;  %v2084_v35 = vmax.f32 %v1989_v37, 0.0  ;;  %v1464_v21 = vadd.f32 %v4349_v8, %v1463_v47  ;;  %v3346_v34 = vpop.f32.mrb[171].mxu0  ;;  %v3462_v50 = vpop.f32.mrb[171].mxu1 }
 0x249   :  { %v1992_v25 = vadd.f32 %v4349_v8, %v1991_v27 }
 0x24a   :  { %2887 = vst [vmem:[%s4617_s3 + $0x80] sm:$0xff] %v2835_v31   ;;  %v1605_v17 = vmax.f32 %v4276_v58, %v1556_v40  ;;  %v1557_v41 = vmax.f32 %v1464_v21, 0.0 }
 0x24b   :  { %v2085_v38 = vmax.f32 %v1992_v25, 0.0 }
 0x24c   :  { %v2133_v51 = vmax.f32 %v1605_v17, %v2084_v35  ;;  %v1606_v43 = vmax.f32 %v4282_v4, %v1557_v41 }
 0x24d   :  { %v1468_v20 = vpop.f32.mrb[172].mxu0  ;;  %v1996_v30 = vpop.f32.mrb[172].mxu1 }
 0x24e   :  { %v2134_v42 = vmax.f32 %v1606_v43, %v2085_v38  ;;  %v1469_v44 = vadd.f32 %v4349_v8, %v1468_v20  ;;  %v1997_v7 = vadd.f32 %v4349_v8, %v1996_v30  ;;  %v3349_v14 = vpop.f32.mrb[173].mxu0  ;;  %v3465_v0 = vpop.f32.mrb[173].mxu1 }
 0x24f   :  { %v1471_v11 = vpop.f32.mrb[174].mxu0  ;;  %v1999_v54 = vpop.f32.mrb[174].mxu1 }
 0x250   :  { %v2840_v53 = vpack.c.bf16 %v2134_v42, %v2133_v51  ;;  %v1558_v23 = vmax.f32 %v1469_v44, 0.0  ;;  %v2086_v10 = vmax.f32 %v1997_v7, 0.0  ;;  %v1472_v58 = vadd.f32 %v4349_v8, %v1471_v11  ;;  %v3350_v15 = vpop.f32.mrb[175].mxu0  ;;  %v3466_v62 = vpop.f32.mrb[175].mxu1 }
 0x251   :  { %v2000_v4 = vadd.f32 %v4349_v8, %v1999_v54 }
 0x252   :  { %2888 = vst [vmem:[%s4617_s3 + $0x88] sm:$0xff] %v2840_v53   ;;  %v1607_v26 = vmax.f32 %v4294_v46, %v1558_v23  ;;  %v1559_v13 = vmax.f32 %v1472_v58, 0.0 }
 0x253   :  { %v2087_v3 = vmax.f32 %v2000_v4, 0.0 }
 0x254   :  { %v2135_v5 = vmax.f32 %v1607_v26, %v2086_v10  ;;  %v1608_v9 = vmax.f32 %v4300_v52, %v1559_v13  ;;  %v4625_v26 = vld [vmem:[#allocation2_spill] sm:$0xff] }
 0x255   :  { %v1476_v1 = vpop.f32.mrb[176].mxu0  ;;  %v2004_v19 = vpop.f32.mrb[176].mxu1 }
 0x256   :  { %v2136_v6 = vmax.f32 %v1608_v9, %v2087_v3  ;;  %v1477_v12 = vadd.f32 %v4349_v8, %v1476_v1  ;;  %v2005_v56 = vadd.f32 %v4349_v8, %v2004_v19  ;;  %v3353_v18 = vpop.f32.mrb[177].mxu0  ;;  %v3469_v45 = vpop.f32.mrb[177].mxu1  ;;  %v4626_v3 = vld [vmem:[#allocation3_spill] sm:$0xff] }
 0x257   :  { %v1479_v33 = vpop.f32.mrb[178].mxu0  ;;  %v2007_v59 = vpop.f32.mrb[178].mxu1 }
 0x258   :  { %v2845_v49 = vpack.c.bf16 %v2136_v6, %v2135_v5  ;;  %v1560_v57 = vmax.f32 %v1477_v12, 0.0  ;;  %v2088_v63 = vmax.f32 %v2005_v56, 0.0  ;;  %v1480_v46 = vadd.f32 %v4349_v8, %v1479_v33  ;;  %v3354_v24 = vpop.f32.mrb[179].mxu0  ;;  %v3470_v61 = vpop.f32.mrb[179].mxu1 }
 0x259   :  { %v2008_v52 = vadd.f32 %v4349_v8, %v2007_v59 }
 0x25a   :  { %2889 = vst [vmem:[%s4617_s3 + $0x90] sm:$0xff] %v2845_v49   ;;  %v1609_v60 = vmax.f32 %v4312_v29, %v1560_v57  ;;  %v1561_v48 = vmax.f32 %v1480_v46, 0.0  ;;  %v4569_v29 = vld [vmem:[%s4616_s2] ss:$0 sm:$0xff] }
 0x25b   :  { %v2089_v55 = vmax.f32 %v2008_v52, 0.0 }
 0x25c   :  { %v2137_v2 = vmax.f32 %v1609_v60, %v2088_v63  ;;  %v1610_v32 = vmax.f32 %v4318_v36, %v1561_v48 }
 0x25d   :  { %v1484_v37 = vpop.f32.mrb[180].mxu0  ;;  %v2012_v39 = vpop.f32.mrb[180].mxu1 }
 0x25e   :  { %v2138_v16 = vmax.f32 %v1610_v32, %v2089_v55  ;;  %v1485_v47 = vadd.f32 %v4349_v8, %v1484_v37  ;;  %v2013_v27 = vadd.f32 %v4349_v8, %v2012_v39  ;;  %v3357_v31 = vpop.f32.mrb[181].mxu0  ;;  %v3473_v40 = vpop.f32.mrb[181].mxu1  ;;  %v4628_v39 = vld [vmem:[#allocation5_spill] sm:$0xff] }
 0x25f   :  { %v1487_v35 = vpop.f32.mrb[182].mxu0  ;;  %v2015_v21 = vpop.f32.mrb[182].mxu1 }
 0x260   :  { %v2850_v34 = vpack.c.bf16 %v2138_v16, %v2137_v2  ;;  %v1562_v50 = vmax.f32 %v1485_v47, 0.0  ;;  %v2090_v25 = vmax.f32 %v2013_v27, 0.0  ;;  %v1488_v36 = vadd.f32 %v4569_v29, %v1487_v35  ;;  %v3358_v17 = vpop.f32.mrb[183].mxu0  ;;  %v3474_v41 = vpop.f32.mrb[183].mxu1  ;;  %v4627_v2 = vld [vmem:[#allocation4_spill] sm:$0xff] }
 0x261   :  { %v2016_v51 = vadd.f32 %v4569_v29, %v2015_v21 }
 0x262   :  { %2890 = vst [vmem:[%s4617_s3 + $0x98] sm:$0xff] %v2850_v34   ;;  %v1611_v8 = vmax.f32 %v4330_v22, %v1562_v50  ;;  %v1563_v43 = vmax.f32 %v1488_v36, 0.0 }
 0x263   :  { %v2091_v30 = vmax.f32 %v2016_v51, 0.0 }
 0x264   :  { %v2139_v38 = vmax.f32 %v1611_v8, %v2090_v25  ;;  %v1612_v20 = vmax.f32 %v4336_v28, %v1563_v43 }
 0x265   :  { %v1492_v42 = vpop.f32.mrb[184].mxu0  ;;  %v2020_v44 = vpop.f32.mrb[184].mxu1 }
 0x266   :  { %v2140_v7 = vmax.f32 %v1612_v20, %v2091_v30  ;;  %v1493_v14 = vadd.f32 %v4569_v29, %v1492_v42  ;;  %v2021_v0 = vadd.f32 %v4569_v29, %v2020_v44  ;;  %v3361_v11 = vpop.f32.mrb[185].mxu0  ;;  %v3477_v54 = vpop.f32.mrb[185].mxu1  ;;  %v4629_v30 = vld [vmem:[#allocation6_spill] sm:$0xff] }
 0x267   :  { %v1495_v53 = vpop.f32.mrb[186].mxu0  ;;  %v2023_v23 = vpop.f32.mrb[186].mxu1 }
 0x268   :  { %v2855_v10 = vpack.c.bf16 %v2140_v7, %v2139_v38  ;;  %v1564_v58 = vmax.f32 %v1493_v14, 0.0  ;;  %v2092_v15 = vmax.f32 %v2021_v0, 0.0  ;;  %v1496_v22 = vadd.f32 %v4569_v29, %v1495_v53  ;;  %v3362_v62 = vpop.f32.mrb[187].mxu0  ;;  %v3478_v4 = vpop.f32.mrb[187].mxu1  ;;  %v4630_v14 = vld [vmem:[#allocation7_spill] sm:$0xff] }
 0x269   :  { %v2024_v28 = vadd.f32 %v4569_v29, %v2023_v23 }
 0x26a   :  { %2891 = vst [vmem:[%s4617_s3 + $0xa0] sm:$0xff] %v2855_v10   ;;  %v1613_v13 = vmax.f32 %v4625_v26, %v1564_v58  ;;  %v1565_v5 = vmax.f32 %v1496_v22, 0.0 }
 0x26b   :  { %v2093_v19 = vmax.f32 %v2024_v28, 0.0 }
 0x26c   :  { %v2141_v9 = vmax.f32 %v1613_v13, %v2092_v15  ;;  %v1614_v1 = vmax.f32 %v4626_v3, %v1565_v5  ;;  %v4631_v3 = vld [vmem:[#allocation8_spill] sm:$0xff] }
 0x26d   :  { %v1500_v6 = vpop.f32.mrb[188].mxu0  ;;  %v2028_v12 = vpop.f32.mrb[188].mxu1 }
 0x26e   :  { %v2142_v56 = vmax.f32 %v1614_v1, %v2093_v19  ;;  %v1501_v18 = vadd.f32 %v4569_v29, %v1500_v6  ;;  %v2029_v45 = vadd.f32 %v4569_v29, %v2028_v12  ;;  %v3365_v33 = vpop.f32.mrb[189].mxu0  ;;  %v3481_v59 = vpop.f32.mrb[189].mxu1 }
 0x26f   :  { %v1503_v49 = vpop.f32.mrb[190].mxu0  ;;  %v2031_v57 = vpop.f32.mrb[190].mxu1 }
 0x270   :  { %v2860_v63 = vpack.c.bf16 %v2142_v56, %v2141_v9  ;;  %v1566_v46 = vmax.f32 %v1501_v18, 0.0  ;;  %v2094_v24 = vmax.f32 %v2029_v45, 0.0  ;;  %v1504_v61 = vadd.f32 %v4569_v29, %v1503_v49  ;;  %v3366_v52 = vpop.f32.mrb[191].mxu0  ;;  %v3482_v60 = vpop.f32.mrb[191].mxu1 }
 0x271   :  { %v2032_v48 = vadd.f32 %v4569_v29, %v2031_v57 }
 0x272   :  { %2892 = vst [vmem:[%s4617_s3 + $0xa8] sm:$0xff] %v2860_v63   ;;  %v1615_v32 = vmax.f32 %v4627_v2, %v1566_v46  ;;  %v1567_v55 = vmax.f32 %v1504_v61, 0.0 }
 0x273   :  { %v2095_v47 = vmax.f32 %v2032_v48, 0.0 }
 0x274   :  { %v2143_v37 = vmax.f32 %v1615_v32, %v2094_v24  ;;  %v1616_v16 = vmax.f32 %v4628_v39, %v1567_v55 }
 0x275   :  { %v1508_v27 = vpop.f32.mrb[192].mxu0  ;;  %v2036_v31 = vpop.f32.mrb[192].mxu1 }
 0x276   :  { %v2144_v40 = vmax.f32 %v1616_v16, %v2095_v47  ;;  %v1509_v35 = vadd.f32 %v4569_v29, %v1508_v27  ;;  %v2037_v21 = vadd.f32 %v4569_v29, %v2036_v31  ;;  %v3369_v34 = vpop.f32.mrb[193].mxu0  ;;  %v3485_v50 = vpop.f32.mrb[193].mxu1 }
 0x277   :  { %v1511_v25 = vpop.f32.mrb[194].mxu0  ;;  %v2039_v36 = vpop.f32.mrb[194].mxu1 }
 0x278   :  { %v2865_v17 = vpack.c.bf16 %v2144_v40, %v2143_v37  ;;  %v1568_v41 = vmax.f32 %v1509_v35, 0.0  ;;  %v2096_v51 = vmax.f32 %v2037_v21, 0.0  ;;  %v1512_v8 = vadd.f32 %v4569_v29, %v1511_v25  ;;  %v3370_v43 = vpop.f32.mrb[195].mxu0  ;;  %v3486_v38 = vpop.f32.mrb[195].mxu1 }
 0x279   :  { %v2040_v20 = vadd.f32 %v4569_v29, %v2039_v36 }
 0x27a   :  { %2893 = vst [vmem:[%s4617_s3 + $0xb0] sm:$0xff] %v2865_v17   ;;  %v1617_v42 = vmax.f32 %v4629_v30, %v1568_v41  ;;  %v1569_v44 = vmax.f32 %v1512_v8, 0.0 }
 0x27b   :  { %v2097_v11 = vmax.f32 %v2040_v20, 0.0 }
 0x27c   :  { %v2145_v7 = vmax.f32 %v1617_v42, %v2096_v51  ;;  %v1618_v0 = vmax.f32 %v4630_v14, %v1569_v44 }
 0x27d   :  { %v1516_v54 = vpop.f32.mrb[196].mxu0  ;;  %v2044_v53 = vpop.f32.mrb[196].mxu1 }
 0x27e   :  { %v2146_v23 = vmax.f32 %v1618_v0, %v2097_v11  ;;  %v1517_v10 = vadd.f32 %v4569_v29, %v1516_v54  ;;  %v2045_v58 = vadd.f32 %v4569_v29, %v2044_v53  ;;  %v3373_v15 = vpop.f32.mrb[197].mxu0  ;;  %v3489_v22 = vpop.f32.mrb[197].mxu1 }
 0x27f   :  { %v1519_v62 = vpop.f32.mrb[198].mxu0  ;;  %v2047_v4 = vpop.f32.mrb[198].mxu1 }
 0x280   :  { %v2870_v28 = vpack.c.bf16 %v2146_v23, %v2145_v7  ;;  %v1570_v26 = vmax.f32 %v1517_v10, 0.0  ;;  %v2098_v13 = vmax.f32 %v2045_v58, 0.0  ;;  %v3374_v5 = vpop.f32.mrb[199].mxu0  ;;  %v3490_v9 = vpop.f32.mrb[199].mxu1 }
 0x282   :  { %2894 = vst [vmem:[%s4617_s3 + $0xb8] sm:$0xff] %v2870_v28   ;;  %v1619_v1 = vmax.f32 %v4631_v3, %v1570_v26 }
 0x284   :  { %v2147_v19 = vmax.f32 %v1619_v1, %v2098_v13 }
 0x286   :  { %v2751_v6 = vpack.c.bf16 %v2147_v19, %v2147_v19 }
 0x288   :  { %2393 = vst [vmem:[%s4617_s3 + $0xc0] sm:$0xf] %v2751_v6 }

// kernel: client_model_noise_forward.3
= control target key start
LH: loop header
LB: loop body
LE: loop exit
PB: predicated region body
PF: predicated region fallthrough
CT: control target
= control target key end

     0   :  { %s5228_s0 = inlined_call_operand.vmem [shape: bf16[4,50,256], index: 0, kind: input, shape index: {}]   ;;  %s5229_s1 = inlined_call_operand.vmem [shape: bf16[256,128], index: 1, kind: input, shape index: {}]   ;;  %s5230_s2 = inlined_call_operand.vmem [shape: f32[1,128], index: 2, kind: input, shape index: {}]   ;;  %s5231_s3 = inlined_call_operand.vmem [shape: bf16[3200,128], index: 3, kind: input, shape index: {}]   ;;  %s5232_s4 = inlined_call_operand.vmem [shape: f32[1,128], index: 4, kind: input, shape index: {}]   ;;  %s5233_s5 = inlined_call_operand.vmem [shape: bf16[128,128], index: 5, kind: input, shape index: {}]   ;;  %s5234_s6 = inlined_call_operand.vmem [shape: f32[1,128], index: 6, kind: input, shape index: {}]   ;;  %s5235_s7 = inlined_call_operand.vmem [shape: bf16[128,128], index: 7, kind: input, shape index: {}]   ;;  %s5236_s8 = inlined_call_operand.vmem [shape: f32[1,128], index: 8, kind: input, shape index: {}]   ;;  %s5237_s9 = inlined_call_operand.hbm [shape: f32[2,128], index: 9, kind: output, shape index: {}]  }
   0x1   :  { %v3891_v0 = vld [vmem:[%s5229_s1 + $0x40] sm:$0xff]   ;;  %v3893_v2 = vld [vmem:[%s5229_s1 + $0x48] sm:$0xff]   ;;  %v3895_v4 = vld [vmem:[%s5229_s1 + $0x50] sm:$0xff]  }
   0x2   :  { %v3892_v1 = vld [vmem:[%s5229_s1] sm:$0xff]   ;;  %3377 = vmatprep.subr.bf16.mxu0 %v3891_v0  ;;  %3417 = vmatprep.subr.bf16.mxu1 %v3891_v0  ;;  %v3894_v3 = vld [vmem:[%s5229_s1 + $0x8] sm:$0xff]   ;;  %v4262_v5 = vld [vmem:[%s5229_s1 + $0x10] sm:$0xff]  }
   0x3   :  { %3378 = vmatpush3.bf16.msra.mxu0 %v3892_v1  ;;  %3418 = vmatpush3.bf16.msra.mxu1 %v3892_v1  ;;  %v3897_v6 = vld [vmem:[%s5229_s1 + $0x58] sm:$0xff]   ;;  %v4277_v8 = vld [vmem:[%s5229_s1 + $0x60] sm:$0xff]   ;;  %v4291_v10 = vld [vmem:[%s5229_s1 + $0x68] sm:$0xff]  }
   0x4   :  { %3379 = vmatprep.subr.bf16.mxu0 %v3893_v2  ;;  %3419 = vmatprep.subr.bf16.mxu1 %v3893_v2  ;;  %v4272_v7 = vld [vmem:[%s5229_s1 + $0x18] sm:$0xff]   ;;  %v4284_v9 = vld [vmem:[%s5229_s1 + $0x20] sm:$0xff]   ;;  %v4304_v13 = vld [vmem:[%s5229_s1 + $0x28] sm:$0xff]  }
   0x5   :  { %v3909_v11 = vld [vmem:[%s5228_s0 + $0x4] ss:$8 sps:$4 sm:$0xff]   ;;  %v4311_v14 = vld [vmem:[%s5229_s1 + $0x70] sm:$0xff]   ;;  %v4325_v16 = vld [vmem:[%s5229_s1 + $0x78] sm:$0xff]  }
   0x6   :  { %v3912_v12 = vld [vmem:[%s5228_s0 + $0x3c] ss:$8 sps:$4 sm:$0xff]   ;;  %245 = vmatprep.mubr.bf16.mxu0 %v3909_v11  ;;  %v4318_v15 = vld [vmem:[%s5229_s1 + $0x30] sm:$0xff]   ;;  %v3907_v18 = vld [vmem:[%s5228_s0] ss:$8 sps:$4 sm:$0xff]  }
   0x7   :  { %3380 = vmatpush3.bf16.msra.mxu0 %v3894_v3  ;;  %3420 = vmatpush3.bf16.msra.mxu1 %v3894_v3  ;;  %v4332_v17 = vld [vmem:[%s5229_s1 + $0x38] sm:$0xff]   ;;  %v3915_v21 = vld [vmem:[%s5228_s0 + $0x4c] ss:$8 sps:$4 sm:$0xff]   ;;  %v3918_v23 = vld [vmem:[%s5228_s0 + $0x48] ss:$8 sps:$4 sm:$0xff]  }
   0x8   :  { %3381 = vmatprep.subr.bf16.mxu0 %v3895_v4  ;;  %3421 = vmatprep.subr.bf16.mxu1 %v3895_v4  ;;  %v3910_v19 = vld [vmem:[%s5228_s0 + $0x38] ss:$8 sps:$4 sm:$0xff]   ;;  %v3913_v20 = vld [vmem:[%s5228_s0 + $0x14] ss:$8 sps:$4 sm:$0xff]   ;;  %v3919_v24 = vld [vmem:[%s5228_s0 + $0x24] ss:$8 sps:$4 sm:$0xff]  }
   0x9   :  { %361 = vmatprep.mubr.bf16.mxu1 %v3912_v12  ;;  %v3917_v22 = vld [vmem:[%s5228_s0 + $0x10] ss:$8 sps:$4 sm:$0xff]   ;;  %v3921_v25 = vld [vmem:[%s5228_s0 + $0x5c] ss:$8 sps:$4 sm:$0xff]   ;;  %v3923_v26 = vld [vmem:[%s5228_s0 + $0x20] ss:$8 sps:$4 sm:$0xff]  }
   0xa   :  { %v3924_v27 = vld [vmem:[%s5228_s0 + $0x58] ss:$8 sps:$4 sm:$0xff]   ;;  %v73_v28 = vld [vmem:[%s5228_s0 + $0x30] sm:$0x11]  ;;  %v3119_v29 = vld [vmem:[%s5228_s0 + $0x68] sm:$0x11] }
   0xb   :  { %3382 = vmatpush3.bf16.msra.mxu0 %v4262_v5  ;;  %3422 = vmatpush3.bf16.msra.mxu1 %v4262_v5  ;;  %v3096_v30 = vcombine.high %v73_v28, %v73_v28  ;;  %v3127_v31 = vcombine.high %v3119_v29, %v3119_v29  ;;  %v3095_v32 = vcombine.low %v73_v28, %v73_v28  ;;  %v3931_v34 = vld [vmem:[%s5228_s0 + $0x74] ss:$8 sps:$4 sm:$0xff]   ;;  %v3929_v36 = vld [vmem:[%s5228_s0 + $0x70] ss:$8 sps:$4 sm:$0xff]   ;;  %v3935_v38 = vld [vmem:[%s5228_s0 + $0x84] ss:$8 sps:$4 sm:$0xff]  }
   0xc   :  { %3383 = vmatprep.subr.bf16.mxu0 %v3897_v6  ;;  %3423 = vmatprep.subr.bf16.mxu1 %v3897_v6  ;;  %v3126_v33 = vcombine.low %v3119_v29, %v3119_v29  ;;  %v3934_v35 = vld [vmem:[%s5228_s0 + $0xac] ss:$8 sps:$4 sm:$0xff]   ;;  %v3932_v37 = vld [vmem:[%s5228_s0 + $0xa8] ss:$8 sps:$4 sm:$0xff]   ;;  %v3938_v39 = vld [vmem:[%s5228_s0 + $0xbc] ss:$8 sps:$4 sm:$0xff]  }
   0xd   :  { %v3937_v40 = vld [vmem:[%s5228_s0 + $0x80] ss:$8 sps:$4 sm:$0xff]   ;;  %v3941_v42 = vld [vmem:[%s5228_s0 + $0x94] ss:$8 sps:$4 sm:$0xff]   ;;  %v3943_v46 = vld [vmem:[%s5228_s0 + $0x90] ss:$8 sps:$4 sm:$0xff]  }
   0xe   :  { %v3940_v41 = vld [vmem:[%s5228_s0 + $0xb8] ss:$8 sps:$4 sm:$0xff]   ;;  %v3944_v43 = vld [vmem:[%s5228_s0 + $0xcc] ss:$8 sps:$4 sm:$0xff]   ;;  %v3946_v47 = vld [vmem:[%s5228_s0 + $0xc8] ss:$8 sps:$4 sm:$0xff]  }
   0xf   :  { %3384 = vmatpush3.bf16.msra.mxu0 %v4272_v7  ;;  %3424 = vmatpush3.bf16.msra.mxu1 %v4272_v7  ;;  %v3134_v44 = vld [vmem:[%s5228_s0 + $0xa0] sm:$0x11]  ;;  %v3149_v45 = vld [vmem:[%s5228_s0 + $0xd8] sm:$0x11]  ;;  %v3955_v56 = vld [vmem:[%s5231_s3 + $0x48] sm:$0xff]  }
  0x10   :  { %3385 = vmatprep.subr.bf16.mxu0 %v4277_v8  ;;  %3425 = vmatprep.subr.bf16.mxu1 %v4277_v8  ;;  %v3142_v48 = vcombine.high %v3134_v44, %v3134_v44  ;;  %v3157_v49 = vcombine.high %v3149_v45, %v3149_v45  ;;  %v3141_v50 = vcombine.low %v3134_v44, %v3134_v44  ;;  %v3951_v52 = vld [vmem:[%s5231_s3 + $0x40] sm:$0xff]   ;;  %v3956_v57 = vld [vmem:[%s5231_s3 + $0xc8] sm:$0xff]   ;;  %v3959_v60 = vld [vmem:[%s5231_s3 + $0x50] sm:$0xff]  }
  0x11   :  { %v3156_v51 = vcombine.low %v3149_v45, %v3149_v45  ;;  %v3952_v53 = vld [vmem:[%s5231_s3 + $0xc0] sm:$0xff]   ;;  %v3957_v58 = vld [vmem:[%s5231_s3 + $0x8] sm:$0xff]   ;;  %v3960_v61 = vld [vmem:[%s5231_s3 + $0xd0] sm:$0xff]  }
  0x12   :  { %v3953_v54 = vld [vmem:[%s5231_s3] sm:$0xff]   ;;  %v3958_v59 = vld [vmem:[%s5231_s3 + $0x88] sm:$0xff]   ;;  %v3961_v62 = vld [vmem:[%s5231_s3 + $0x10] sm:$0xff]  }
  0x13   :  { %3386 = vmatpush3.bf16.msra.mxu0 %v4284_v9  ;;  %3426 = vmatpush3.bf16.msra.mxu1 %v4284_v9  ;;  %v3954_v55 = vld [vmem:[%s5231_s3 + $0x80] sm:$0xff]   ;;  %v3962_v63 = vld [vmem:[%s5231_s3 + $0x90] sm:$0xff]   ;;  %v3974_v11 = vld [vmem:[%s5231_s3 + $0xa8] sm:$0xff]  }
  0x14   :  { %3387 = vmatprep.subr.bf16.mxu0 %v4291_v10  ;;  %3427 = vmatprep.subr.bf16.mxu1 %v4291_v10  ;;  %v3975_v12 = vld [vmem:[%s5231_s3 + $0x70] sm:$0xff]  }
  0x17   :  { %3388 = vmatpush3.bf16.msra.mxu0 %v4304_v13  ;;  %3428 = vmatpush3.bf16.msra.mxu1 %v4304_v13 }
  0x18   :  { %3389 = vmatprep.subr.bf16.mxu0 %v4311_v14  ;;  %3429 = vmatprep.subr.bf16.mxu1 %v4311_v14 }
  0x1b   :  { %3390 = vmatpush3.bf16.msra.mxu0 %v4318_v15  ;;  %3430 = vmatpush3.bf16.msra.mxu1 %v4318_v15 }
  0x1c   :  { %3391 = vmatprep.subr.bf16.mxu0 %v4325_v16  ;;  %3431 = vmatprep.subr.bf16.mxu1 %v4325_v16 }
  0x1f   :  { %3392 = vmatpush3.bf16.msra.mxu0 %v4332_v17  ;;  %3432 = vmatpush3.bf16.msra.mxu1 %v4332_v17 }
  0x20   :  { %3457 = vmatprep.subr.bf16.mxu0 %v3891_v0  ;;  %3497 = vmatprep.subr.bf16.mxu1 %v3891_v0  ;;  %v3963_v0 = vld [vmem:[%s5231_s3 + $0x58] sm:$0xff]  }
  0x22   :  { %246 = vmatmul.mubr.bf16.vlgmr.msra.gmra.mrb[0].mxu0 %v3907_v18  ;;  %362 = vmatmul.mubr.bf16.vlgmr.msra.gmra.mrb[0].mxu1 %v3910_v19  ;;  %v3981_v18 = vld [vmem:[%s5231_s3 + $0x38] sm:$0xff]  }
  0x23   :  { %3458 = vmatpush3.bf16.msra.mxu0 %v3892_v1  ;;  %3498 = vmatpush3.bf16.msra.mxu1 %v3892_v1  ;;  %v3964_v1 = vld [vmem:[%s5231_s3 + $0xd8] sm:$0xff]  }
  0x24   :  { %3459 = vmatprep.subr.bf16.mxu0 %v3893_v2  ;;  %3499 = vmatprep.subr.bf16.mxu1 %v3893_v2  ;;  %v3965_v2 = vld [vmem:[%s5231_s3 + $0x18] sm:$0xff]  }
  0x25   :  { %253 = vmatprep.mubr.bf16.mxu0 %v3913_v20  ;;  %369 = vmatprep.mubr.bf16.mxu1 %v3915_v21  ;;  %v3982_v19 = vld [vmem:[%s5231_s3 + $0xb8] sm:$0xff]   ;;  %v3983_v20 = vld [vmem:[%s5231_s3 + $0x140] sm:$0xff]  }
  0x26   :  { %v3984_v21 = vld [vmem:[%s5231_s3 + $0x1c0] sm:$0xff]  }
  0x27   :  { %3460 = vmatpush3.bf16.msra.mxu0 %v3894_v3  ;;  %3500 = vmatpush3.bf16.msra.mxu1 %v3894_v3  ;;  %v3966_v3 = vld [vmem:[%s5231_s3 + $0x98] sm:$0xff]  }
  0x28   :  { %3461 = vmatprep.subr.bf16.mxu0 %v3895_v4  ;;  %3501 = vmatprep.subr.bf16.mxu1 %v3895_v4  ;;  %v3967_v4 = vld [vmem:[%s5231_s3 + $0x60] sm:$0xff]  }
  0x2a   :  { %254 = vmatmul.mubr.bf16.gmra.mrb[4].mxu0 %v3917_v22  ;;  %370 = vmatmul.mubr.bf16.gmra.mrb[4].mxu1 %v3918_v23 }
  0x2b   :  { %3462 = vmatpush3.bf16.msra.mxu0 %v4262_v5  ;;  %3502 = vmatpush3.bf16.msra.mxu1 %v4262_v5  ;;  %v3968_v5 = vld [vmem:[%s5231_s3 + $0xe0] sm:$0xff]  }
  0x2c   :  { %3463 = vmatprep.subr.bf16.mxu0 %v3897_v6  ;;  %3503 = vmatprep.subr.bf16.mxu1 %v3897_v6  ;;  %v3969_v6 = vld [vmem:[%s5231_s3 + $0x20] sm:$0xff]  }
  0x2d   :  { %261 = vmatprep.mubr.bf16.mxu0 %v3919_v24  ;;  %377 = vmatprep.mubr.bf16.mxu1 %v3921_v25 }
  0x2f   :  { %3464 = vmatpush3.bf16.msra.mxu0 %v4272_v7  ;;  %3504 = vmatpush3.bf16.msra.mxu1 %v4272_v7  ;;  %v3970_v7 = vld [vmem:[%s5231_s3 + $0xa0] sm:$0xff]  }
  0x30   :  { %3465 = vmatprep.subr.bf16.mxu0 %v4277_v8  ;;  %3505 = vmatprep.subr.bf16.mxu1 %v4277_v8  ;;  %v3971_v8 = vld [vmem:[%s5231_s3 + $0x68] sm:$0xff]  }
  0x32   :  { %262 = vmatmul.mubr.bf16.gmra.mrb[8].mxu0 %v3923_v26  ;;  %378 = vmatmul.mubr.bf16.gmra.mrb[8].mxu1 %v3924_v27 }
  0x33   :  { %3466 = vmatpush3.bf16.msra.mxu0 %v4284_v9  ;;  %3506 = vmatpush3.bf16.msra.mxu1 %v4284_v9  ;;  %v3972_v9 = vld [vmem:[%s5231_s3 + $0xe8] sm:$0xff]  }
  0x34   :  { %3467 = vmatprep.subr.bf16.mxu0 %v4291_v10  ;;  %3507 = vmatprep.subr.bf16.mxu1 %v4291_v10  ;;  %v3973_v10 = vld [vmem:[%s5231_s3 + $0x28] sm:$0xff]  }
  0x35   :  { %269 = vmatprep.mubr.bf16.mxu0 %v3096_v30  ;;  %385 = vmatprep.mubr.bf16.mxu1 %v3127_v31 }
  0x37   :  { %3468 = vmatpush3.bf16.msra.mxu0 %v4304_v13  ;;  %3508 = vmatpush3.bf16.msra.mxu1 %v4304_v13  ;;  %v3976_v13 = vld [vmem:[%s5231_s3 + $0xf0] sm:$0xff]  }
  0x38   :  { %3469 = vmatprep.subr.bf16.mxu0 %v4311_v14  ;;  %3509 = vmatprep.subr.bf16.mxu1 %v4311_v14  ;;  %v3977_v14 = vld [vmem:[%s5231_s3 + $0x30] sm:$0xff]  }
  0x3a   :  { %270 = vmatmul.mubr.bf16.gmra.mrb[12].mxu0 %v3095_v32  ;;  %386 = vmatmul.mubr.bf16.gmra.mrb[12].mxu1 %v3126_v33 }
  0x3b   :  { %3470 = vmatpush3.bf16.msra.mxu0 %v4318_v15  ;;  %3510 = vmatpush3.bf16.msra.mxu1 %v4318_v15  ;;  %v3978_v15 = vld [vmem:[%s5231_s3 + $0xb0] sm:$0xff]  }
  0x3c   :  { %3471 = vmatprep.subr.bf16.mxu0 %v4325_v16  ;;  %3511 = vmatprep.subr.bf16.mxu1 %v4325_v16  ;;  %v3979_v16 = vld [vmem:[%s5231_s3 + $0x78] sm:$0xff]  }
  0x3d   :  { %484 = vmatprep.mubr.bf16.mxu0 %v3931_v34  ;;  %607 = vmatprep.mubr.bf16.mxu1 %v3934_v35 }
  0x3f   :  { %3472 = vmatpush3.bf16.msra.mxu0 %v4332_v17  ;;  %3512 = vmatpush3.bf16.msra.mxu1 %v4332_v17  ;;  %v3980_v17 = vld [vmem:[%s5231_s3 + $0xf8] sm:$0xff]  }
  0x40   :  { %3537 = vmatprep.subr.bf16.mxu0 %v3951_v52  ;;  %3559 = vmatprep.subr.bf16.mxu1 %v3952_v53 }
  0x42   :  { %485 = vmatmul.mubr.bf16.vlgmr.msra.gmra.mrb[16].mxu0 %v3929_v36  ;;  %608 = vmatmul.mubr.bf16.vlgmr.msra.gmra.mrb[16].mxu1 %v3932_v37 }
  0x43   :  { %492 = vmatprep.mubr.bf16.mxu0 %v3935_v38  ;;  %615 = vmatprep.mubr.bf16.mxu1 %v3938_v39 }
  0x44   :  { %3538 = vmatpush3.bf16.msra.mxu0 %v3953_v54  ;;  %3560 = vmatpush3.bf16.msra.mxu1 %v3954_v55 }
  0x45   :  { %3539 = vmatprep.subr.bf16.mxu0 %v3955_v56  ;;  %3561 = vmatprep.subr.bf16.mxu1 %v3956_v57 }
  0x48   :  { %3540 = vmatpush3.bf16.msra.mxu0 %v3957_v58  ;;  %3562 = vmatpush3.bf16.msra.mxu1 %v3958_v59 }
  0x49   :  { %3541 = vmatprep.subr.bf16.mxu0 %v3959_v60  ;;  %3563 = vmatprep.subr.bf16.mxu1 %v3960_v61 }
  0x4a   :  { %493 = vmatmul.mubr.bf16.gmra.mrb[20].mxu0 %v3937_v40  ;;  %616 = vmatmul.mubr.bf16.gmra.mrb[20].mxu1 %v3940_v41 }
  0x4b   :  { %500 = vmatprep.mubr.bf16.mxu0 %v3941_v42  ;;  %623 = vmatprep.mubr.bf16.mxu1 %v3944_v43 }
  0x4c   :  { %3542 = vmatpush3.bf16.msra.mxu0 %v3961_v62  ;;  %3564 = vmatpush3.bf16.msra.mxu1 %v3962_v63 }
  0x4d   :  { %3543 = vmatprep.subr.bf16.mxu0 %v3963_v0  ;;  %3565 = vmatprep.subr.bf16.mxu1 %v3964_v1 }
  0x50   :  { %3544 = vmatpush3.bf16.msra.mxu0 %v3965_v2  ;;  %3566 = vmatpush3.bf16.msra.mxu1 %v3966_v3 }
  0x51   :  { %3545 = vmatprep.subr.bf16.mxu0 %v3967_v4  ;;  %3567 = vmatprep.subr.bf16.mxu1 %v3968_v5 }
  0x52   :  { %501 = vmatmul.mubr.bf16.gmra.mrb[24].mxu0 %v3943_v46  ;;  %624 = vmatmul.mubr.bf16.gmra.mrb[24].mxu1 %v3946_v47 }
  0x53   :  { %508 = vmatprep.mubr.bf16.mxu0 %v3142_v48  ;;  %631 = vmatprep.mubr.bf16.mxu1 %v3157_v49 }
  0x54   :  { %3546 = vmatpush3.bf16.msra.mxu0 %v3969_v6  ;;  %3568 = vmatpush3.bf16.msra.mxu1 %v3970_v7 }
  0x55   :  { %3547 = vmatprep.subr.bf16.mxu0 %v3971_v8  ;;  %3569 = vmatprep.subr.bf16.mxu1 %v3972_v9 }
  0x58   :  { %3548 = vmatpush3.bf16.msra.mxu0 %v3973_v10  ;;  %3570 = vmatpush3.bf16.msra.mxu1 %v3974_v11 }
  0x59   :  { %3549 = vmatprep.subr.bf16.mxu0 %v3975_v12  ;;  %3571 = vmatprep.subr.bf16.mxu1 %v3976_v13 }
  0x5a   :  { %509 = vmatmul.mubr.bf16.gmra.mrb[28].mxu0 %v3141_v50  ;;  %632 = vmatmul.mubr.bf16.gmra.mrb[28].mxu1 %v3156_v51 }
  0x5c   :  { %3550 = vmatpush3.bf16.msra.mxu0 %v3977_v14  ;;  %3572 = vmatpush3.bf16.msra.mxu1 %v3978_v15 }
  0x5d   :  { %3551 = vmatprep.subr.bf16.mxu0 %v3979_v16  ;;  %3573 = vmatprep.subr.bf16.mxu1 %v3980_v17 }
  0x60   :  { %3552 = vmatpush3.bf16.msra.mxu0 %v3981_v18  ;;  %3574 = vmatpush3.bf16.msra.mxu1 %v3982_v19 }
  0x61   :  { %3581 = vmatprep.subr.bf16.mxu0 %v3983_v20  ;;  %3603 = vmatprep.subr.bf16.mxu1 %v3984_v21 }
  0x62   :  { %14 = vsyncpa [#allocation3], 0  ;;  %v4541_v24 = vld [vmem:[%s5230_s2] ss:$0 sm:$0xff]  ;;  %vm4192_vm0 = vmmov 0   ;;  %s4193_s0 = smov [#allocation2]  }
  0x63   :  { %s3080_s15 = sshll.u32 %s4193_s0, 4  ;;  %s3081_s15 = int_to_ptr.vmem [resolvable:$true] %s3080_s15 }
  0x64   :  { %p4172_p1 = scmp.lt.s32.totalorder %s3081_s15, %s3081_s15 }
  0xf5   :  { %v3393_v22 = vpop.f32.mrb[0].mxu0  ;;  %v3433_v23 = vpop.f32.mrb[0].mxu1 }
  0xf6   :  { %v3394_v25 = vpop.f32.mrb[1].mxu0  ;;  %v3434_v26 = vpop.f32.mrb[1].mxu1 }
  0xf7   :  { %v3395_v27 = vadd.f32 %v3394_v25, %v3393_v22  ;;  %v3435_v28 = vadd.f32 %v3434_v26, %v3433_v23  ;;  %v3396_v29 = vpop.f32.mrb[2].mxu0  ;;  %v3436_v30 = vpop.f32.mrb[2].mxu1 }
  0xf8   :  { %v3397_v31 = vpop.f32.mrb[3].mxu0  ;;  %v3437_v32 = vpop.f32.mrb[3].mxu1 }
  0xf9   :  { %v248_v33 = vadd.f32 %v3395_v27, %v4541_v24  ;;  %v364_v34 = vadd.f32 %v3435_v28, %v4541_v24  ;;  %v3398_v35 = vadd.f32 %v3397_v31, %v3396_v29  ;;  %v3438_v36 = vadd.f32 %v3437_v32, %v3436_v30 }
  0xfb   :  { %v277_v37 = vmax.f32 %v248_v33, 0.0  ;;  %v393_v38 = vmax.f32 %v364_v34, 0.0  ;;  %v251_v39 = vadd.f32 %v3398_v35, %v4541_v24  ;;  %v367_v40 = vadd.f32 %v3438_v36, %v4541_v24 }
  0xfd   :  { %v4547_v41 = vmax.f32 %v277_v37, %v393_v38  ;;  %v278_v42 = vmax.f32 %v251_v39, 0.0  ;;  %v394_v43 = vmax.f32 %v367_v40, 0.0  ;;  %v3399_v44 = vpop.f32.mrb[4].mxu0  ;;  %v3439_v45 = vpop.f32.mrb[4].mxu1 }
  0xfe   :  { %v3400_v46 = vpop.f32.mrb[5].mxu0  ;;  %v3440_v47 = vpop.f32.mrb[5].mxu1 }
  0xff   :  { %v4549_v48 = vmax.f32 %v278_v42, %v394_v43  ;;  %v3401_v49 = vadd.f32 %v3400_v46, %v3399_v44  ;;  %v3441_v50 = vadd.f32 %v3440_v47, %v3439_v45  ;;  %v3402_v51 = vpop.f32.mrb[6].mxu0  ;;  %v3442_v52 = vpop.f32.mrb[6].mxu1 }
 0x100   :  { %v3403_v53 = vpop.f32.mrb[7].mxu0  ;;  %v3443_v54 = vpop.f32.mrb[7].mxu1 }
 0x101   :  { %v256_v55 = vadd.f32 %v3401_v49, %v4541_v24  ;;  %v372_v56 = vadd.f32 %v3441_v50, %v4541_v24  ;;  %v3404_v57 = vadd.f32 %v3403_v53, %v3402_v51  ;;  %v3444_v58 = vadd.f32 %v3443_v54, %v3442_v52 }
 0x103   :  { %v279_v59 = vmax.f32 %v256_v55, 0.0  ;;  %v395_v60 = vmax.f32 %v372_v56, 0.0  ;;  %v259_v61 = vadd.f32 %v3404_v57, %v4541_v24  ;;  %v375_v62 = vadd.f32 %v3444_v58, %v4541_v24 }
 0x105   :  { %v4555_v63 = vmax.f32 %v279_v59, %v395_v60  ;;  %v280_v0 = vmax.f32 %v259_v61, 0.0  ;;  %v396_v1 = vmax.f32 %v375_v62, 0.0  ;;  %v3405_v2 = vpop.f32.mrb[8].mxu0  ;;  %v3445_v3 = vpop.f32.mrb[8].mxu1 }
 0x106   :  { %v3406_v4 = vpop.f32.mrb[9].mxu0  ;;  %v3446_v5 = vpop.f32.mrb[9].mxu1 }
 0x107   :  { %v4557_v6 = vmax.f32 %v280_v0, %v396_v1  ;;  %v3407_v7 = vadd.f32 %v3406_v4, %v3405_v2  ;;  %v3447_v8 = vadd.f32 %v3446_v5, %v3445_v3  ;;  %v3408_v9 = vpop.f32.mrb[10].mxu0  ;;  %v3448_v10 = vpop.f32.mrb[10].mxu1 }
 0x108   :  { %v3409_v11 = vpop.f32.mrb[11].mxu0  ;;  %v3449_v12 = vpop.f32.mrb[11].mxu1 }
 0x109   :  { %v264_v13 = vadd.f32 %v3407_v7, %v4541_v24  ;;  %v380_v14 = vadd.f32 %v3447_v8, %v4541_v24  ;;  %v3410_v15 = vadd.f32 %v3409_v11, %v3408_v9  ;;  %v3450_v16 = vadd.f32 %v3449_v12, %v3448_v10 }
 0x10b   :  { %v281_v17 = vmax.f32 %v264_v13, 0.0  ;;  %v397_v18 = vmax.f32 %v380_v14, 0.0  ;;  %v267_v19 = vadd.f32 %v3410_v15, %v4541_v24  ;;  %v383_v20 = vadd.f32 %v3450_v16, %v4541_v24 }
 0x10d   :  { %v4563_v21 = vmax.f32 %v281_v17, %v397_v18  ;;  %v282_v22 = vmax.f32 %v267_v19, 0.0  ;;  %v398_v23 = vmax.f32 %v383_v20, 0.0  ;;  %v3411_v25 = vpop.f32.mrb[12].mxu0  ;;  %v3451_v26 = vpop.f32.mrb[12].mxu1 }
 0x10e   :  { %v3412_v27 = vpop.f32.mrb[13].mxu0  ;;  %v3452_v28 = vpop.f32.mrb[13].mxu1 }
 0x10f   :  { %v4565_v29 = vmax.f32 %v282_v22, %v398_v23  ;;  %v3413_v30 = vadd.f32 %v3412_v27, %v3411_v25  ;;  %v3453_v31 = vadd.f32 %v3452_v28, %v3451_v26  ;;  %v3414_v32 = vpop.f32.mrb[14].mxu0  ;;  %v3454_v33 = vpop.f32.mrb[14].mxu1 }
 0x110   :  { %v3415_v34 = vpop.f32.mrb[15].mxu0  ;;  %v3455_v35 = vpop.f32.mrb[15].mxu1 }
 0x111   :  { %v272_v36 = vadd.f32 %v3413_v30, %v4541_v24  ;;  %v388_v37 = vadd.f32 %v3453_v31, %v4541_v24  ;;  %v3985_v30 = vld [vmem:[%s5231_s3 + $0x100] sm:$0xff]  }
 0x112   :  { %v3986_v31 = vld [vmem:[%s5231_s3 + $0x180] sm:$0xff]  }
 0x113   :  { %v283_v38 = vmax.f32 %v272_v36, 0.0  ;;  %v399_v39 = vmax.f32 %v388_v37, 0.0 }
 0x115   :  { %v4569_v40 = vmax.f32 %v283_v38, %v399_v39  ;;  %v3473_v42 = vpop.f32.mrb[16].mxu0  ;;  %v3513_v43 = vpop.f32.mrb[16].mxu1  ;;  %v3987_v39 = vld [vmem:[%s5231_s3 + $0x148] sm:$0xff]  }
 0x116   :  { %v3474_v44 = vpop.f32.mrb[17].mxu0  ;;  %v3514_v45 = vpop.f32.mrb[17].mxu1 }
 0x117   :  { %v3475_v46 = vadd.f32 %v3474_v44, %v3473_v42  ;;  %v3515_v47 = vadd.f32 %v3514_v45, %v3513_v43  ;;  %v3476_v49 = vpop.f32.mrb[18].mxu0  ;;  %v3516_v50 = vpop.f32.mrb[18].mxu1 }
 0x118   :  { %v3477_v51 = vpop.f32.mrb[19].mxu0  ;;  %v3517_v52 = vpop.f32.mrb[19].mxu1 }
 0x119   :  { %v487_v53 = vadd.f32 %v3475_v46, %v4541_v24  ;;  %v610_v54 = vadd.f32 %v3515_v47, %v4541_v24  ;;  %v3478_v55 = vadd.f32 %v3477_v51, %v3476_v49  ;;  %v3518_v56 = vadd.f32 %v3517_v52, %v3516_v50 }
 0x11b   :  { %v516_v57 = vmax.f32 %v487_v53, 0.0  ;;  %v639_v58 = vmax.f32 %v610_v54, 0.0  ;;  %v490_v59 = vadd.f32 %v3478_v55, %v4541_v24  ;;  %v613_v60 = vadd.f32 %v3518_v56, %v4541_v24  ;;  %v3989_v56 = vld [vmem:[%s5231_s3 + $0x108] sm:$0xff]  }
 0x11d   :  { %v523_v61 = vmax.f32 %v4547_v41, %v516_v57  ;;  %v517_v62 = vmax.f32 %v490_v59, 0.0  ;;  %v3479_v0 = vpop.f32.mrb[20].mxu0  ;;  %v3519_v1 = vpop.f32.mrb[20].mxu1  ;;  %v640_v2 = vmax.f32 %v613_v60, 0.0  ;;  %v3991_v60 = vld [vmem:[%s5231_s3 + $0x150] sm:$0xff]  }
 0x11e   :  { %v3480_v3 = vpop.f32.mrb[21].mxu0  ;;  %v3520_v4 = vpop.f32.mrb[21].mxu1 }
 0x11f   :  { %v646_v5 = vmax.f32 %v523_v61, %v639_v58  ;;  %v524_v7 = vmax.f32 %v4549_v48, %v517_v62  ;;  %v3481_v8 = vadd.f32 %v3480_v3, %v3479_v0  ;;  %v3482_v9 = vpop.f32.mrb[22].mxu0  ;;  %v3521_v10 = vadd.f32 %v3520_v4, %v3519_v1  ;;  %v3522_v11 = vpop.f32.mrb[22].mxu1  ;;  %v3992_v61 = vld [vmem:[%s5231_s3 + $0x1d0] sm:$0xff]  }
 0x120   :  { %v3483_v12 = vpop.f32.mrb[23].mxu0  ;;  %v3523_v13 = vpop.f32.mrb[23].mxu1 }
 0x121   :  { %v4577_v14 = vmax.f32 %v524_v7, %v640_v2  ;;  %v495_v15 = vadd.f32 %v3481_v8, %v4541_v24  ;;  %v3484_v41 = vadd.f32 %v3483_v12, %v3482_v9  ;;  %v618_v16 = vadd.f32 %v3521_v10, %v4541_v24  ;;  %v3994_v7 = vld [vmem:[%s5231_s3 + $0x190] sm:$0xff]   ;;  %v3995_v12 = vld [vmem:[%s5231_s3 + $0x158] sm:$0xff]  }
 0x122   :  { %v3524_v17 = vadd.f32 %v3523_v13, %v3522_v11  ;;  %v654_v18 = vrot.slane %v646_v5, 2  ;;  %v658_v19 = vrot.slane %v646_v5, 6  ;;  %v695_v20 = vpack.c.bf16 %v646_v5, %v646_v5  ;;  %v3996_v13 = vld [vmem:[%s5231_s3 + $0x1d8] sm:$0xff]  }
 0x123   :  { %v518_v22 = vmax.f32 %v495_v15, 0.0  ;;  %v498_v48 = vadd.f32 %v3484_v41, %v4541_v24  ;;  %v641_v23 = vmax.f32 %v618_v16, 0.0  ;;  %v656_v25 = vrot.slane %v646_v5, 4  ;;  %v3993_v5 = vld [vmem:[%s5231_s3 + $0x110] sm:$0xff]  }
 0x124   :  { %v621_v26 = vadd.f32 %v3524_v17, %v4541_v24  ;;  %v696_v27 = vpack.c.bf16 %v654_v18, %v654_v18  ;;  %v698_v28 = vpack.c.bf16 %v658_v19, %v658_v19  ;;  %v661_v32 = vrot.slane %v4577_v14, 2 }
 0x125   :  { %v525_v33 = vmax.f32 %v4555_v63, %v518_v22  ;;  %v519_v34 = vmax.f32 %v498_v48, 0.0  ;;  %v3485_v35 = vpop.f32.mrb[24].mxu0  ;;  %v697_v36 = vpack.c.bf16 %v656_v25, %v656_v25  ;;  %v3525_v37 = vpop.f32.mrb[24].mxu1  ;;  %v665_v38 = vrot.slane %v4577_v14, 6  ;;  %v3988_v63 = vld [vmem:[%s5231_s3 + $0x1c8] sm:$0xff]   ;;  %v3997_v48 = vld [vmem:[%s5231_s3 + $0x118] sm:$0xff]  }
 0x126   :  { %v642_v42 = vmax.f32 %v621_v26, 0.0  ;;  %2359 = vmatprep.mubr.bf16.mxu0 %v696_v27  ;;  %2399 = vmatprep.mubr.bf16.mxu1 %v698_v28  ;;  %v3486_v43 = vpop.f32.mrb[25].mxu0  ;;  %v700_v44 = vpack.c.bf16 %v661_v32, %v661_v32  ;;  %v3526_v45 = vpop.f32.mrb[25].mxu1 }
 0x127   :  { %v526_v46 = vmax.f32 %v4557_v6, %v519_v34  ;;  %v4599_v47 = vmax.f32 %v525_v33, %v641_v23  ;;  %v3487_v49 = vadd.f32 %v3486_v43, %v3485_v35  ;;  %2360 = vmatmul.mubr.bf16.vlgmr.msra.gmra.mrb[32].mxu0 %v695_v20  ;;  %2400 = vmatmul.mubr.bf16.vlgmr.msra.gmra.mrb[32].mxu1 %v697_v36  ;;  %v3488_v50 = vpop.f32.mrb[26].mxu0  ;;  %v3528_v51 = vpop.f32.mrb[26].mxu1  ;;  %v3990_v6 = vld [vmem:[%s5231_s3 + $0x188] sm:$0xff]   ;;  %v3998_v23 = vld [vmem:[%s5231_s3 + $0x198] sm:$0xff]   ;;  %v4001_v34 = vld [vmem:[%s5231_s3 + $0x120] sm:$0xff]  }
 0x128   :  { %3582 = vmatpush3.bf16.msra.mxu0 %v3985_v30  ;;  %3604 = vmatpush3.bf16.msra.mxu1 %v3986_v31  ;;  %v702_v52 = vpack.c.bf16 %v665_v38, %v665_v38  ;;  %v3489_v53 = vpop.f32.mrb[27].mxu0  ;;  %v3527_v54 = vadd.f32 %v3526_v45, %v3525_v37  ;;  %v3529_v55 = vpop.f32.mrb[27].mxu1  ;;  %v3999_v30 = vld [vmem:[%s5231_s3 + $0x160] sm:$0xff]   ;;  %v4003_v36 = vld [vmem:[%s5231_s3 + $0x168] sm:$0xff]   ;;  %v4008_v43 = vld [vmem:[%s5231_s3 + $0x1f0] sm:$0xff]  }
 0x129   :  { %v4607_v57 = vmax.f32 %v526_v46, %v642_v42  ;;  %v503_v58 = vadd.f32 %v3487_v49, %v4541_v24  ;;  %2439 = vmatprep.mubr.bf16.mxu0 %v700_v44  ;;  %v3490_v59 = vadd.f32 %v3489_v53, %v3488_v50  ;;  %3583 = vmatprep.subr.bf16.mxu0 %v3987_v39  ;;  %v4000_v31 = vld [vmem:[%s5231_s3 + $0x1e0] sm:$0xff]   ;;  %v4004_v37 = vld [vmem:[%s5231_s3 + $0x1e8] sm:$0xff]   ;;  %v4007_v42 = vld [vmem:[%s5231_s3 + $0x170] sm:$0xff]  }
 0x12a   :  { %2479 = vmatprep.mubr.bf16.mxu1 %v702_v52  ;;  %v626_v62 = vadd.f32 %v3527_v54, %v4541_v24  ;;  %3605 = vmatprep.subr.bf16.mxu1 %v3988_v63  ;;  %v3530_v0 = vadd.f32 %v3529_v55, %v3528_v51  ;;  %v4005_v39 = vld [vmem:[%s5231_s3 + $0x128] sm:$0xff]   ;;  %v4009_v44 = vld [vmem:[%s5231_s3 + $0x130] sm:$0xff]   ;;  %v4011_v63 = vld [vmem:[%s5231_s3 + $0x178] sm:$0xff]   ;;  %v663_v51 = vrot.slane %v4577_v14, 4  ;;  %v668_v54 = vrot.slane %v4599_v47, 2 }
 0x12b   :  { %v520_v1 = vmax.f32 %v503_v58, 0.0  ;;  %v506_v2 = vadd.f32 %v3490_v59, %v4541_v24  ;;  %v4010_v45 = vld [vmem:[%s5231_s3 + $0x1b0] sm:$0xff]   ;;  %v4012_v46 = vld [vmem:[%s5231_s3 + $0x1f8] sm:$0xff]   ;;  %v4015_v52 = vld [vmem:[%s5231_s3 + $0x240] sm:$0xff]   ;;  %v672_v55 = vrot.slane %v4599_v47, 6 }
 0x12c   :  { %v643_v3 = vmax.f32 %v626_v62, 0.0  ;;  %v629_v4 = vadd.f32 %v3530_v0, %v4541_v24  ;;  %3584 = vmatpush3.bf16.msra.mxu0 %v3989_v56  ;;  %3606 = vmatpush3.bf16.msra.mxu1 %v3990_v6  ;;  %v4013_v49 = vld [vmem:[%s5231_s3 + $0x138] sm:$0xff]   ;;  %v4016_v53 = vld [vmem:[%s5231_s3 + $0x2c0] sm:$0xff]   ;;  %v699_v6 = vpack.c.bf16 %v4577_v14, %v4577_v14  ;;  %v701_v58 = vpack.c.bf16 %v663_v51, %v663_v51  ;;  %v4020_v62 = vld [vmem:[%s5231_s3 + $0x2c8] sm:$0xff]  }
 0x12d   :  { %v527_v8 = vmax.f32 %v4563_v21, %v520_v1  ;;  %v521_v9 = vmax.f32 %v506_v2, 0.0  ;;  %v3491_v10 = vpop.f32.mrb[28].mxu0  ;;  %3585 = vmatprep.subr.bf16.mxu0 %v3991_v60  ;;  %3607 = vmatprep.subr.bf16.mxu1 %v3992_v61  ;;  %v3531_v11 = vpop.f32.mrb[28].mxu1  ;;  %v4014_v50 = vld [vmem:[%s5231_s3 + $0x1b8] sm:$0xff]   ;;  %v4017_v56 = vld [vmem:[%s5231_s3 + $0x200] sm:$0xff]   ;;  %v704_v60 = vpack.c.bf16 %v668_v54, %v668_v54  ;;  %v4019_v61 = vld [vmem:[%s5231_s3 + $0x248] sm:$0xff]   ;;  %v706_v0 = vpack.c.bf16 %v672_v55, %v672_v55 }
 0x12e   :  { %v644_v15 = vmax.f32 %v629_v4, 0.0  ;;  %v3492_v41 = vpop.f32.mrb[29].mxu0  ;;  %v3532_v16 = vpop.f32.mrb[29].mxu1  ;;  %v4018_v59 = vld [vmem:[%s5231_s3 + $0x280] sm:$0xff]   ;;  %v4021_v14 = vld [vmem:[%s5231_s3 + $0x208] sm:$0xff]   ;;  %v4023_v2 = vld [vmem:[%s5231_s3 + $0x250] sm:$0xff]  }
 0x12f   :  { %v528_v17 = vmax.f32 %v4565_v29, %v521_v9  ;;  %v4633_v18 = vmax.f32 %v527_v8, %v643_v3  ;;  %v3493_v21 = vadd.f32 %v3492_v41, %v3491_v10  ;;  %v3533_v19 = vadd.f32 %v3532_v16, %v3531_v11  ;;  %v3494_v20 = vpop.f32.mrb[30].mxu0  ;;  %v3534_v22 = vpop.f32.mrb[30].mxu1  ;;  %v4022_v1 = vld [vmem:[%s5231_s3 + $0x288] sm:$0xff]   ;;  %v4024_v3 = vld [vmem:[%s5231_s3 + $0x2d0] sm:$0xff]   ;;  %v4028_v8 = vld [vmem:[%s5231_s3 + $0x2d8] sm:$0xff]  }
 0x130   :  { %3586 = vmatpush3.bf16.msra.mxu0 %v3993_v5  ;;  %3608 = vmatpush3.bf16.msra.mxu1 %v3994_v7  ;;  %v3495_v25 = vpop.f32.mrb[31].mxu0  ;;  %v3535_v26 = vpop.f32.mrb[31].mxu1  ;;  %v4025_v4 = vld [vmem:[%s5231_s3 + $0x210] sm:$0xff]   ;;  %v4027_v7 = vld [vmem:[%s5231_s3 + $0x258] sm:$0xff]   ;;  %v4031_v11 = vld [vmem:[%s5231_s3 + $0x260] sm:$0xff]  }
 0x131   :  { %v4641_v27 = vmax.f32 %v528_v17, %v644_v15  ;;  %v511_v29 = vadd.f32 %v3493_v21, %v4541_v24  ;;  %v634_v28 = vadd.f32 %v3533_v19, %v4541_v24  ;;  %3587 = vmatprep.subr.bf16.mxu0 %v3995_v12  ;;  %3609 = vmatprep.subr.bf16.mxu1 %v3996_v13  ;;  %v4002_v24 = vld [vmem:[%s5231_s3 + $0x1a0] sm:$0xff]   ;;  %v4026_v5 = vld [vmem:[%s5231_s3 + $0x290] sm:$0xff]   ;;  %v4029_v9 = vld [vmem:[%s5231_s3 + $0x218] sm:$0xff]  }
 0x132   :  { %v4030_v10 = vld [vmem:[%s5231_s3 + $0x298] sm:$0xff]   ;;  %v4032_v12 = vld [vmem:[%s5231_s3 + $0x2e0] sm:$0xff]   ;;  %v4035_v41 = vld [vmem:[%s5231_s3 + $0x268] sm:$0xff]  }
 0x133   :  { %v522_v32 = vmax.f32 %v511_v29, 0.0  ;;  %v645_v33 = vmax.f32 %v634_v28, 0.0  ;;  %v4033_v13 = vld [vmem:[%s5231_s3 + $0x220] sm:$0xff]   ;;  %v4036_v16 = vld [vmem:[%s5231_s3 + $0x2e8] sm:$0xff]   ;;  %v4039_v19 = vld [vmem:[%s5231_s3 + $0x270] sm:$0xff]  }
 0x134   :  { %3588 = vmatpush3.bf16.msra.mxu0 %v3997_v48  ;;  %3610 = vmatpush3.bf16.msra.mxu1 %v3998_v23  ;;  %v4034_v15 = vld [vmem:[%s5231_s3 + $0x2a0] sm:$0xff]   ;;  %v4037_v17 = vld [vmem:[%s5231_s3 + $0x228] sm:$0xff]   ;;  %v4040_v20 = vld [vmem:[%s5231_s3 + $0x2f0] sm:$0xff]  }
 0x135   :  { %v529_v35 = vmax.f32 %v4569_v40, %v522_v32  ;;  %3589 = vmatprep.subr.bf16.mxu0 %v3999_v30  ;;  %3611 = vmatprep.subr.bf16.mxu1 %v4000_v31  ;;  %v4006_v40 = vld [vmem:[%s5231_s3 + $0x1a8] sm:$0xff]   ;;  %v4041_v22 = vld [vmem:[%s5231_s3 + $0x230] sm:$0xff]   ;;  %v4043_v23 = vld [vmem:[%s5231_s3 + $0x278] sm:$0xff]   ;;  %v670_v30 = vrot.slane %v4599_v47, 4  ;;  %v675_v32 = vrot.slane %v4607_v57, 2 }
 0x136   :  { %v4038_v21 = vld [vmem:[%s5231_s3 + $0x2a8] sm:$0xff]   ;;  %v4042_v48 = vld [vmem:[%s5231_s3 + $0x2b0] sm:$0xff]   ;;  %v4044_v25 = vld [vmem:[%s5231_s3 + $0x2f8] sm:$0xff]  }
 0x137   :  { %v4664_v38 = vmax.f32 %v529_v35, %v645_v33  ;;  %v4045_v26 = vld [vmem:[%s5231_s3 + $0x238] sm:$0xff]   ;;  %v4047_v28 = vld [vmem:[%s5231_s3 + $0x340] sm:$0xff]  }
 0x138   :  { %3590 = vmatpush3.bf16.msra.mxu0 %v4001_v34  ;;  %3612 = vmatpush3.bf16.msra.mxu1 %v4002_v24  ;;  %v4046_v29 = vld [vmem:[%s5231_s3 + $0x2b8] sm:$0xff]   ;;  %v4048_v31 = vld [vmem:[%s5231_s3 + $0x3c0] sm:$0xff]   ;;  %v679_v34 = vrot.slane %v4607_v57, 6  ;;  %v703_v24 = vpack.c.bf16 %v4599_v47, %v4599_v47 }
 0x139   :  { %3591 = vmatprep.subr.bf16.mxu0 %v4003_v36  ;;  %3613 = vmatprep.subr.bf16.mxu1 %v4004_v37  ;;  %v4049_v33 = vld [vmem:[%s5231_s3 + $0x300] sm:$0xff]   ;;  %v705_v36 = vpack.c.bf16 %v670_v30, %v670_v30  ;;  %v4051_v37 = vld [vmem:[%s5231_s3 + $0x348] sm:$0xff]   ;;  %v4061_v51 = vld [vmem:[%s5231_s3 + $0x318] sm:$0xff]  }
 0x13a   :  { %v4050_v35 = vld [vmem:[%s5231_s3 + $0x380] sm:$0xff]   ;;  %v710_v47 = vpack.c.bf16 %v679_v34, %v679_v34  ;;  %v4099_v34 = vld [vmem:[%s5231_s3 + $0x468] sm:$0xff]  }
 0x13b   :  { %v4064_v54 = vld [vmem:[%s5231_s3 + $0x3e0] sm:$0xff]  }
 0x13c   :  { %3592 = vmatpush3.bf16.msra.mxu0 %v4005_v39  ;;  %3614 = vmatpush3.bf16.msra.mxu1 %v4006_v40  ;;  %v708_v39 = vpack.c.bf16 %v675_v32, %v675_v32  ;;  %v4052_v40 = vld [vmem:[%s5231_s3 + $0x3c8] sm:$0xff]   ;;  %v4065_v55 = vld [vmem:[%s5231_s3 + $0x320] sm:$0xff]  }
 0x13d   :  { %3593 = vmatprep.subr.bf16.mxu0 %v4007_v42  ;;  %3615 = vmatprep.subr.bf16.mxu1 %v4008_v43  ;;  %v4053_v42 = vld [vmem:[%s5231_s3 + $0x308] sm:$0xff]   ;;  %v4095_v30 = vld [vmem:[%s5231_s3 + $0x460] sm:$0xff]  }
 0x13e   :  { %v4054_v43 = vld [vmem:[%s5231_s3 + $0x388] sm:$0xff]   ;;  %v4097_v32 = vld [vmem:[%s5231_s3 + $0x420] sm:$0xff]  }
 0x140   :  { %3594 = vmatpush3.bf16.msra.mxu0 %v4009_v44  ;;  %3616 = vmatpush3.bf16.msra.mxu1 %v4010_v45  ;;  %v4055_v44 = vld [vmem:[%s5231_s3 + $0x350] sm:$0xff]  }
 0x141   :  { %3595 = vmatprep.subr.bf16.mxu0 %v4011_v63  ;;  %3617 = vmatprep.subr.bf16.mxu1 %v4012_v46  ;;  %v4056_v45 = vld [vmem:[%s5231_s3 + $0x3d0] sm:$0xff]  }
 0x142   :  { %v4057_v63 = vld [vmem:[%s5231_s3 + $0x310] sm:$0xff]  }
 0x143   :  { %v4058_v46 = vld [vmem:[%s5231_s3 + $0x390] sm:$0xff]  }
 0x144   :  { %3596 = vmatpush3.bf16.msra.mxu0 %v4013_v49  ;;  %3618 = vmatpush3.bf16.msra.mxu1 %v4014_v50  ;;  %v4059_v49 = vld [vmem:[%s5231_s3 + $0x358] sm:$0xff]  }
 0x145   :  { %3625 = vmatprep.subr.bf16.mxu0 %v4015_v52  ;;  %3647 = vmatprep.subr.bf16.mxu1 %v4016_v53  ;;  %v4060_v50 = vld [vmem:[%s5231_s3 + $0x3d8] sm:$0xff]   ;;  %v4063_v53 = vld [vmem:[%s5231_s3 + $0x360] sm:$0xff]  }
 0x146   :  { %v4062_v52 = vld [vmem:[%s5231_s3 + $0x398] sm:$0xff]  }
 0x147   :  { %2440 = vmatmul.mubr.bf16.vlgmr.msra.gmra.mrb[36].mxu0 %v699_v6  ;;  %2480 = vmatmul.mubr.bf16.vlgmr.msra.gmra.mrb[36].mxu1 %v701_v58  ;;  %v4067_v6 = vld [vmem:[%s5231_s3 + $0x368] sm:$0xff]  }
 0x148   :  { %3626 = vmatpush3.bf16.msra.mxu0 %v4017_v56  ;;  %2519 = vmatprep.mubr.bf16.mxu0 %v704_v60  ;;  %v4066_v56 = vld [vmem:[%s5231_s3 + $0x3a0] sm:$0xff]   ;;  %v4068_v58 = vld [vmem:[%s5231_s3 + $0x3e8] sm:$0xff]  }
 0x149   :  { %3648 = vmatpush3.bf16.msra.mxu1 %v4018_v59  ;;  %2559 = vmatprep.mubr.bf16.mxu1 %v706_v0  ;;  %v4069_v59 = vld [vmem:[%s5231_s3 + $0x328] sm:$0xff]   ;;  %v4073_v0 = vld [vmem:[%s5231_s3 + $0x330] sm:$0xff]  }
 0x14a   :  { %3627 = vmatprep.subr.bf16.mxu0 %v4019_v61  ;;  %3649 = vmatprep.subr.bf16.mxu1 %v4020_v62  ;;  %v4070_v60 = vld [vmem:[%s5231_s3 + $0x3a8] sm:$0xff]   ;;  %v4071_v61 = vld [vmem:[%s5231_s3 + $0x370] sm:$0xff]  }
 0x14b   :  { %v4072_v62 = vld [vmem:[%s5231_s3 + $0x3f0] sm:$0xff]  }
 0x14c   :  { %3628 = vmatpush3.bf16.msra.mxu0 %v4021_v14  ;;  %v4074_v14 = vld [vmem:[%s5231_s3 + $0x3b0] sm:$0xff]  }
 0x14d   :  { %3650 = vmatpush3.bf16.msra.mxu1 %v4022_v1  ;;  %3629 = vmatprep.subr.bf16.mxu0 %v4023_v2  ;;  %v4075_v1 = vld [vmem:[%s5231_s3 + $0x378] sm:$0xff]  }
 0x14e   :  { %3651 = vmatprep.subr.bf16.mxu1 %v4024_v3  ;;  %v4076_v2 = vld [vmem:[%s5231_s3 + $0x3f8] sm:$0xff]  }
 0x14f   :  { %v4077_v3 = vld [vmem:[%s5231_s3 + $0x338] sm:$0xff]  }
 0x150   :  { %3630 = vmatpush3.bf16.msra.mxu0 %v4025_v4  ;;  %v4078_v4 = vld [vmem:[%s5231_s3 + $0x3b8] sm:$0xff]  }
 0x151   :  { %3652 = vmatpush3.bf16.msra.mxu1 %v4026_v5  ;;  %3631 = vmatprep.subr.bf16.mxu0 %v4027_v7  ;;  %v4079_v5 = vld [vmem:[%s5231_s3 + $0x440] sm:$0xff]   ;;  %v677_v7 = vrot.slane %v4607_v57, 4 }
 0x152   :  { %3653 = vmatprep.subr.bf16.mxu1 %v4028_v8  ;;  %v4080_v8 = vld [vmem:[%s5231_s3 + $0x4c0] sm:$0xff]  }
 0x154   :  { %3632 = vmatpush3.bf16.msra.mxu0 %v4029_v9  ;;  %v682_v9 = vrot.slane %v4633_v18, 2 }
 0x155   :  { %3654 = vmatpush3.bf16.msra.mxu1 %v4030_v10  ;;  %3633 = vmatprep.subr.bf16.mxu0 %v4031_v11  ;;  %v4081_v10 = vld [vmem:[%s5231_s3 + $0x400] sm:$0xff]   ;;  %v686_v11 = vrot.slane %v4633_v18, 6 }
 0x156   :  { %3655 = vmatprep.subr.bf16.mxu1 %v4032_v12  ;;  %v707_v12 = vpack.c.bf16 %v4607_v57, %v4607_v57 }
 0x157   :  { %v714_v57 = vpack.c.bf16 %v686_v11, %v686_v11  ;;  %v4132_v11 = vld [vmem:[%s5231_s3 + $0x5e8] sm:$0xff]  }
 0x158   :  { %3634 = vmatpush3.bf16.msra.mxu0 %v4033_v13  ;;  %v4082_v13 = vld [vmem:[%s5231_s3 + $0x480] sm:$0xff]  }
 0x159   :  { %3656 = vmatpush3.bf16.msra.mxu1 %v4034_v15  ;;  %3635 = vmatprep.subr.bf16.mxu0 %v4035_v41  ;;  %v709_v15 = vpack.c.bf16 %v677_v7, %v677_v7  ;;  %v4083_v41 = vld [vmem:[%s5231_s3 + $0x448] sm:$0xff]   ;;  %v4128_v7 = vld [vmem:[%s5231_s3 + $0x5e0] sm:$0xff]  }
 0x15a   :  { %3657 = vmatprep.subr.bf16.mxu1 %v4036_v16  ;;  %v712_v16 = vpack.c.bf16 %v682_v9, %v682_v9  ;;  %v4130_v9 = vld [vmem:[%s5231_s3 + $0x5a0] sm:$0xff]  }
 0x15c   :  { %3636 = vmatpush3.bf16.msra.mxu0 %v4037_v17  ;;  %v4084_v17 = vld [vmem:[%s5231_s3 + $0x4c8] sm:$0xff]  }
 0x15d   :  { %3658 = vmatpush3.bf16.msra.mxu1 %v4038_v21  ;;  %3637 = vmatprep.subr.bf16.mxu0 %v4039_v19  ;;  %v4085_v21 = vld [vmem:[%s5231_s3 + $0x408] sm:$0xff]  }
 0x15e   :  { %3659 = vmatprep.subr.bf16.mxu1 %v4040_v20  ;;  %v4086_v19 = vld [vmem:[%s5231_s3 + $0x488] sm:$0xff]   ;;  %v4087_v20 = vld [vmem:[%s5231_s3 + $0x450] sm:$0xff]  }
 0x160   :  { %3638 = vmatpush3.bf16.msra.mxu0 %v4041_v22  ;;  %v4088_v22 = vld [vmem:[%s5231_s3 + $0x4d0] sm:$0xff]  }
 0x161   :  { %3660 = vmatpush3.bf16.msra.mxu1 %v4042_v48  ;;  %3639 = vmatprep.subr.bf16.mxu0 %v4043_v23  ;;  %v4089_v48 = vld [vmem:[%s5231_s3 + $0x410] sm:$0xff]  }
 0x162   :  { %3661 = vmatprep.subr.bf16.mxu1 %v4044_v25  ;;  %v4090_v23 = vld [vmem:[%s5231_s3 + $0x490] sm:$0xff]   ;;  %v4091_v25 = vld [vmem:[%s5231_s3 + $0x458] sm:$0xff]  }
 0x164   :  { %3640 = vmatpush3.bf16.msra.mxu0 %v4045_v26  ;;  %v4092_v26 = vld [vmem:[%s5231_s3 + $0x4d8] sm:$0xff]  }
 0x165   :  { %3662 = vmatpush3.bf16.msra.mxu1 %v4046_v29  ;;  %3669 = vmatprep.subr.bf16.mxu0 %v4047_v28  ;;  %v4093_v29 = vld [vmem:[%s5231_s3 + $0x418] sm:$0xff]  }
 0x166   :  { %3691 = vmatprep.subr.bf16.mxu1 %v4048_v31  ;;  %v4094_v28 = vld [vmem:[%s5231_s3 + $0x498] sm:$0xff]   ;;  %v4096_v31 = vld [vmem:[%s5231_s3 + $0x4e0] sm:$0xff]  }
 0x167   :  { %2520 = vmatmul.mubr.bf16.vlgmr.msra.gmra.mrb[40].mxu0 %v703_v24  ;;  %v4100_v24 = vld [vmem:[%s5231_s3 + $0x4e8] sm:$0xff]  }
 0x168   :  { %2560 = vmatmul.mubr.bf16.vlgmr.msra.gmra.mrb[40].mxu1 %v705_v36  ;;  %3670 = vmatpush3.bf16.msra.mxu0 %v4049_v33  ;;  %v4098_v33 = vld [vmem:[%s5231_s3 + $0x4a0] sm:$0xff]   ;;  %v4102_v36 = vld [vmem:[%s5231_s3 + $0x4a8] sm:$0xff]  }
 0x169   :  { %2599 = vmatprep.mubr.bf16.mxu0 %v708_v39  ;;  %3692 = vmatpush3.bf16.msra.mxu1 %v4050_v35  ;;  %v4101_v35 = vld [vmem:[%s5231_s3 + $0x428] sm:$0xff]   ;;  %v4104_v39 = vld [vmem:[%s5231_s3 + $0x4f0] sm:$0xff]  }
 0x16a   :  { %2639 = vmatprep.mubr.bf16.mxu1 %v710_v47  ;;  %3671 = vmatprep.subr.bf16.mxu0 %v4051_v37  ;;  %v4103_v37 = vld [vmem:[%s5231_s3 + $0x470] sm:$0xff]  }
 0x16b   :  { %3693 = vmatprep.subr.bf16.mxu1 %v4052_v40  ;;  %v4105_v40 = vld [vmem:[%s5231_s3 + $0x430] sm:$0xff]  }
 0x16c   :  { %3672 = vmatpush3.bf16.msra.mxu0 %v4053_v42  ;;  %v4106_v47 = vld [vmem:[%s5231_s3 + $0x4b0] sm:$0xff]   ;;  %v4107_v42 = vld [vmem:[%s5231_s3 + $0x478] sm:$0xff]  }
 0x16d   :  { %3694 = vmatpush3.bf16.msra.mxu1 %v4054_v43  ;;  %3673 = vmatprep.subr.bf16.mxu0 %v4055_v44  ;;  %v4108_v43 = vld [vmem:[%s5231_s3 + $0x4f8] sm:$0xff]  }
 0x16e   :  { %3695 = vmatprep.subr.bf16.mxu1 %v4056_v45  ;;  %v4109_v44 = vld [vmem:[%s5231_s3 + $0x438] sm:$0xff]  }
 0x16f   :  { %v4110_v45 = vld [vmem:[%s5231_s3 + $0x4b8] sm:$0xff]  }
 0x170   :  { %3674 = vmatpush3.bf16.msra.mxu0 %v4057_v63  ;;  %v4111_v63 = vld [vmem:[%s5231_s3 + $0x540] sm:$0xff]  }
 0x171   :  { %3696 = vmatpush3.bf16.msra.mxu1 %v4058_v46  ;;  %3675 = vmatprep.subr.bf16.mxu0 %v4059_v49  ;;  %v684_v46 = vrot.slane %v4633_v18, 4  ;;  %v4112_v49 = vld [vmem:[%s5231_s3 + $0x5c0] sm:$0xff]  }
 0x172   :  { %3697 = vmatprep.subr.bf16.mxu1 %v4060_v50  ;;  %v689_v50 = vrot.slane %v4641_v27, 2 }
 0x174   :  { %3676 = vmatpush3.bf16.msra.mxu0 %v4061_v51  ;;  %v4113_v51 = vld [vmem:[%s5231_s3 + $0x500] sm:$0xff]  }
 0x175   :  { %3698 = vmatpush3.bf16.msra.mxu1 %v4062_v52  ;;  %3677 = vmatprep.subr.bf16.mxu0 %v4063_v53  ;;  %v693_v52 = vrot.slane %v4641_v27, 6  ;;  %v711_v53 = vpack.c.bf16 %v4633_v18, %v4633_v18 }
 0x176   :  { %3699 = vmatprep.subr.bf16.mxu1 %v4064_v54  ;;  %v4114_v54 = vld [vmem:[%s5231_s3 + $0x580] sm:$0xff]  }
 0x177   :  { %v718_v18 = vpack.c.bf16 %v693_v52, %v693_v52 }
 0x178   :  { %3678 = vmatpush3.bf16.msra.mxu0 %v4065_v55  ;;  %v713_v55 = vpack.c.bf16 %v684_v46, %v684_v46 }
 0x179   :  { %3700 = vmatpush3.bf16.msra.mxu1 %v4066_v56  ;;  %3679 = vmatprep.subr.bf16.mxu0 %v4067_v6  ;;  %v4115_v56 = vld [vmem:[%s5231_s3 + $0x548] sm:$0xff]   ;;  %v716_v6 = vpack.c.bf16 %v689_v50, %v689_v50 }
 0x17a   :  { %3701 = vmatprep.subr.bf16.mxu1 %v4068_v58  ;;  %v4116_v58 = vld [vmem:[%s5231_s3 + $0x5c8] sm:$0xff]  }
 0x17c   :  { %3680 = vmatpush3.bf16.msra.mxu0 %v4069_v59  ;;  %v4117_v59 = vld [vmem:[%s5231_s3 + $0x508] sm:$0xff]  }
 0x17d   :  { %3702 = vmatpush3.bf16.msra.mxu1 %v4070_v60  ;;  %3681 = vmatprep.subr.bf16.mxu0 %v4071_v61  ;;  %v4118_v60 = vld [vmem:[%s5231_s3 + $0x588] sm:$0xff]   ;;  %v4119_v61 = vld [vmem:[%s5231_s3 + $0x550] sm:$0xff]  }
 0x17e   :  { %3703 = vmatprep.subr.bf16.mxu1 %v4072_v62  ;;  %v4120_v62 = vld [vmem:[%s5231_s3 + $0x5d0] sm:$0xff]  }
 0x180   :  { %3682 = vmatpush3.bf16.msra.mxu0 %v4073_v0  ;;  %v4121_v0 = vld [vmem:[%s5231_s3 + $0x510] sm:$0xff]  }
 0x181   :  { %3704 = vmatpush3.bf16.msra.mxu1 %v4074_v14  ;;  %3683 = vmatprep.subr.bf16.mxu0 %v4075_v1  ;;  %v4122_v14 = vld [vmem:[%s5231_s3 + $0x590] sm:$0xff]   ;;  %v4123_v1 = vld [vmem:[%s5231_s3 + $0x558] sm:$0xff]  }
 0x182   :  { %3705 = vmatprep.subr.bf16.mxu1 %v4076_v2  ;;  %v4124_v2 = vld [vmem:[%s5231_s3 + $0x5d8] sm:$0xff]  }
 0x184   :  { %3684 = vmatpush3.bf16.msra.mxu0 %v4077_v3  ;;  %v4125_v3 = vld [vmem:[%s5231_s3 + $0x518] sm:$0xff]  }
 0x185   :  { %3706 = vmatpush3.bf16.msra.mxu1 %v4078_v4  ;;  %3713 = vmatprep.subr.bf16.mxu0 %v4079_v5  ;;  %v4126_v4 = vld [vmem:[%s5231_s3 + $0x598] sm:$0xff]   ;;  %v4127_v5 = vld [vmem:[%s5231_s3 + $0x560] sm:$0xff]  }
 0x186   :  { %3735 = vmatprep.subr.bf16.mxu1 %v4080_v8  ;;  %v4129_v8 = vld [vmem:[%s5231_s3 + $0x520] sm:$0xff]  }
 0x187   :  { %2600 = vmatmul.mubr.bf16.vlgmr.msra.gmra.mrb[44].mxu0 %v707_v12  ;;  %v4133_v12 = vld [vmem:[%s5231_s3 + $0x528] sm:$0xff]  }
 0x188   :  { %2640 = vmatmul.mubr.bf16.vlgmr.msra.gmra.mrb[44].mxu1 %v709_v15  ;;  %3714 = vmatpush3.bf16.msra.mxu0 %v4081_v10  ;;  %v4131_v10 = vld [vmem:[%s5231_s3 + $0x568] sm:$0xff]   ;;  %v4135_v15 = vld [vmem:[%s5231_s3 + $0x570] sm:$0xff]  }
 0x189   :  { %2679 = vmatprep.mubr.bf16.mxu0 %v712_v16  ;;  %3736 = vmatpush3.bf16.msra.mxu1 %v4082_v13  ;;  %v4134_v13 = vld [vmem:[%s5231_s3 + $0x5a8] sm:$0xff]   ;;  %v4137_v16 = vld [vmem:[%s5231_s3 + $0x530] sm:$0xff]  }
 0x18a   :  { %2719 = vmatprep.mubr.bf16.mxu1 %v714_v57  ;;  %3715 = vmatprep.subr.bf16.mxu0 %v4083_v41  ;;  %v4136_v41 = vld [vmem:[%s5231_s3 + $0x5f0] sm:$0xff]   ;;  %v4139_v57 = vld [vmem:[%s5231_s3 + $0x578] sm:$0xff]  }
 0x18b   :  { %3737 = vmatprep.subr.bf16.mxu1 %v4084_v17  ;;  %v4138_v17 = vld [vmem:[%s5231_s3 + $0x5b0] sm:$0xff]  }
 0x18c   :  { %3716 = vmatpush3.bf16.msra.mxu0 %v4085_v21  ;;  %v4140_v21 = vld [vmem:[%s5231_s3 + $0x5f8] sm:$0xff]  }
 0x18d   :  { %3738 = vmatpush3.bf16.msra.mxu1 %v4086_v19  ;;  %3717 = vmatprep.subr.bf16.mxu0 %v4087_v20  ;;  %v4141_v19 = vld [vmem:[%s5231_s3 + $0x538] sm:$0xff]  }
 0x18e   :  { %3739 = vmatprep.subr.bf16.mxu1 %v4088_v22  ;;  %v4142_v20 = vld [vmem:[%s5231_s3 + $0x5b8] sm:$0xff]   ;;  %v691_v22 = vrot.slane %v4641_v27, 4 }
 0x190   :  { %3718 = vmatpush3.bf16.msra.mxu0 %v4089_v48  ;;  %v4143_v48 = vld [vmem:[%s5231_s3 + $0x600] sm:$0xff]  }
 0x191   :  { %3740 = vmatpush3.bf16.msra.mxu1 %v4090_v23  ;;  %3719 = vmatprep.subr.bf16.mxu0 %v4091_v25  ;;  %v715_v23 = vpack.c.bf16 %v4641_v27, %v4641_v27  ;;  %v4191_v25 = vmov 0.0   ;;  %v4145_v27 = vld [vmem:[%s5231_s3 + $0x610] sm:$0xff]  }
 0x192   :  { %3741 = vmatprep.subr.bf16.mxu1 %v4092_v26  ;;  %v717_v26 = vpack.c.bf16 %v691_v22, %v691_v22 }
 0x194   :  { %3720 = vmatpush3.bf16.msra.mxu0 %v4093_v29  ;;  %v4144_v29 = vld [vmem:[%s5231_s3 + $0x608] sm:$0xff]  }
 0x195   :  { %3742 = vmatpush3.bf16.msra.mxu1 %v4094_v28  ;;  %3721 = vmatprep.subr.bf16.mxu0 %v4095_v30  ;;  %v4146_v28 = vld [vmem:[%s5231_s3 + $0x618] sm:$0xff]   ;;  %v4147_v30 = vld [vmem:[%s5231_s3 + $0x620] sm:$0xff]  }
 0x196   :  { %3743 = vmatprep.subr.bf16.mxu1 %v4096_v31  ;;  %v4148_v31 = vld [vmem:[%s5231_s3 + $0x628] sm:$0xff]  }
 0x198   :  { %3722 = vmatpush3.bf16.msra.mxu0 %v4097_v32  ;;  %v4149_v32 = vld [vmem:[%s5231_s3 + $0x630] sm:$0xff]  }
 0x199   :  { %3744 = vmatpush3.bf16.msra.mxu1 %v4098_v33  ;;  %3723 = vmatprep.subr.bf16.mxu0 %v4099_v34  ;;  %v4150_v33 = vld [vmem:[%s5231_s3 + $0x638] sm:$0xff]   ;;  %v719_v34 = vpack.c.bf16 %v4664_v38, %v4664_v38 }
 0x19a   :  { %3745 = vmatprep.subr.bf16.mxu1 %v4100_v24 }
 0x19c   :  { %3724 = vmatpush3.bf16.msra.mxu0 %v4101_v35 }
 0x19d   :  { %3746 = vmatpush3.bf16.msra.mxu1 %v4102_v36  ;;  %3725 = vmatprep.subr.bf16.mxu0 %v4103_v37  ;;  %v3158_v36 = vld [vmem:[%s5232_s4] ss:$0 sm:$0xff] }
 0x19e   :  { %3747 = vmatprep.subr.bf16.mxu1 %v4104_v39 }
 0x1a0   :  { %3726 = vmatpush3.bf16.msra.mxu0 %v4105_v40 }
 0x1a1   :  { %3748 = vmatpush3.bf16.msra.mxu1 %v4106_v47  ;;  %3727 = vmatprep.subr.bf16.mxu0 %v4107_v42 }
 0x1a2   :  { %3749 = vmatprep.subr.bf16.mxu1 %v4108_v43 }
 0x1a4   :  { %3728 = vmatpush3.bf16.msra.mxu0 %v4109_v44 }
 0x1a5   :  { %3750 = vmatpush3.bf16.msra.mxu1 %v4110_v45  ;;  %3757 = vmatprep.subr.bf16.mxu0 %v4111_v63 }
 0x1a6   :  { %3779 = vmatprep.subr.bf16.mxu1 %v4112_v49 }
 0x1a7   :  { %2680 = vmatmul.mubr.bf16.vlgmr.msra.gmra.mrb[48].mxu0 %v711_v53 }
 0x1a8   :  { %2720 = vmatmul.mubr.bf16.vlgmr.msra.gmra.mrb[48].mxu1 %v713_v55  ;;  %3758 = vmatpush3.bf16.msra.mxu0 %v4113_v51 }
 0x1a9   :  { %2759 = vmatprep.mubr.bf16.mxu0 %v716_v6  ;;  %3780 = vmatpush3.bf16.msra.mxu1 %v4114_v54 }
 0x1aa   :  { %2799 = vmatprep.mubr.bf16.mxu1 %v718_v18  ;;  %3759 = vmatprep.subr.bf16.mxu0 %v4115_v56  ;;  %v4151_v18 = vld [vmem:[%s5233_s5] sm:$0xff]  }
 0x1ab   :  { %3781 = vmatprep.subr.bf16.mxu1 %v4116_v58 }
 0x1ac   :  { %3760 = vmatpush3.bf16.msra.mxu0 %v4117_v59 }
 0x1ad   :  { %3782 = vmatpush3.bf16.msra.mxu1 %v4118_v60  ;;  %3761 = vmatprep.subr.bf16.mxu0 %v4119_v61  ;;  %v4152_v60 = vld [vmem:[%s5233_s5 + $0x8] sm:$0xff]   ;;  %v4153_v61 = vld [vmem:[%s5233_s5 + $0x10] sm:$0xff]  }
 0x1ae   :  { %3783 = vmatprep.subr.bf16.mxu1 %v4120_v62  ;;  %v4154_v62 = vld [vmem:[%s5233_s5 + $0x18] sm:$0xff]  }
 0x1b0   :  { %3762 = vmatpush3.bf16.msra.mxu0 %v4121_v0  ;;  %v4155_v0 = vld [vmem:[%s5233_s5 + $0x20] sm:$0xff]  }
 0x1b1   :  { %3784 = vmatpush3.bf16.msra.mxu1 %v4122_v14  ;;  %3763 = vmatprep.subr.bf16.mxu0 %v4123_v1  ;;  %v4156_v14 = vld [vmem:[%s5233_s5 + $0x28] sm:$0xff]  }
 0x1b2   :  { %3785 = vmatprep.subr.bf16.mxu1 %v4124_v2  ;;  %v4157_v2 = vld [vmem:[%s5233_s5 + $0x30] sm:$0xff]  }
 0x1b4   :  { %3764 = vmatpush3.bf16.msra.mxu0 %v4125_v3 }
 0x1b5   :  { %3786 = vmatpush3.bf16.msra.mxu1 %v4126_v4  ;;  %3765 = vmatprep.subr.bf16.mxu0 %v4127_v5 }
 0x1b6   :  { %3787 = vmatprep.subr.bf16.mxu1 %v4128_v7 }
 0x1b8   :  { %3766 = vmatpush3.bf16.msra.mxu0 %v4129_v8 }
 0x1b9   :  { %3788 = vmatpush3.bf16.msra.mxu1 %v4130_v9  ;;  %3767 = vmatprep.subr.bf16.mxu0 %v4131_v10 }
 0x1ba   :  { %3789 = vmatprep.subr.bf16.mxu1 %v4132_v11 }
 0x1bc   :  { %3768 = vmatpush3.bf16.msra.mxu0 %v4133_v12 }
 0x1bd   :  { %3790 = vmatpush3.bf16.msra.mxu1 %v4134_v13  ;;  %3769 = vmatprep.subr.bf16.mxu0 %v4135_v15  ;;  %v4158_v15 = vld [vmem:[%s5233_s5 + $0x38] sm:$0xff]  }
 0x1be   :  { %3791 = vmatprep.subr.bf16.mxu1 %v4136_v41 }
 0x1c0   :  { %3770 = vmatpush3.bf16.msra.mxu0 %v4137_v16  ;;  %v4159_v16 = vld [vmem:[%s5235_s7] sm:$0xff]  }
 0x1c1   :  { %3792 = vmatpush3.bf16.msra.mxu1 %v4138_v17  ;;  %3771 = vmatprep.subr.bf16.mxu0 %v4139_v57  ;;  %v4160_v17 = vld [vmem:[%s5235_s7 + $0x8] sm:$0xff]   ;;  %v4161_v57 = vld [vmem:[%s5235_s7 + $0x10] sm:$0xff]  }
 0x1c2   :  { %3793 = vmatprep.subr.bf16.mxu1 %v4140_v21  ;;  %v4162_v21 = vld [vmem:[%s5235_s7 + $0x18] sm:$0xff]  }
 0x1c4   :  { %3772 = vmatpush3.bf16.msra.mxu0 %v4141_v19  ;;  %v4163_v19 = vld [vmem:[%s5235_s7 + $0x20] sm:$0xff]  }
 0x1c5   :  { %3794 = vmatpush3.bf16.msra.mxu1 %v4142_v20  ;;  %3828 = vmatprep.subr.bf16.mxu0 %v4191_v25  ;;  %v4164_v20 = vld [vmem:[%s5235_s7 + $0x28] sm:$0xff]  }
 0x1c6   :  { %3848 = vmatprep.subr.bf16.mxu1 %v4191_v25 }
 0x1c7   :  { %2760 = vmatmul.mubr.bf16.vlgmr.msra.gmra.mrb[52].mxu0 %v715_v23 }
 0x1c8   :  { %2800 = vmatmul.mubr.bf16.vlgmr.msra.gmra.mrb[52].mxu1 %v717_v26  ;;  %3829 = vmatpush3.bf16.msra.mxu0 %v4143_v48 }
 0x1c9   :  { %3830 = vmatprep.subr.bf16.mxu0 %v4191_v25  ;;  %3844 = vmatprep.mubr.msk.bf16.mxu0 %vm4192_vm0, %v4191_v25 }
 0x1ca   :  { %3864 = vmatprep.mubr.msk.bf16.mxu1 %vm4192_vm0, %v4191_v25  ;;  %3849 = vmatpush3.bf16.msra.mxu1 %v4151_v18 }
 0x1cb   :  { %3850 = vmatprep.subr.bf16.mxu1 %v4191_v25 }
 0x1cc   :  { %3831 = vmatpush3.bf16.msra.mxu0 %v4144_v29 }
 0x1cd   :  { %3832 = vmatprep.subr.bf16.mxu0 %v4191_v25 }
 0x1ce   :  { %3851 = vmatpush3.bf16.msra.mxu1 %v4152_v60 }
 0x1cf   :  { %3852 = vmatprep.subr.bf16.mxu1 %v4191_v25 }
 0x1d0   :  { %3833 = vmatpush3.bf16.msra.mxu0 %v4145_v27 }
 0x1d1   :  { %3834 = vmatprep.subr.bf16.mxu0 %v4191_v25 }
 0x1d2   :  { %3853 = vmatpush3.bf16.msra.mxu1 %v4153_v61 }
 0x1d3   :  { %3854 = vmatprep.subr.bf16.mxu1 %v4191_v25 }
 0x1d4   :  { %3835 = vmatpush3.bf16.msra.mxu0 %v4146_v28 }
 0x1d5   :  { %3836 = vmatprep.subr.bf16.mxu0 %v4191_v25 }
 0x1d6   :  { %3855 = vmatpush3.bf16.msra.mxu1 %v4154_v62 }
 0x1d7   :  { %3856 = vmatprep.subr.bf16.mxu1 %v4191_v25 }
 0x1d8   :  { %3837 = vmatpush3.bf16.msra.mxu0 %v4147_v30 }
 0x1d9   :  { %3838 = vmatprep.subr.bf16.mxu0 %v4191_v25 }
 0x1da   :  { %3857 = vmatpush3.bf16.msra.mxu1 %v4155_v0 }
 0x1db   :  { %3858 = vmatprep.subr.bf16.mxu1 %v4191_v25 }
 0x1dc   :  { %3839 = vmatpush3.bf16.msra.mxu0 %v4148_v31 }
 0x1dd   :  { %3840 = vmatprep.subr.bf16.mxu0 %v4191_v25 }
 0x1de   :  { %3859 = vmatpush3.bf16.msra.mxu1 %v4156_v14 }
 0x1df   :  { %3860 = vmatprep.subr.bf16.mxu1 %v4191_v25 }
 0x1e0   :  { %3841 = vmatpush3.bf16.msra.mxu0 %v4149_v32 }
 0x1e1   :  { %3842 = vmatprep.subr.bf16.mxu0 %v4191_v25 }
 0x1e2   :  { %3861 = vmatpush3.bf16.msra.mxu1 %v4157_v2  ;;  %v4166_v2 = vld [vmem:[%s5235_s7 + $0x38] sm:$0xff]  }
 0x1e3   :  { %3862 = vmatprep.subr.bf16.mxu1 %v4191_v25 }
 0x1e4   :  { %3843 = vmatpush3.bf16.msra.mxu0 %v4150_v33 }
 0x1e5   :  { %3868 = vmatprep.subr.bf16.mxu0 %v4191_v25 }
 0x1e6   :  { %3863 = vmatpush3.bf16.msra.mxu1 %v4158_v15 }
 0x1e7   :  { %3845 = vmatmul.mubr.bf16.vlgmr.msra.gmra.mrb[56].mxu0 %v719_v34 }
 0x1e8   :  { %3884 = vmatprep.mubr.msk.bf16.mxu0 %vm4192_vm0, %v4191_v25  ;;  %3869 = vmatpush3.bf16.msra.mxu0 %v4159_v16 }
 0x1e9   :  { %3870 = vmatprep.subr.bf16.mxu0 %v4191_v25 }
 0x1ec   :  { %3871 = vmatpush3.bf16.msra.mxu0 %v4160_v17 }
 0x1ed   :  { %3872 = vmatprep.subr.bf16.mxu0 %v4191_v25 }
 0x1f0   :  { %3873 = vmatpush3.bf16.msra.mxu0 %v4161_v57 }
 0x1f1   :  { %3874 = vmatprep.subr.bf16.mxu0 %v4191_v25 }
 0x1f4   :  { %3875 = vmatpush3.bf16.msra.mxu0 %v4162_v21 }
 0x1f5   :  { %3876 = vmatprep.subr.bf16.mxu0 %v4191_v25 }
 0x1f8   :  { %3877 = vmatpush3.bf16.msra.mxu0 %v4163_v19 }
 0x1f9   :  { %3878 = vmatprep.subr.bf16.mxu0 %v4191_v25 }
 0x1fa   :  { %v3553_v24 = vpop.f32.mrb[32].mxu0  ;;  %v3575_v35 = vpop.f32.mrb[32].mxu1 }
 0x1fb   :  { %v3554_v37 = vpop.f32.mrb[33].mxu0  ;;  %v3576_v39 = vpop.f32.mrb[33].mxu1 }
 0x1fc   :  { %v3555_v40 = vadd.f32 %v3554_v37, %v3553_v24  ;;  %v3577_v47 = vadd.f32 %v3576_v39, %v3575_v35  ;;  %v3556_v42 = vpop.f32.mrb[34].mxu0  ;;  %v3578_v43 = vpop.f32.mrb[34].mxu1  ;;  %3879 = vmatpush3.bf16.msra.mxu0 %v4164_v20 }
 0x1fd   :  { %v3557_v44 = vpop.f32.mrb[35].mxu0  ;;  %v3579_v38 = vpop.f32.mrb[35].mxu1  ;;  %3880 = vmatprep.subr.bf16.mxu0 %v4191_v25 }
 0x1fe   :  { %v2362_v45 = vadd.f32 %v3555_v40, %v3158_v36 }
 0x200   :  { %v2402_v63 = vadd.f32 %v3577_v47, %v2362_v45 }
 0x21a   :  { %v3597_v46 = vpop.f32.mrb[36].mxu0  ;;  %v3619_v49 = vpop.f32.mrb[36].mxu1 }
 0x21b   :  { %v3598_v50 = vpop.f32.mrb[37].mxu0  ;;  %v3620_v51 = vpop.f32.mrb[37].mxu1 }
 0x21c   :  { %v3599_v52 = vadd.f32 %v3598_v50, %v3597_v46  ;;  %v3621_v53 = vadd.f32 %v3620_v51, %v3619_v49  ;;  %v3600_v54 = vpop.f32.mrb[38].mxu0  ;;  %v3622_v55 = vpop.f32.mrb[38].mxu1 }
 0x21d   :  { %v3601_v56 = vpop.f32.mrb[39].mxu0  ;;  %v3623_v6 = vpop.f32.mrb[39].mxu1 }
 0x21e   :  { %v2442_v58 = vadd.f32 %v3599_v52, %v2402_v63 }
 0x220   :  { %v2482_v59 = vadd.f32 %v3621_v53, %v2442_v58 }
 0x23a   :  { %v3641_v1 = vpop.f32.mrb[40].mxu0 }
 0x23b   :  { %v3663_v3 = vpop.f32.mrb[40].mxu1  ;;  %v3642_v4 = vpop.f32.mrb[41].mxu0 }
 0x23c   :  { %v3643_v5 = vadd.f32 %v3642_v4, %v3641_v1  ;;  %v3664_v7 = vpop.f32.mrb[41].mxu1  ;;  %v3644_v8 = vpop.f32.mrb[42].mxu0  ;;  %v4165_v1 = vld [vmem:[%s5235_s7 + $0x30] sm:$0xff]  }
 0x23d   :  { %v3665_v9 = vadd.f32 %v3664_v7, %v3663_v3  ;;  %v3666_v10 = vpop.f32.mrb[42].mxu1  ;;  %v3645_v11 = vpop.f32.mrb[43].mxu0  ;;  %3881 = vmatpush3.bf16.msra.mxu0 %v4165_v1  ;;  %v3359_v3 = vld [vmem:[%s5234_s6] ss:$0 sm:$0xff]  ;;  %s4167_s6 = scalar_lea.vmem %s3081_s15, 32 }
 0x23e   :  { %v2522_v12 = vadd.f32 %v3643_v5, %v2482_v59  ;;  %v3667_v13 = vpop.f32.mrb[43].mxu1  ;;  %3882 = vmatprep.subr.bf16.mxu0 %v4191_v25  ;;  %v3368_v25 = vld [vmem:[%s5236_s8] ss:$0 sm:$0xff]  ;;  %p4168_p0 = scmp.ne.s32.totalorder %s3081_s15, %s4167_s6  ;;  %p4173_p2 = scmp.lt.s32.totalorder %s4167_s6, %s4167_s6 }
 0x240   :  { %v2562_v41 = vadd.f32 %v3665_v9, %v2522_v12  ;;  %p4174_p3 = por %p4173_p2, %p4172_p1 }
 0x241   :  { %3883 = vmatpush3.bf16.msra.mxu0 %v4166_v2 }
 0x242   :  { %p4175_p4 = pnand %p4174_p3, %p4168_p0 }
 0x25a   :  { %v3685_v22 = vpop.f32.mrb[44].mxu0 }
 0x25b   :  { %v3707_v48 = vpop.f32.mrb[44].mxu1  ;;  %v3686_v23 = vpop.f32.mrb[45].mxu0 }
 0x25c   :  { %v3687_v26 = vadd.f32 %v3686_v23, %v3685_v22  ;;  %v3708_v29 = vpop.f32.mrb[45].mxu1  ;;  %v3688_v27 = vpop.f32.mrb[46].mxu0 }
 0x25d   :  { %v3709_v28 = vadd.f32 %v3708_v29, %v3707_v48  ;;  %v3710_v30 = vpop.f32.mrb[46].mxu1  ;;  %v3689_v31 = vpop.f32.mrb[47].mxu0 }
 0x25e   :  { %v2602_v32 = vadd.f32 %v3687_v26, %v2562_v41  ;;  %v3711_v33 = vpop.f32.mrb[47].mxu1 }
 0x260   :  { %v2642_v34 = vadd.f32 %v3709_v28, %v2602_v32 }
 0x27a   :  { %v3729_v24 = vpop.f32.mrb[48].mxu0 }
 0x27b   :  { %v3751_v35 = vpop.f32.mrb[48].mxu1  ;;  %v3730_v36 = vpop.f32.mrb[49].mxu0 }
 0x27c   :  { %v3731_v37 = vadd.f32 %v3730_v36, %v3729_v24  ;;  %v3752_v39 = vpop.f32.mrb[49].mxu1  ;;  %v3732_v40 = vpop.f32.mrb[50].mxu0 }
 0x27d   :  { %v3753_v47 = vadd.f32 %v3752_v39, %v3751_v35  ;;  %v3754_v42 = vpop.f32.mrb[50].mxu1  ;;  %v3733_v43 = vpop.f32.mrb[51].mxu0 }
 0x27e   :  { %v2682_v44 = vadd.f32 %v3731_v37, %v2642_v34  ;;  %v3755_v38 = vpop.f32.mrb[51].mxu1 }
 0x280   :  { %v2722_v45 = vadd.f32 %v3753_v47, %v2682_v44 }
 0x29a   :  { %v3773_v63 = vpop.f32.mrb[52].mxu0 }
 0x29b   :  { %v3795_v46 = vpop.f32.mrb[52].mxu1  ;;  %v3774_v49 = vpop.f32.mrb[53].mxu0 }
 0x29c   :  { %v3775_v50 = vadd.f32 %v3774_v49, %v3773_v63  ;;  %v3796_v51 = vpop.f32.mrb[53].mxu1  ;;  %v3776_v52 = vpop.f32.mrb[54].mxu0 }
 0x29d   :  { %v3797_v53 = vadd.f32 %v3796_v51, %v3795_v46  ;;  %v3798_v54 = vpop.f32.mrb[54].mxu1  ;;  %v3777_v55 = vpop.f32.mrb[55].mxu0 }
 0x29e   :  { %v2762_v56 = vadd.f32 %v3775_v50, %v2722_v45  ;;  %v3799_v6 = vpop.f32.mrb[55].mxu1 }
 0x2a0   :  { %v2802_v58 = vadd.f32 %v3797_v53, %v2762_v56 }
 0x2ba   :  { %v2841_v18 = vpop.f32.mrb[56].mxu0 }
 0x2bb   :  { %v2842_v59 = vadd.f32 %v2841_v18, %v2802_v58  ;;  %v3846_v60 = vpop.f32.mrb[57].mxu0 }
 0x2bc   :  { %v2844_v61 = vpop.f32.mrb[58].mxu0 }
 0x2bd   :  { %v2847_v62 = vmax.f32 %v2842_v59, 0.0  ;;  %v3847_v0 = vpop.f32.mrb[59].mxu0 }
 0x2bf   :  { %v2848_v14 = vpack.c.bf16 %v2847_v62, %v2847_v62 }
 0x2c1   :  { %3865 = vmatmul.mubr.bf16.vlgmr.msra.gmra.mrb[56].mxu1 %v2848_v14 }
 0x394   :  { %v2954_v4 = vpop.f32.mrb[56].mxu1 }
 0x395   :  { %v2955_v5 = vadd.f32 %v3359_v3, %v2954_v4  ;;  %v3866_v7 = vpop.f32.mrb[57].mxu1 }
 0x396   :  { %v2957_v8 = vpop.f32.mrb[58].mxu1 }
 0x397   :  { %v2960_v9 = vmax.f32 %v2955_v5, 0.0  ;;  %v3867_v10 = vpop.f32.mrb[59].mxu1 }
 0x399   :  { %v2961_v11 = vpack.c.bf16 %v2960_v9, %v2960_v9 }
 0x39b   :  { %3885 = vmatmul.mubr.bf16.vlgmr.msra.gmra.mrb[60].mxu0 %v2961_v11 }
 0x46e   :  { %v3067_v12 = vpop.f32.mrb[60].mxu0 }
 0x46f   :  { %v3068_v13 = vadd.f32 %v3368_v25, %v3067_v12  ;;  %v3886_v15 = vpop.f32.mrb[61].mxu0 }
 0x470   :  { %v3070_v41 = vpop.f32.mrb[62].mxu0 }
 0x471   :  { %3073 = vst [vmem:[#allocation2] sm:$0x3] %v3068_v13  ;;  %v3887_v16 = vpop.f32.mrb[63].mxu0 }
 0x472   :  { %4178 = shalt.err (!%p4175_p4)
}
 0x473   :  { %s4179_s8 = scalar_lea.hbm %s5237_s9, 32 }
 0x474   :  { %p4180_p5 = scmp.ne.s32.totalorder %s5237_s9, %s4179_s8  ;;  %p4183_p6 = scmp.lt.u32.totalorder %s4179_s8, %s5237_s9 }
 0x476   :  { %p4185_p7 = pnand %p4183_p6, %p4180_p5 }
 0x478   :  { %4188 = shalt.err (!%p4185_p7)
}
 0x479   :  { %3083 = dma.vmem_to_hbm [thread:$0]  %s3081_s15, 32, %s5237_s9, [#allocation3]  }
 0x47a   :  { %4189 = dma.done.wait [#allocation3], 32  }
 0x47b   :  { %4190 = vsyncadd [#allocation3], 4294967264 }
 0x47c   :  { %3087 = vsyncpa [#allocation3], 1 }

</bundles_post_ra>
